<compile_context>
chip_gen: v7x
topology: tpu7x:2x2x1
jax: 0.10.0
libtpu: 0.0.40
codegen_flags: <defaults>
</compile_context>

<pallas_src>
import functools

import jax
import jax.numpy as jnp
from jax.experimental import pallas as pl
from jax.experimental.pallas import tpu as pltpu

MXU_DTYPE = jnp.bfloat16          # MXU operand / activation-storage dtype.
VMEM_LIMIT = 32 * 1024 * 1024     # explicit scoped-VMEM limit for every call
VMEM_BUDGET = 12 * 1024 * 1024    # per-kernel working-set target (fits all gens)


def _round_up(x, m):
    return ((x + m - 1) // m) * m


# ----------------------------------------------------------------------------
# Char CNN kernel: dense matmul over pre-built im2col columns -> max -> tanh.
# Output filter axis is padded to a multiple of 128 => lane-dense stores.
# ----------------------------------------------------------------------------
def char_conv_kernel(x_ref, w_ref, b_ref, o_ref):
    # x_ref: (bn, T_out, K*Dc) bf16   w_ref: (K*Dc, Fpad) bf16
    # b_ref: (1, Fpad) f32            o_ref: (bn, Fpad) bf16
    acc = jax.lax.dot_general(x_ref[...], w_ref[...], (((2,), (0,)), ((), ())),
                              preferred_element_type=jnp.float32)
    # Bias after the max is equivalent to the pre-pool bias (time-invariant).
    o_ref[...] = jnp.tanh(jnp.max(acc, axis=1) + b_ref[...]).astype(o_ref.dtype)


def char_conv(cols, w2d, b):
    # cols: (N, T_out, K*Dc) bf16 im2col tensor (built in the wrapper / XLA).
    n, t_out, kdc = cols.shape
    f_pad = w2d.shape[1]

    def blk_bytes(bn_):
        return (2 * bn_ * t_out * kdc * 2 + 2 * kdc * f_pad * 2 + 2 * f_pad * 4
                + 2 * bn_ * f_pad * 2 + bn_ * t_out * f_pad * 4)

    bn = 512
    while bn > 8 and blk_bytes(bn) > VMEM_BUDGET:
        bn //= 2
    bn = max(8, min(bn, _round_up(n, 8)))
    n_pad = _round_up(n, bn)
    if n_pad != n:
        cols = jnp.pad(cols, ((0, n_pad - n), (0, 0), (0, 0)))

    out = pl.pallas_call(
        char_conv_kernel,
        out_shape=jax.ShapeDtypeStruct((n_pad, f_pad), MXU_DTYPE),
        grid_spec=pltpu.PrefetchScalarGridSpec(
            num_scalar_prefetch=0,
            grid=(n_pad // bn,),
            in_specs=[
                pl.BlockSpec((bn, t_out, kdc), lambda i: (i, 0, 0)),
                pl.BlockSpec(w2d.shape, lambda i: (0, 0)),
                pl.BlockSpec(b.shape, lambda i: (0, 0)),
            ],
            out_specs=pl.BlockSpec((bn, f_pad), lambda i: (i, 0)),
        ),
        compiler_params=pltpu.CompilerParams(
            dimension_semantics=("parallel",),
            vmem_limit_bytes=VMEM_LIMIT),
    )(cols, w2d, b)
    return out[:n]


# ----------------------------------------------------------------------------
# Gate projection: gx = sum_j X_j @ W_j + b, emitted in bf16.
# Takes a LIST of (L, B, D_j) inputs so the inter-layer concat (y_f | y_b) and
# the layer-0 concat (word | char) are fused into the matmul (row-split W_ih).
# ----------------------------------------------------------------------------
def _proj_kernel(*refs, n_in):
    xs = refs[:n_in]
    ws = refs[n_in:2 * n_in]
    b_ref = refs[2 * n_in]
    o_ref = refs[2 * n_in + 1]
    acc = jax.lax.dot_general(xs[0][...], ws[0][...], (((2,), (0,)), ((), ())),
                              preferred_element_type=jnp.float32)
    for j in range(1, n_in):
        acc = acc + jax.lax.dot_general(xs[j][...], ws[j][...],
                                        (((2,), (0,)), ((), ())),
                                        preferred_element_type=jnp.float32)
    o_ref[...] = (acc + b_ref[...]).astype(o_ref.dtype)


def gate_projection(xs, ws, b):
    # xs: list of (L, B, D_j) bf16;  ws: list of (D_j, G) bf16;  b: (1, G) f32
    seq_len, batch, _ = xs[0].shape
    g_dim = ws[0].shape[1]

    def blk_bytes(lb):
        bb = 0
        for x, w in zip(xs, ws):
            bb += 2 * lb * batch * x.shape[2] * 2
            bb += 2 * w.shape[0] * g_dim * 2
        bb += 2 * lb * batch * g_dim * 2      # bf16 out, double-buffered
        bb += lb * batch * g_dim * 4          # f32 accumulator
        return bb

    lblk = 1
    for cand in range(seq_len, 0, -1):
        if seq_len % cand == 0 and blk_bytes(cand) <= VMEM_BUDGET:
            lblk = cand
            break

    in_specs = ([pl.BlockSpec((lblk, batch, x.shape[2]), lambda i: (i, 0, 0))
                 for x in xs]
                + [pl.BlockSpec(w.shape, lambda i: (0, 0)) for w in ws]
                + [pl.BlockSpec(b.shape, lambda i: (0, 0))])
    out = pl.pallas_call(
        functools.partial(_proj_kernel, n_in=len(xs)),
        out_shape=jax.ShapeDtypeStruct((seq_len, batch, g_dim), MXU_DTYPE),
        grid_spec=pltpu.PrefetchScalarGridSpec(
            num_scalar_prefetch=0,
            grid=(seq_len // lblk,),
            in_specs=in_specs,
            out_specs=pl.BlockSpec((lblk, batch, g_dim), lambda i: (i, 0, 0)),
        ),
        compiler_params=pltpu.CompilerParams(
            dimension_semantics=("parallel",),
            vmem_limit_bytes=VMEM_LIMIT),
    )(*xs, *ws, b)
    return out


# ----------------------------------------------------------------------------
# Time-chunked bidirectional LSTM recurrence.
# gx layout along 8H lanes: [fwd 4H | bwd 4H], each 4H block ordered [i,f,o,g].
# gx is passed twice: fwd lanes at chunk i, bwd lanes at chunk nc-1-i (already
# reversed by the BlockSpec index_map).  h/c carries persist in VMEM scratch.
# ----------------------------------------------------------------------------
def bilstm_kernel(gxf_ref, gxb_ref, whf_ref, whb_ref,
                  yf_ref, yb_ref, hn_ref, cn_ref,
                  h_scr, c_scr, *, chunk, hidden, nc):
    i = pl.program_id(1)

    @pl.when(i == 0)
    def _():
        h_scr[...] = jnp.zeros_like(h_scr)
        c_scr[...] = jnp.zeros_like(c_scr)

    whf = whf_ref[...]                       # (H, 4H) bf16, hoisted
    whb = whb_ref[...]
    h3 = 3 * hidden

    def dir_step(gx_row, h, c, whh):
        gates = gx_row.astype(jnp.float32) + jnp.dot(
            h.astype(whh.dtype), whh, preferred_element_type=jnp.float32)
        sg = jax.nn.sigmoid(gates[:, :h3])           # contiguous [i,f,o] block
        gg = jnp.tanh(gates[:, h3:])                 # [g] block
        c_new = sg[:, hidden:2 * hidden] * c + sg[:, :hidden] * gg
        h_new = sg[:, 2 * hidden:h3] * jnp.tanh(c_new)
        return h_new, c_new

    def step(s, carry):
        hf, cf, hb, cb = carry
        sb = chunk - 1 - s                           # reversed local index
        hf, cf = dir_step(gxf_ref[s], hf, cf, whf)
        hb, cb = dir_step(gxb_ref[sb], hb, cb, whb)
        yf_ref[pl.ds(s, 1)] = hf[None].astype(yf_ref.dtype)
        yb_ref[pl.ds(sb, 1)] = hb[None].astype(yb_ref.dtype)
        return hf, cf, hb, cb

    carry0 = (h_scr[0], c_scr[0], h_scr[1], c_scr[1])
    hf, cf, hb, cb = jax.lax.fori_loop(
        0, chunk, step, carry0, unroll=chunk if chunk <= 8 else 8)

    h_scr[0] = hf
    h_scr[1] = hb
    c_scr[0] = cf
    c_scr[1] = cb

    @pl.when(i == nc - 1)
    def _():
        hn_ref[0] = hf
        hn_ref[1] = hb
        cn_ref[0] = cf
        cn_ref[1] = cb


def bilstm_run(gx, whh_f, whh_b, *, hidden):
    # gx: (L, B, 8H) bf16 precomputed gate pre-activations (x @ Wih + b).
    seq_len, batch, g8 = gx.shape
    assert g8 == 8 * hidden
    assert (4 * hidden) % 128 == 0, "hidden must be a multiple of 32"
    g4 = 4 * hidden

    # Megacore batch sharding (v7x): only when each half stays (8,·)-tileable.
    nb = 2 if batch % 16 == 0 else 1
    b_blk = batch // nb

    # Time chunk: largest divisor of L (<=256) whose working set fits budget.
    def chunk_bytes(tc_):
        bb = 2 * 2 * tc_ * b_blk * g4 * 2          # gx fwd+bwd blocks (bf16, x2 buf)
        bb += 2 * 2 * tc_ * b_blk * hidden * 2     # y fwd+bwd blocks
        bb += 2 * 2 * hidden * g4 * 2              # whh_f + whh_b
        bb += 2 * 2 * 2 * b_blk * hidden * 4       # h/c scratch + hn/cn blocks
        return bb

    chunk = 1
    for cand in range(min(seq_len, 256), 0, -1):
        if seq_len % cand == 0 and chunk_bytes(cand) <= VMEM_BUDGET:
            chunk = cand
            break
    nc = seq_len // chunk

    kernel = functools.partial(bilstm_kernel, chunk=chunk, hidden=hidden, nc=nc)
    y_f, y_b, hn, cn = pl.pallas_call(
        kernel,
        out_shape=(
            jax.ShapeDtypeStruct((seq_len, batch, hidden), MXU_DTYPE),
            jax.ShapeDtypeStruct((seq_len, batch, hidden), MXU_DTYPE),
            jax.ShapeDtypeStruct((2, batch, hidden), jnp.float32),
            jax.ShapeDtypeStruct((2, batch, hidden), jnp.float32),
        ),
        grid_spec=pltpu.PrefetchScalarGridSpec(
            num_scalar_prefetch=0,
            grid=(nb, nc),
            in_specs=[
                # forward-direction lanes, chunk i
                pl.BlockSpec((chunk, b_blk, g4), lambda b, i: (i, b, 0)),
                # backward-direction lanes, reversed chunk order (free addr math)
                pl.BlockSpec((chunk, b_blk, g4), lambda b, i: (nc - 1 - i, b, 1)),
                pl.BlockSpec((hidden, g4), lambda b, i: (0, 0)),
                pl.BlockSpec((hidden, g4), lambda b, i: (0, 0)),
            ],
            out_specs=[
                pl.BlockSpec((chunk, b_blk, hidden), lambda b, i: (i, b, 0)),
                pl.BlockSpec((chunk, b_blk, hidden), lambda b, i: (nc - 1 - i, b, 0)),
                pl.BlockSpec((2, b_blk, hidden), lambda b, i: (0, b, 0)),
                pl.BlockSpec((2, b_blk, hidden), lambda b, i: (0, b, 0)),
            ],
            scratch_shapes=[
                pltpu.VMEM((2, b_blk, hidden), jnp.float32),   # h carry [fwd,bwd]
                pltpu.VMEM((2, b_blk, hidden), jnp.float32),   # c carry [fwd,bwd]
            ]),
        compiler_params=pltpu.CompilerParams(
            dimension_semantics=("parallel", "arbitrary"),
            vmem_limit_bytes=VMEM_LIMIT),
    )(gx, gx, whh_f, whh_b)
    return y_f, y_b, hn, cn


# ----------------------------------------------------------------------------
# Parameter construction (PyTorch-style per-direction layout) + packing.
# PyTorch gate order inside 4H: [i, f, g, o]; kernel order: [i, f, o, g].
# ----------------------------------------------------------------------------
def _split_gates(w, h):
    return w[..., 0:h], w[..., h:2 * h], w[..., 2 * h:3 * h], w[..., 3 * h:4 * h]


def _reorder_ifgo_to_ifog(w, h):
    i, f, g, o = _split_gates(w, h)
    return jnp.concatenate([i, f, o, g], axis=-1)


def _pack_lstm_layer(p_fwd, p_bwd, hidden, in_splits):
    wih = jnp.concatenate([_reorder_ifgo_to_ifog(p_fwd["wih"], hidden),
                           _reorder_ifgo_to_ifog(p_bwd["wih"], hidden)], axis=-1)
    bias = jnp.concatenate([_reorder_ifgo_to_ifog(p_fwd["b"], hidden),
                            _reorder_ifgo_to_ifog(p_bwd["b"], hidden)], axis=-1)
    whh_f = _reorder_ifgo_to_ifog(p_fwd["whh"], hidden)
    whh_b = _reorder_ifgo_to_ifog(p_bwd["whh"], hidden)

    parts, row = [], 0
    for rows, pad_to in in_splits:
        wpart = wih[row:row + rows]
        if pad_to > rows:
            wpart = jnp.pad(wpart, ((0, pad_to - rows), (0, 0)))
        parts.append(wpart.astype(MXU_DTYPE))
        row += rows
    return {"w_parts": parts, "b": bias.astype(jnp.float32),
            "whh_f": whh_f.astype(MXU_DTYPE), "whh_b": whh_b.astype(MXU_DTYPE)}


def build_params(key, num_words, word_dim, num_chars, char_dim, num_filters,
                 kernel_size, hidden_size, rnn_layers):
    keys = jax.random.split(key, 4 + 4 * rnn_layers * 2)
    kit = iter(keys)
    scale = 0.1
    f_pad = _round_up(num_filters, 128)

    conv_w = scale * jax.random.normal(
        next(kit), (kernel_size, char_dim, num_filters), jnp.float32)
    w2d = conv_w.reshape(kernel_size * char_dim, num_filters)
    w2d = jnp.pad(w2d, ((0, 0), (0, f_pad - num_filters)))      # lane-dense F
    conv_b = scale * jax.random.normal(next(kit), (1, num_filters), jnp.float32)
    conv_b = jnp.pad(conv_b, ((0, 0), (0, f_pad - num_filters)))

    params = {
        "word_embed": scale * jax.random.normal(next(kit), (num_words, word_dim), jnp.float32),
        "char_embed": scale * jax.random.normal(next(kit), (num_chars, char_dim), jnp.float32),
        "conv_w2d": w2d.astype(MXU_DTYPE),
        "conv_b": conv_b,
        "f_pad": f_pad,
        "lstm": [],
    }

    d_in = word_dim + num_filters
    for layer in range(rnn_layers):
        dir_params = []
        for _ in range(2):  # forward, backward (PyTorch layout, gate order i,f,g,o)
            wih = scale * jax.random.normal(next(kit), (d_in, 4 * hidden_size), jnp.float32)
            whh = scale * jax.random.normal(next(kit), (hidden_size, 4 * hidden_size), jnp.float32)
            b_ih = scale * jax.random.normal(next(kit), (1, 4 * hidden_size), jnp.float32)
            b_hh = scale * jax.random.normal(next(kit), (1, 4 * hidden_size), jnp.float32)
            dir_params.append({"wih": wih, "whh": whh, "b": b_ih + b_hh})
        if layer == 0:
            in_splits = [(word_dim, word_dim), (num_filters, f_pad)]
        else:
            in_splits = [(hidden_size, hidden_size), (hidden_size, hidden_size)]
        params["lstm"].append(
            _pack_lstm_layer(dir_params[0], dir_params[1], hidden_size, in_splits))
        d_in = 2 * hidden_size
    return params


# ----------------------------------------------------------------------------
# Full forward pass (mask=None, length=None, hx=None path)
# ----------------------------------------------------------------------------
def transcription_forward(params, input_word, input_char, kernel_size,
                          hidden_size, rnn_layers):
    # Embedding gathers (glue).
    word = params["word_embed"][input_word]               # (B, L, Dw) f32
    char = params["char_embed"][input_char]               # (B, L, C, Dc) f32
    b, l, c, dc = char.shape

    # Char CNN: im2col built in XLA (lane-dense matmul operand).
    pad = kernel_size // 2
    x = char.reshape(b * l, c, dc)
    x_pad = jnp.pad(x, ((0, 0), (pad, pad), (0, 0))).astype(MXU_DTYPE)
    t_out = c + 2 * pad - kernel_size + 1
    cols = jnp.concatenate([x_pad[:, k:k + t_out, :] for k in range(kernel_size)],
                           axis=-1)                       # (B*L, T_out, K*Dc)
    char_feat = char_conv(cols, params["conv_w2d"], params["conv_b"])  # (B*L, Fpad) bf16
    f_pad = char_feat.shape[-1]

    # Time-major layer inputs; layer-0 word/char stay UNconcatenated (fused in proj).
    char_t = jnp.transpose(char_feat.reshape(b, l, f_pad), (1, 0, 2))  # (L, B, Fpad)
    word_t = jnp.transpose(word, (1, 0, 2)).astype(MXU_DTYPE)          # (L, B, Dw)

    xs = [word_t, char_t]
    h_list, c_list = [], []
    y_f = y_b = None
    for layer in range(rnn_layers):
        p = params["lstm"][layer]
        gx = gate_projection(xs, p["w_parts"], p["b"])     # (L, B, 8H) bf16
        y_f, y_b, hn, cn = bilstm_run(gx, p["whh_f"], p["whh_b"], hidden=hidden_size)
        h_list.append(hn)                                  # (2, B, H) -> [fwd, bwd]
        c_list.append(cn)
        xs = [y_f, y_b]                                    # next layer: fused concat

    output = jnp.concatenate([y_f, y_b], axis=-1).astype(jnp.float32)  # (L, B, 2H)
    output = jnp.transpose(output, (1, 0, 2))              # (B, L, 2H)
    h_n = jnp.concatenate(h_list, axis=0)                  # (layers*2, B, H)
    c_n = jnp.concatenate(c_list, axis=0)
    return output, (h_n, c_n), None, None


if __name__ == "__main__":
    # Small, module-consistent shapes.
    num_words, word_dim = 50, 16
    num_chars, char_dim = 30, 16
    num_filters, kernel_size = 16, 3
    hidden_size, rnn_layers = 32, 2
    batch, seq_len, char_len = 2, 8, 8

    key = jax.random.PRNGKey(0)
    k_params, k_word, k_char = jax.random.split(key, 3)

    params = build_params(k_params, num_words, word_dim, num_chars, char_dim,
                          num_filters, kernel_size, hidden_size, rnn_layers)

    input_word = jax.random.randint(k_word, (batch, seq_len), 0, num_words,
                                    dtype=jnp.int32)
    input_char = jax.random.randint(k_char, (batch, seq_len, char_len), 0,
                                    num_chars, dtype=jnp.int32)

    fwd = jax.jit(functools.partial(transcription_forward,
                                    kernel_size=kernel_size,
                                    hidden_size=hidden_size,
                                    rnn_layers=rnn_layers))
    output, (h_n, c_n), mask, length = fwd(params, input_word, input_char)
    jax.block_until_ready((output, h_n, c_n))

    assert output.shape == (batch, seq_len, 2 * hidden_size), output.shape
    assert h_n.shape == (rnn_layers * 2, batch, hidden_size), h_n.shape
    assert c_n.shape == (rnn_layers * 2, batch, hidden_size), c_n.shape
    assert bool(jnp.all(jnp.isfinite(output)))
    assert bool(jnp.all(jnp.isfinite(h_n)))
    assert bool(jnp.all(jnp.isfinite(c_n)))
    print("KERNEL_OK")
</pallas_src>

<mosaic_0001>
module attributes {stable_mosaic.version = 11 : i64} {
  func.func @char_conv_kernel(%arg0: i32, %arg1: memref<16x8x48xbf16, #tpu.memory_space<vmem>>, %arg2: memref<48x128xbf16, #tpu.memory_space<vmem>>, %arg3: memref<1x128xf32, #tpu.memory_space<vmem>>, %arg4: memref<16x128xbf16, #tpu.memory_space<vmem>>) attributes {dimension_semantics = [#tpu.dimension_semantics<parallel>], iteration_bounds = array<i64: 1>, scalar_prefetch = 0 : i64, scratch_operands = 0 : i64, tpu.core_type = #tpu.core_type<tc>, window_params = [{transform_indices = @transform_0, window_bounds = array<i64: 16, 8, 48>}, {pipeline_mode = #tpu.pipeline_mode<synchronous>, transform_indices = @transform_1, window_bounds = array<i64: 48, 128>}, {pipeline_mode = #tpu.pipeline_mode<synchronous>, transform_indices = @transform_2, window_bounds = array<i64: 1, 128>}, {transform_indices = @transform_3, window_bounds = array<i64: 16, 128>}]} {
    %c0 = arith.constant 0 : index
    %c0_0 = arith.constant 0 : index
    %c0_1 = arith.constant 0 : index
    %0 = vector.load %arg1[%c0, %c0_0, %c0_1] : memref<16x8x48xbf16, #tpu.memory_space<vmem>>, vector<16x8x48xbf16>
    %c0_2 = arith.constant 0 : index
    %c0_3 = arith.constant 0 : index
    %1 = vector.load %arg2[%c0_2, %c0_3] : memref<48x128xbf16, #tpu.memory_space<vmem>>, vector<48x128xbf16>
    %cst = arith.constant dense<0.000000e+00> : vector<16x8x128xf32>
    %2 = tpu.matmul %0, %1, %cst {dimension_numbers = #tpu.dot_dimension_numbers<[2], [0], [0, 1], [1], [0, 0, 0, 1, 1, 1], [], []>} : vector<16x8x48xbf16>, vector<48x128xbf16>, vector<16x8x128xf32> -> vector<16x8x128xf32>
    %cst_4 = arith.constant dense<0xFF800000> : vector<16x128xf32>
    %3 = vector.multi_reduction <maximumf>, %2, %cst_4 [1] : vector<16x8x128xf32> to vector<16x128xf32>
    %c0_5 = arith.constant 0 : index
    %c0_6 = arith.constant 0 : index
    %4 = vector.load %arg3[%c0_5, %c0_6] : memref<1x128xf32, #tpu.memory_space<vmem>>, vector<1x128xf32>
    %5 = vector.broadcast %4 : vector<1x128xf32> to vector<16x128xf32>
    %6 = arith.addf %3, %5 : vector<16x128xf32>
    %7 = math.tanh %6 : vector<16x128xf32>
    %8 = arith.truncf %7 : vector<16x128xf32> to vector<16x128xbf16>
    %c0_7 = arith.constant 0 : index
    %c0_8 = arith.constant 0 : index
    %9 = vector.load %arg4[%c0_7, %c0_8] : memref<16x128xbf16, #tpu.memory_space<vmem>>, vector<16x128xbf16>
    tpu.vector_store %arg4[%c0_7, %c0_8], %8 {strides = array<i32>} : memref<16x128xbf16, #tpu.memory_space<vmem>>, vector<16x128xbf16>,
    return
  }
  func.func @transform_0(%arg0: i32) -> (i32, i32, i32) {
    %c0_i32 = arith.constant 0 : i32
    %c0_i32_0 = arith.constant 0 : i32
    %c0_i32_1 = arith.constant 0 : i32
    return %arg0, %c0_i32, %c0_i32_0 : i32, i32, i32
  }
  func.func @transform_1(%arg0: i32) -> (i32, i32) {
    %c0_i32 = arith.constant 0 : i32
    %c0_i32_0 = arith.constant 0 : i32
    %c0_i32_1 = arith.constant 0 : i32
    return %c0_i32, %c0_i32_0 : i32, i32
  }
  func.func @transform_2(%arg0: i32) -> (i32, i32) {
    %c0_i32 = arith.constant 0 : i32
    %c0_i32_0 = arith.constant 0 : i32
    %c0_i32_1 = arith.constant 0 : i32
    return %c0_i32, %c0_i32_0 : i32, i32
  }
  func.func @transform_3(%arg0: i32) -> (i32, i32) {
    %c0_i32 = arith.constant 0 : i32
    %c0_i32_0 = arith.constant 0 : i32
    return %arg0, %c0_i32 : i32, i32
  }
}

module attributes {stable_mosaic.version = 11 : i64} {
  func.func @_proj_kernel(%arg0: i32, %arg1: memref<8x2x16xbf16, #tpu.memory_space<vmem>>, %arg2: memref<8x2x128xbf16, #tpu.memory_space<vmem>>, %arg3: memref<16x256xbf16, #tpu.memory_space<vmem>>, %arg4: memref<128x256xbf16, #tpu.memory_space<vmem>>, %arg5: memref<1x256xf32, #tpu.memory_space<vmem>>, %arg6: memref<8x2x256xbf16, #tpu.memory_space<vmem>>) attributes {dimension_semantics = [#tpu.dimension_semantics<parallel>], iteration_bounds = array<i64: 1>, scalar_prefetch = 0 : i64, scratch_operands = 0 : i64, tpu.core_type = #tpu.core_type<tc>, window_params = [{transform_indices = @transform_0, window_bounds = array<i64: 8, 2, 16>}, {transform_indices = @transform_1, window_bounds = array<i64: 8, 2, 128>}, {pipeline_mode = #tpu.pipeline_mode<synchronous>, transform_indices = @transform_2, window_bounds = array<i64: 16, 256>}, {pipeline_mode = #tpu.pipeline_mode<synchronous>, transform_indices = @transform_3, window_bounds = array<i64: 128, 256>}, {pipeline_mode = #tpu.pipeline_mode<synchronous>, transform_indices = @transform_4, window_bounds = array<i64: 1, 256>}, {transform_indices = @transform_5, window_bounds = array<i64: 8, 2, 256>}]} {
    %c0 = arith.constant 0 : index
    %c0_0 = arith.constant 0 : index
    %c0_1 = arith.constant 0 : index
    %0 = vector.load %arg1[%c0, %c0_0, %c0_1] : memref<8x2x16xbf16, #tpu.memory_space<vmem>>, vector<8x2x16xbf16>
    %c0_2 = arith.constant 0 : index
    %c0_3 = arith.constant 0 : index
    %1 = vector.load %arg3[%c0_2, %c0_3] : memref<16x256xbf16, #tpu.memory_space<vmem>>, vector<16x256xbf16>
    %cst = arith.constant dense<0.000000e+00> : vector<8x2x256xf32>
    %2 = tpu.matmul %0, %1, %cst {dimension_numbers = #tpu.dot_dimension_numbers<[2], [0], [0, 1], [1], [0, 0, 0, 1, 1, 1], [], []>} : vector<8x2x16xbf16>, vector<16x256xbf16>, vector<8x2x256xf32> -> vector<8x2x256xf32>
    %c0_4 = arith.constant 0 : index
    %c0_5 = arith.constant 0 : index
    %c0_6 = arith.constant 0 : index
    %3 = vector.load %arg2[%c0_4, %c0_5, %c0_6] : memref<8x2x128xbf16, #tpu.memory_space<vmem>>, vector<8x2x128xbf16>
    %c0_7 = arith.constant 0 : index
    %c0_8 = arith.constant 0 : index
    %4 = vector.load %arg4[%c0_7, %c0_8] : memref<128x256xbf16, #tpu.memory_space<vmem>>, vector<128x256xbf16>
    %cst_9 = arith.constant dense<0.000000e+00> : vector<8x2x256xf32>
    %5 = tpu.matmul %3, %4, %cst_9 {dimension_numbers = #tpu.dot_dimension_numbers<[2], [0], [0, 1], [1], [0, 0, 0, 1, 1, 1], [], []>} : vector<8x2x128xbf16>, vector<128x256xbf16>, vector<8x2x256xf32> -> vector<8x2x256xf32>
    %6 = arith.addf %2, %5 : vector<8x2x256xf32>
    %c0_10 = arith.constant 0 : index
    %c0_11 = arith.constant 0 : index
    %7 = vector.load %arg5[%c0_10, %c0_11] : memref<1x256xf32, #tpu.memory_space<vmem>>, vector<1x256xf32>
    %8 = vector.shape_cast %7 : vector<1x256xf32> to vector<1x1x256xf32>
    %9 = vector.broadcast %8 : vector<1x1x256xf32> to vector<8x2x256xf32>
    %10 = arith.addf %6, %9 : vector<8x2x256xf32>
    %11 = arith.truncf %10 : vector<8x2x256xf32> to vector<8x2x256xbf16>
    %c0_12 = arith.constant 0 : index
    %c0_13 = arith.constant 0 : index
    %c0_14 = arith.constant 0 : index
    %12 = vector.load %arg6[%c0_12, %c0_13, %c0_14] : memref<8x2x256xbf16, #tpu.memory_space<vmem>>, vector<8x2x256xbf16>
    tpu.vector_store %arg6[%c0_12, %c0_13, %c0_14], %11 {strides = array<i32>} : memref<8x2x256xbf16, #tpu.memory_space<vmem>>, vector<8x2x256xbf16>,
    return
  }
  func.func @transform_0(%arg0: i32) -> (i32, i32, i32) {
    %c0_i32 = arith.constant 0 : i32
    %c0_i32_0 = arith.constant 0 : i32
    %c0_i32_1 = arith.constant 0 : i32
    return %arg0, %c0_i32, %c0_i32_0 : i32, i32, i32
  }
  func.func @transform_1(%arg0: i32) -> (i32, i32, i32) {
    %c0_i32 = arith.constant 0 : i32
    %c0_i32_0 = arith.constant 0 : i32
    %c0_i32_1 = arith.constant 0 : i32
    return %arg0, %c0_i32, %c0_i32_0 : i32, i32, i32
  }
  func.func @transform_2(%arg0: i32) -> (i32, i32) {
    %c0_i32 = arith.constant 0 : i32
    %c0_i32_0 = arith.constant 0 : i32
    %c0_i32_1 = arith.constant 0 : i32
    return %c0_i32, %c0_i32_0 : i32, i32
  }
  func.func @transform_3(%arg0: i32) -> (i32, i32) {
    %c0_i32 = arith.constant 0 : i32
    %c0_i32_0 = arith.constant 0 : i32
    %c0_i32_1 = arith.constant 0 : i32
    return %c0_i32, %c0_i32_0 : i32, i32
  }
  func.func @transform_4(%arg0: i32) -> (i32, i32) {
    %c0_i32 = arith.constant 0 : i32
    %c0_i32_0 = arith.constant 0 : i32
    %c0_i32_1 = arith.constant 0 : i32
    return %c0_i32, %c0_i32_0 : i32, i32
  }
  func.func @transform_5(%arg0: i32) -> (i32, i32, i32) {
    %c0_i32 = arith.constant 0 : i32
    %c0_i32_0 = arith.constant 0 : i32
    %c0_i32_1 = arith.constant 0 : i32
    return %arg0, %c0_i32, %c0_i32_0 : i32, i32, i32
  }
}

module attributes {stable_mosaic.version = 11 : i64} {
  func.func @_proj_kernel(%arg0: i32, %arg1: memref<8x2x32xbf16, #tpu.memory_space<vmem>>, %arg2: memref<8x2x32xbf16, #tpu.memory_space<vmem>>, %arg3: memref<32x256xbf16, #tpu.memory_space<vmem>>, %arg4: memref<32x256xbf16, #tpu.memory_space<vmem>>, %arg5: memref<1x256xf32, #tpu.memory_space<vmem>>, %arg6: memref<8x2x256xbf16, #tpu.memory_space<vmem>>) attributes {dimension_semantics = [#tpu.dimension_semantics<parallel>], iteration_bounds = array<i64: 1>, scalar_prefetch = 0 : i64, scratch_operands = 0 : i64, tpu.core_type = #tpu.core_type<tc>, window_params = [{transform_indices = @transform_0, window_bounds = array<i64: 8, 2, 32>}, {transform_indices = @transform_1, window_bounds = array<i64: 8, 2, 32>}, {pipeline_mode = #tpu.pipeline_mode<synchronous>, transform_indices = @transform_2, window_bounds = array<i64: 32, 256>}, {pipeline_mode = #tpu.pipeline_mode<synchronous>, transform_indices = @transform_3, window_bounds = array<i64: 32, 256>}, {pipeline_mode = #tpu.pipeline_mode<synchronous>, transform_indices = @transform_4, window_bounds = array<i64: 1, 256>}, {transform_indices = @transform_5, window_bounds = array<i64: 8, 2, 256>}]} {
    %c0 = arith.constant 0 : index
    %c0_0 = arith.constant 0 : index
    %c0_1 = arith.constant 0 : index
    %0 = vector.load %arg1[%c0, %c0_0, %c0_1] : memref<8x2x32xbf16, #tpu.memory_space<vmem>>, vector<8x2x32xbf16>
    %c0_2 = arith.constant 0 : index
    %c0_3 = arith.constant 0 : index
    %1 = vector.load %arg3[%c0_2, %c0_3] : memref<32x256xbf16, #tpu.memory_space<vmem>>, vector<32x256xbf16>
    %cst = arith.constant dense<0.000000e+00> : vector<8x2x256xf32>
    %2 = tpu.matmul %0, %1, %cst {dimension_numbers = #tpu.dot_dimension_numbers<[2], [0], [0, 1], [1], [0, 0, 0, 1, 1, 1], [], []>} : vector<8x2x32xbf16>, vector<32x256xbf16>, vector<8x2x256xf32> -> vector<8x2x256xf32>
    %c0_4 = arith.constant 0 : index
    %c0_5 = arith.constant 0 : index
    %c0_6 = arith.constant 0 : index
    %3 = vector.load %arg2[%c0_4, %c0_5, %c0_6] : memref<8x2x32xbf16, #tpu.memory_space<vmem>>, vector<8x2x32xbf16>
    %c0_7 = arith.constant 0 : index
    %c0_8 = arith.constant 0 : index
    %4 = vector.load %arg4[%c0_7, %c0_8] : memref<32x256xbf16, #tpu.memory_space<vmem>>, vector<32x256xbf16>
    %cst_9 = arith.constant dense<0.000000e+00> : vector<8x2x256xf32>
    %5 = tpu.matmul %3, %4, %cst_9 {dimension_numbers = #tpu.dot_dimension_numbers<[2], [0], [0, 1], [1], [0, 0, 0, 1, 1, 1], [], []>} : vector<8x2x32xbf16>, vector<32x256xbf16>, vector<8x2x256xf32> -> vector<8x2x256xf32>
    %6 = arith.addf %2, %5 : vector<8x2x256xf32>
    %c0_10 = arith.constant 0 : index
    %c0_11 = arith.constant 0 : index
    %7 = vector.load %arg5[%c0_10, %c0_11] : memref<1x256xf32, #tpu.memory_space<vmem>>, vector<1x256xf32>
    %8 = vector.shape_cast %7 : vector<1x256xf32> to vector<1x1x256xf32>
    %9 = vector.broadcast %8 : vector<1x1x256xf32> to vector<8x2x256xf32>
    %10 = arith.addf %6, %9 : vector<8x2x256xf32>
    %11 = arith.truncf %10 : vector<8x2x256xf32> to vector<8x2x256xbf16>
    %c0_12 = arith.constant 0 : index
    %c0_13 = arith.constant 0 : index
    %c0_14 = arith.constant 0 : index
    %12 = vector.load %arg6[%c0_12, %c0_13, %c0_14] : memref<8x2x256xbf16, #tpu.memory_space<vmem>>, vector<8x2x256xbf16>
    tpu.vector_store %arg6[%c0_12, %c0_13, %c0_14], %11 {strides = array<i32>} : memref<8x2x256xbf16, #tpu.memory_space<vmem>>, vector<8x2x256xbf16>,
    return
  }
  func.func @transform_0(%arg0: i32) -> (i32, i32, i32) {
    %c0_i32 = arith.constant 0 : i32
    %c0_i32_0 = arith.constant 0 : i32
    %c0_i32_1 = arith.constant 0 : i32
    return %arg0, %c0_i32, %c0_i32_0 : i32, i32, i32
  }
  func.func @transform_1(%arg0: i32) -> (i32, i32, i32) {
    %c0_i32 = arith.constant 0 : i32
    %c0_i32_0 = arith.constant 0 : i32
    %c0_i32_1 = arith.constant 0 : i32
    return %arg0, %c0_i32, %c0_i32_0 : i32, i32, i32
  }
  func.func @transform_2(%arg0: i32) -> (i32, i32) {
    %c0_i32 = arith.constant 0 : i32
    %c0_i32_0 = arith.constant 0 : i32
    %c0_i32_1 = arith.constant 0 : i32
    return %c0_i32, %c0_i32_0 : i32, i32
  }
  func.func @transform_3(%arg0: i32) -> (i32, i32) {
    %c0_i32 = arith.constant 0 : i32
    %c0_i32_0 = arith.constant 0 : i32
    %c0_i32_1 = arith.constant 0 : i32
    return %c0_i32, %c0_i32_0 : i32, i32
  }
  func.func @transform_4(%arg0: i32) -> (i32, i32) {
    %c0_i32 = arith.constant 0 : i32
    %c0_i32_0 = arith.constant 0 : i32
    %c0_i32_1 = arith.constant 0 : i32
    return %c0_i32, %c0_i32_0 : i32, i32
  }
  func.func @transform_5(%arg0: i32) -> (i32, i32, i32) {
    %c0_i32 = arith.constant 0 : i32
    %c0_i32_0 = arith.constant 0 : i32
    %c0_i32_1 = arith.constant 0 : i32
    return %arg0, %c0_i32, %c0_i32_0 : i32, i32, i32
  }
}

module attributes {stable_mosaic.version = 11 : i64} {
  func.func @bilstm_kernel(%arg0: i32, %arg1: i32, %arg2: memref<8x2x128xbf16, #tpu.memory_space<vmem>>, %arg3: memref<8x2x128xbf16, #tpu.memory_space<vmem>>, %arg4: memref<32x128xbf16, #tpu.memory_space<vmem>>, %arg5: memref<32x128xbf16, #tpu.memory_space<vmem>>, %arg6: memref<8x2x32xbf16, #tpu.memory_space<vmem>>, %arg7: memref<8x2x32xbf16, #tpu.memory_space<vmem>>, %arg8: memref<2x2x32xf32, #tpu.memory_space<vmem>>, %arg9: memref<2x2x32xf32, #tpu.memory_space<vmem>>, %arg10: memref<2x2x32xf32, #tpu.memory_space<vmem>>, %arg11: memref<2x2x32xf32, #tpu.memory_space<vmem>>) attributes {dimension_semantics = [#tpu.dimension_semantics<parallel>, #tpu.dimension_semantics<arbitrary>], iteration_bounds = array<i64: 1, 1>, scalar_prefetch = 0 : i64, scratch_operands = 2 : i64, tpu.core_type = #tpu.core_type<tc>, window_params = [{transform_indices = @transform_0, window_bounds = array<i64: 8, 2, 128>}, {transform_indices = @transform_1, window_bounds = array<i64: 8, 2, 128>}, {pipeline_mode = #tpu.pipeline_mode<synchronous>, transform_indices = @transform_2, window_bounds = array<i64: 32, 128>}, {pipeline_mode = #tpu.pipeline_mode<synchronous>, transform_indices = @transform_3, window_bounds = array<i64: 32, 128>}, {transform_indices = @transform_4, window_bounds = array<i64: 8, 2, 32>}, {transform_indices = @transform_5, window_bounds = array<i64: 8, 2, 32>}, {transform_indices = @transform_6, window_bounds = array<i64: 2, 2, 32>}, {transform_indices = @transform_7, window_bounds = array<i64: 2, 2, 32>}]} {
    %c0_i32 = arith.constant 0 : i32
    %0 = arith.cmpi eq, %arg1, %c0_i32 : i32
    %1 = arith.extui %0 : i1 to i32
    %c0_i32_0 = arith.constant 0 : i32
    %2 = arith.cmpi ne, %1, %c0_i32_0 : i32
    scf.if %2 {
      %cst_133 = arith.constant 0.000000e+00 : f32
      %468 = vector.broadcast %cst_133 : f32 to vector<2x2x32xf32>
      %c0_134 = arith.constant 0 : index
      %c0_135 = arith.constant 0 : index
      %c0_136 = arith.constant 0 : index
      %469 = vector.load %arg10[%c0_134, %c0_135, %c0_136] : memref<2x2x32xf32, #tpu.memory_space<vmem>>, vector<2x2x32xf32>
      tpu.vector_store %arg10[%c0_134, %c0_135, %c0_136], %468 {strides = array<i32>} : memref<2x2x32xf32, #tpu.memory_space<vmem>>, vector<2x2x32xf32>,
      %cst_137 = arith.constant 0.000000e+00 : f32
      %470 = vector.broadcast %cst_137 : f32 to vector<2x2x32xf32>
      %c0_138 = arith.constant 0 : index
      %c0_139 = arith.constant 0 : index
      %c0_140 = arith.constant 0 : index
      %471 = vector.load %arg11[%c0_138, %c0_139, %c0_140] : memref<2x2x32xf32, #tpu.memory_space<vmem>>, vector<2x2x32xf32>
      tpu.vector_store %arg11[%c0_138, %c0_139, %c0_140], %470 {strides = array<i32>} : memref<2x2x32xf32, #tpu.memory_space<vmem>>, vector<2x2x32xf32>,
    } else {
    }
    %c0 = arith.constant 0 : index
    %c0_1 = arith.constant 0 : index
    %3 = vector.load %arg4[%c0, %c0_1] : memref<32x128xbf16, #tpu.memory_space<vmem>>, vector<32x128xbf16>
    %c0_2 = arith.constant 0 : index
    %c0_3 = arith.constant 0 : index
    %4 = vector.load %arg5[%c0_2, %c0_3] : memref<32x128xbf16, #tpu.memory_space<vmem>>, vector<32x128xbf16>
    %c0_4 = arith.constant 0 : index
    %c0_5 = arith.constant 0 : index
    %c0_6 = arith.constant 0 : index
    %5 = vector.load %arg10[%c0_4, %c0_5, %c0_6] : memref<2x2x32xf32, #tpu.memory_space<vmem>>, vector<1x2x32xf32>
    %6 = vector.shape_cast %5 : vector<1x2x32xf32> to vector<2x32xf32>
    %c0_7 = arith.constant 0 : index
    %c0_8 = arith.constant 0 : index
    %c0_9 = arith.constant 0 : index
    %7 = vector.load %arg11[%c0_7, %c0_8, %c0_9] : memref<2x2x32xf32, #tpu.memory_space<vmem>>, vector<1x2x32xf32>
    %8 = vector.shape_cast %7 : vector<1x2x32xf32> to vector<2x32xf32>
    %c1 = arith.constant 1 : index
    %c0_10 = arith.constant 0 : index
    %c0_11 = arith.constant 0 : index
    %9 = vector.load %arg10[%c1, %c0_10, %c0_11] : memref<2x2x32xf32, #tpu.memory_space<vmem>>, vector<1x2x32xf32>
    %10 = vector.shape_cast %9 : vector<1x2x32xf32> to vector<2x32xf32>
    %c1_12 = arith.constant 1 : index
    %c0_13 = arith.constant 0 : index
    %c0_14 = arith.constant 0 : index
    %11 = vector.load %arg11[%c1_12, %c0_13, %c0_14] : memref<2x2x32xf32, #tpu.memory_space<vmem>>, vector<1x2x32xf32>
    %12 = vector.shape_cast %11 : vector<1x2x32xf32> to vector<2x32xf32>
    %c0_i32_15 = arith.constant 0 : i32
    %c7_i32 = arith.constant 7 : i32
    %13 = arith.subi %c7_i32, %c0_i32_15 : i32
    %14 = arith.index_cast %c0_i32_15 : i32 to index
    %c0_16 = arith.constant 0 : index
    %c0_17 = arith.constant 0 : index
    %15 = vector.load %arg2[%14, %c0_16, %c0_17] : memref<8x2x128xbf16, #tpu.memory_space<vmem>>, vector<1x2x128xbf16>
    %16 = vector.shape_cast %15 : vector<1x2x128xbf16> to vector<2x128xbf16>
    %17 = arith.extf %16 : vector<2x128xbf16> to vector<2x128xf32>
    %18 = arith.truncf %6 : vector<2x32xf32> to vector<2x32xbf16>
    %cst = arith.constant dense<0.000000e+00> : vector<2x128xf32>
    %19 = tpu.matmul %18, %3, %cst {dimension_numbers = #tpu.dot_dimension_numbers<[1], [0], [0], [1], [0, 0, 1, 1], [], []>} : vector<2x32xbf16>, vector<32x128xbf16>, vector<2x128xf32> -> vector<2x128xf32>
    %20 = arith.addf %17, %19 : vector<2x128xf32>
    %21 = vector.extract_strided_slice %20 {offsets = [0, 0], sizes = [2, 96], strides = [1, 1]} : vector<2x128xf32> to vector<2x96xf32>
    %22 = arith.negf %21 : vector<2x96xf32>
    %23 = math.exp %22 : vector<2x96xf32>
    %cst_18 = arith.constant 1.000000e+00 : f32
    %24 = vector.broadcast %cst_18 : f32 to vector<2x96xf32>
    %25 = arith.addf %24, %23 : vector<2x96xf32>
    %26 = arith.divf %24, %25 : vector<2x96xf32>
    %27 = vector.extract_strided_slice %20 {offsets = [0, 96], sizes = [2, 32], strides = [1, 1]} : vector<2x128xf32> to vector<2x32xf32>
    %28 = math.tanh %27 : vector<2x32xf32>
    %29 = vector.extract_strided_slice %26 {offsets = [0, 32], sizes = [2, 32], strides = [1, 1]} : vector<2x96xf32> to vector<2x32xf32>
    %30 = arith.mulf %29, %8 : vector<2x32xf32>
    %31 = vector.extract_strided_slice %26 {offsets = [0, 0], sizes = [2, 32], strides = [1, 1]} : vector<2x96xf32> to vector<2x32xf32>
    %32 = arith.mulf %31, %28 : vector<2x32xf32>
    %33 = arith.addf %30, %32 : vector<2x32xf32>
    %34 = vector.extract_strided_slice %26 {offsets = [0, 64], sizes = [2, 32], strides = [1, 1]} : vector<2x96xf32> to vector<2x32xf32>
    %35 = math.tanh %33 : vector<2x32xf32>
    %36 = arith.mulf %34, %35 : vector<2x32xf32>
    %37 = arith.index_cast %13 : i32 to index
    %c0_19 = arith.constant 0 : index
    %c0_20 = arith.constant 0 : index
    %38 = vector.load %arg3[%37, %c0_19, %c0_20] : memref<8x2x128xbf16, #tpu.memory_space<vmem>>, vector<1x2x128xbf16>
    %39 = vector.shape_cast %38 : vector<1x2x128xbf16> to vector<2x128xbf16>
    %40 = arith.extf %39 : vector<2x128xbf16> to vector<2x128xf32>
    %41 = arith.truncf %10 : vector<2x32xf32> to vector<2x32xbf16>
    %cst_21 = arith.constant dense<0.000000e+00> : vector<2x128xf32>
    %42 = tpu.matmul %41, %4, %cst_21 {dimension_numbers = #tpu.dot_dimension_numbers<[1], [0], [0], [1], [0, 0, 1, 1], [], []>} : vector<2x32xbf16>, vector<32x128xbf16>, vector<2x128xf32> -> vector<2x128xf32>
    %43 = arith.addf %40, %42 : vector<2x128xf32>
    %44 = vector.extract_strided_slice %43 {offsets = [0, 0], sizes = [2, 96], strides = [1, 1]} : vector<2x128xf32> to vector<2x96xf32>
    %45 = arith.negf %44 : vector<2x96xf32>
    %46 = math.exp %45 : vector<2x96xf32>
    %cst_22 = arith.constant 1.000000e+00 : f32
    %47 = vector.broadcast %cst_22 : f32 to vector<2x96xf32>
    %48 = arith.addf %47, %46 : vector<2x96xf32>
    %49 = arith.divf %47, %48 : vector<2x96xf32>
    %50 = vector.extract_strided_slice %43 {offsets = [0, 96], sizes = [2, 32], strides = [1, 1]} : vector<2x128xf32> to vector<2x32xf32>
    %51 = math.tanh %50 : vector<2x32xf32>
    %52 = vector.extract_strided_slice %49 {offsets = [0, 32], sizes = [2, 32], strides = [1, 1]} : vector<2x96xf32> to vector<2x32xf32>
    %53 = arith.mulf %52, %12 : vector<2x32xf32>
    %54 = vector.extract_strided_slice %49 {offsets = [0, 0], sizes = [2, 32], strides = [1, 1]} : vector<2x96xf32> to vector<2x32xf32>
    %55 = arith.mulf %54, %51 : vector<2x32xf32>
    %56 = arith.addf %53, %55 : vector<2x32xf32>
    %57 = vector.extract_strided_slice %49 {offsets = [0, 64], sizes = [2, 32], strides = [1, 1]} : vector<2x96xf32> to vector<2x32xf32>
    %58 = math.tanh %56 : vector<2x32xf32>
    %59 = arith.mulf %57, %58 : vector<2x32xf32>
    %60 = vector.shape_cast %36 : vector<2x32xf32> to vector<1x2x32xf32>
    %61 = arith.truncf %60 : vector<1x2x32xf32> to vector<1x2x32xbf16>
    %62 = arith.index_cast %c0_i32_15 : i32 to index
    %c0_23 = arith.constant 0 : index
    %c0_24 = arith.constant 0 : index
    %63 = vector.load %arg6[%62, %c0_23, %c0_24] : memref<8x2x32xbf16, #tpu.memory_space<vmem>>, vector<1x2x32xbf16>
    tpu.vector_store %arg6[%62, %c0_23, %c0_24], %61 {strides = array<i32>} : memref<8x2x32xbf16, #tpu.memory_space<vmem>>, vector<1x2x32xbf16>,
    %64 = vector.shape_cast %59 : vector<2x32xf32> to vector<1x2x32xf32>
    %65 = arith.truncf %64 : vector<1x2x32xf32> to vector<1x2x32xbf16>
    %66 = arith.index_cast %13 : i32 to index
    %c0_25 = arith.constant 0 : index
    %c0_26 = arith.constant 0 : index
    %67 = vector.load %arg7[%66, %c0_25, %c0_26] : memref<8x2x32xbf16, #tpu.memory_space<vmem>>, vector<1x2x32xbf16>
    tpu.vector_store %arg7[%66, %c0_25, %c0_26], %65 {strides = array<i32>} : memref<8x2x32xbf16, #tpu.memory_space<vmem>>, vector<1x2x32xbf16>,
    %c1_i32 = arith.constant 1 : i32
    %c7_i32_27 = arith.constant 7 : i32
    %68 = arith.subi %c7_i32_27, %c1_i32 : i32
    %69 = arith.index_cast %c1_i32 : i32 to index
    %c0_28 = arith.constant 0 : index
    %c0_29 = arith.constant 0 : index
    %70 = vector.load %arg2[%69, %c0_28, %c0_29] : memref<8x2x128xbf16, #tpu.memory_space<vmem>>, vector<1x2x128xbf16>
    %71 = vector.shape_cast %70 : vector<1x2x128xbf16> to vector<2x128xbf16>
    %72 = arith.extf %71 : vector<2x128xbf16> to vector<2x128xf32>
    %73 = arith.truncf %36 : vector<2x32xf32> to vector<2x32xbf16>
    %cst_30 = arith.constant dense<0.000000e+00> : vector<2x128xf32>
    %74 = tpu.matmul %73, %3, %cst_30 {dimension_numbers = #tpu.dot_dimension_numbers<[1], [0], [0], [1], [0, 0, 1, 1], [], []>} : vector<2x32xbf16>, vector<32x128xbf16>, vector<2x128xf32> -> vector<2x128xf32>
    %75 = arith.addf %72, %74 : vector<2x128xf32>
    %76 = vector.extract_strided_slice %75 {offsets = [0, 0], sizes = [2, 96], strides = [1, 1]} : vector<2x128xf32> to vector<2x96xf32>
    %77 = arith.negf %76 : vector<2x96xf32>
    %78 = math.exp %77 : vector<2x96xf32>
    %cst_31 = arith.constant 1.000000e+00 : f32
    %79 = vector.broadcast %cst_31 : f32 to vector<2x96xf32>
    %80 = arith.addf %79, %78 : vector<2x96xf32>
    %81 = arith.divf %79, %80 : vector<2x96xf32>
    %82 = vector.extract_strided_slice %75 {offsets = [0, 96], sizes = [2, 32], strides = [1, 1]} : vector<2x128xf32> to vector<2x32xf32>
    %83 = math.tanh %82 : vector<2x32xf32>
    %84 = vector.extract_strided_slice %81 {offsets = [0, 32], sizes = [2, 32], strides = [1, 1]} : vector<2x96xf32> to vector<2x32xf32>
    %85 = arith.mulf %84, %33 : vector<2x32xf32>
    %86 = vector.extract_strided_slice %81 {offsets = [0, 0], sizes = [2, 32], strides = [1, 1]} : vector<2x96xf32> to vector<2x32xf32>
    %87 = arith.mulf %86, %83 : vector<2x32xf32>
    %88 = arith.addf %85, %87 : vector<2x32xf32>
    %89 = vector.extract_strided_slice %81 {offsets = [0, 64], sizes = [2, 32], strides = [1, 1]} : vector<2x96xf32> to vector<2x32xf32>
    %90 = math.tanh %88 : vector<2x32xf32>
    %91 = arith.mulf %89, %90 : vector<2x32xf32>
    %92 = arith.index_cast %68 : i32 to index
    %c0_32 = arith.constant 0 : index
    %c0_33 = arith.constant 0 : index
    %93 = vector.load %arg3[%92, %c0_32, %c0_33] : memref<8x2x128xbf16, #tpu.memory_space<vmem>>, vector<1x2x128xbf16>
    %94 = vector.shape_cast %93 : vector<1x2x128xbf16> to vector<2x128xbf16>
    %95 = arith.extf %94 : vector<2x128xbf16> to vector<2x128xf32>
    %96 = arith.truncf %59 : vector<2x32xf32> to vector<2x32xbf16>
    %cst_34 = arith.constant dense<0.000000e+00> : vector<2x128xf32>
    %97 = tpu.matmul %96, %4, %cst_34 {dimension_numbers = #tpu.dot_dimension_numbers<[1], [0], [0], [1], [0, 0, 1, 1], [], []>} : vector<2x32xbf16>, vector<32x128xbf16>, vector<2x128xf32> -> vector<2x128xf32>
    %98 = arith.addf %95, %97 : vector<2x128xf32>
    %99 = vector.extract_strided_slice %98 {offsets = [0, 0], sizes = [2, 96], strides = [1, 1]} : vector<2x128xf32> to vector<2x96xf32>
    %100 = arith.negf %99 : vector<2x96xf32>
    %101 = math.exp %100 : vector<2x96xf32>
    %cst_35 = arith.constant 1.000000e+00 : f32
    %102 = vector.broadcast %cst_35 : f32 to vector<2x96xf32>
    %103 = arith.addf %102, %101 : vector<2x96xf32>
    %104 = arith.divf %102, %103 : vector<2x96xf32>
    %105 = vector.extract_strided_slice %98 {offsets = [0, 96], sizes = [2, 32], strides = [1, 1]} : vector<2x128xf32> to vector<2x32xf32>
    %106 = math.tanh %105 : vector<2x32xf32>
    %107 = vector.extract_strided_slice %104 {offsets = [0, 32], sizes = [2, 32], strides = [1, 1]} : vector<2x96xf32> to vector<2x32xf32>
    %108 = arith.mulf %107, %56 : vector<2x32xf32>
    %109 = vector.extract_strided_slice %104 {offsets = [0, 0], sizes = [2, 32], strides = [1, 1]} : vector<2x96xf32> to vector<2x32xf32>
    %110 = arith.mulf %109, %106 : vector<2x32xf32>
    %111 = arith.addf %108, %110 : vector<2x32xf32>
    %112 = vector.extract_strided_slice %104 {offsets = [0, 64], sizes = [2, 32], strides = [1, 1]} : vector<2x96xf32> to vector<2x32xf32>
    %113 = math.tanh %111 : vector<2x32xf32>
    %114 = arith.mulf %112, %113 : vector<2x32xf32>
    %115 = vector.shape_cast %91 : vector<2x32xf32> to vector<1x2x32xf32>
    %116 = arith.truncf %115 : vector<1x2x32xf32> to vector<1x2x32xbf16>
    %117 = arith.index_cast %c1_i32 : i32 to index
    %c0_36 = arith.constant 0 : index
    %c0_37 = arith.constant 0 : index
    %118 = vector.load %arg6[%117, %c0_36, %c0_37] : memref<8x2x32xbf16, #tpu.memory_space<vmem>>, vector<1x2x32xbf16>
    tpu.vector_store %arg6[%117, %c0_36, %c0_37], %116 {strides = array<i32>} : memref<8x2x32xbf16, #tpu.memory_space<vmem>>, vector<1x2x32xbf16>,
    %119 = vector.shape_cast %114 : vector<2x32xf32> to vector<1x2x32xf32>
    %120 = arith.truncf %119 : vector<1x2x32xf32> to vector<1x2x32xbf16>
    %121 = arith.index_cast %68 : i32 to index
    %c0_38 = arith.constant 0 : index
    %c0_39 = arith.constant 0 : index
    %122 = vector.load %arg7[%121, %c0_38, %c0_39] : memref<8x2x32xbf16, #tpu.memory_space<vmem>>, vector<1x2x32xbf16>
    tpu.vector_store %arg7[%121, %c0_38, %c0_39], %120 {strides = array<i32>} : memref<8x2x32xbf16, #tpu.memory_space<vmem>>, vector<1x2x32xbf16>,
    %c2_i32 = arith.constant 2 : i32
    %c7_i32_40 = arith.constant 7 : i32
    %123 = arith.subi %c7_i32_40, %c2_i32 : i32
    %124 = arith.index_cast %c2_i32 : i32 to index
    %c0_41 = arith.constant 0 : index
    %c0_42 = arith.constant 0 : index
    %125 = vector.load %arg2[%124, %c0_41, %c0_42] : memref<8x2x128xbf16, #tpu.memory_space<vmem>>, vector<1x2x128xbf16>
    %126 = vector.shape_cast %125 : vector<1x2x128xbf16> to vector<2x128xbf16>
    %127 = arith.extf %126 : vector<2x128xbf16> to vector<2x128xf32>
    %128 = arith.truncf %91 : vector<2x32xf32> to vector<2x32xbf16>
    %cst_43 = arith.constant dense<0.000000e+00> : vector<2x128xf32>
    %129 = tpu.matmul %128, %3, %cst_43 {dimension_numbers = #tpu.dot_dimension_numbers<[1], [0], [0], [1], [0, 0, 1, 1], [], []>} : vector<2x32xbf16>, vector<32x128xbf16>, vector<2x128xf32> -> vector<2x128xf32>
    %130 = arith.addf %127, %129 : vector<2x128xf32>
    %131 = vector.extract_strided_slice %130 {offsets = [0, 0], sizes = [2, 96], strides = [1, 1]} : vector<2x128xf32> to vector<2x96xf32>
    %132 = arith.negf %131 : vector<2x96xf32>
    %133 = math.exp %132 : vector<2x96xf32>
    %cst_44 = arith.constant 1.000000e+00 : f32
    %134 = vector.broadcast %cst_44 : f32 to vector<2x96xf32>
    %135 = arith.addf %134, %133 : vector<2x96xf32>
    %136 = arith.divf %134, %135 : vector<2x96xf32>
    %137 = vector.extract_strided_slice %130 {offsets = [0, 96], sizes = [2, 32], strides = [1, 1]} : vector<2x128xf32> to vector<2x32xf32>
    %138 = math.tanh %137 : vector<2x32xf32>
    %139 = vector.extract_strided_slice %136 {offsets = [0, 32], sizes = [2, 32], strides = [1, 1]} : vector<2x96xf32> to vector<2x32xf32>
    %140 = arith.mulf %139, %88 : vector<2x32xf32>
    %141 = vector.extract_strided_slice %136 {offsets = [0, 0], sizes = [2, 32], strides = [1, 1]} : vector<2x96xf32> to vector<2x32xf32>
    %142 = arith.mulf %141, %138 : vector<2x32xf32>
    %143 = arith.addf %140, %142 : vector<2x32xf32>
    %144 = vector.extract_strided_slice %136 {offsets = [0, 64], sizes = [2, 32], strides = [1, 1]} : vector<2x96xf32> to vector<2x32xf32>
    %145 = math.tanh %143 : vector<2x32xf32>
    %146 = arith.mulf %144, %145 : vector<2x32xf32>
    %147 = arith.index_cast %123 : i32 to index
    %c0_45 = arith.constant 0 : index
    %c0_46 = arith.constant 0 : index
    %148 = vector.load %arg3[%147, %c0_45, %c0_46] : memref<8x2x128xbf16, #tpu.memory_space<vmem>>, vector<1x2x128xbf16>
    %149 = vector.shape_cast %148 : vector<1x2x128xbf16> to vector<2x128xbf16>
    %150 = arith.extf %149 : vector<2x128xbf16> to vector<2x128xf32>
    %151 = arith.truncf %114 : vector<2x32xf32> to vector<2x32xbf16>
    %cst_47 = arith.constant dense<0.000000e+00> : vector<2x128xf32>
    %152 = tpu.matmul %151, %4, %cst_47 {dimension_numbers = #tpu.dot_dimension_numbers<[1], [0], [0], [1], [0, 0, 1, 1], [], []>} : vector<2x32xbf16>, vector<32x128xbf16>, vector<2x128xf32> -> vector<2x128xf32>
    %153 = arith.addf %150, %152 : vector<2x128xf32>
    %154 = vector.extract_strided_slice %153 {offsets = [0, 0], sizes = [2, 96], strides = [1, 1]} : vector<2x128xf32> to vector<2x96xf32>
    %155 = arith.negf %154 : vector<2x96xf32>
    %156 = math.exp %155 : vector<2x96xf32>
    %cst_48 = arith.constant 1.000000e+00 : f32
    %157 = vector.broadcast %cst_48 : f32 to vector<2x96xf32>
    %158 = arith.addf %157, %156 : vector<2x96xf32>
    %159 = arith.divf %157, %158 : vector<2x96xf32>
    %160 = vector.extract_strided_slice %153 {offsets = [0, 96], sizes = [2, 32], strides = [1, 1]} : vector<2x128xf32> to vector<2x32xf32>
    %161 = math.tanh %160 : vector<2x32xf32>
    %162 = vector.extract_strided_slice %159 {offsets = [0, 32], sizes = [2, 32], strides = [1, 1]} : vector<2x96xf32> to vector<2x32xf32>
    %163 = arith.mulf %162, %111 : vector<2x32xf32>
    %164 = vector.extract_strided_slice %159 {offsets = [0, 0], sizes = [2, 32], strides = [1, 1]} : vector<2x96xf32> to vector<2x32xf32>
    %165 = arith.mulf %164, %161 : vector<2x32xf32>
    %166 = arith.addf %163, %165 : vector<2x32xf32>
    %167 = vector.extract_strided_slice %159 {offsets = [0, 64], sizes = [2, 32], strides = [1, 1]} : vector<2x96xf32> to vector<2x32xf32>
    %168 = math.tanh %166 : vector<2x32xf32>
    %169 = arith.mulf %167, %168 : vector<2x32xf32>
    %170 = vector.shape_cast %146 : vector<2x32xf32> to vector<1x2x32xf32>
    %171 = arith.truncf %170 : vector<1x2x32xf32> to vector<1x2x32xbf16>
    %172 = arith.index_cast %c2_i32 : i32 to index
    %c0_49 = arith.constant 0 : index
    %c0_50 = arith.constant 0 : index
    %173 = vector.load %arg6[%172, %c0_49, %c0_50] : memref<8x2x32xbf16, #tpu.memory_space<vmem>>, vector<1x2x32xbf16>
    tpu.vector_store %arg6[%172, %c0_49, %c0_50], %171 {strides = array<i32>} : memref<8x2x32xbf16, #tpu.memory_space<vmem>>, vector<1x2x32xbf16>,
    %174 = vector.shape_cast %169 : vector<2x32xf32> to vector<1x2x32xf32>
    %175 = arith.truncf %174 : vector<1x2x32xf32> to vector<1x2x32xbf16>
    %176 = arith.index_cast %123 : i32 to index
    %c0_51 = arith.constant 0 : index
    %c0_52 = arith.constant 0 : index
    %177 = vector.load %arg7[%176, %c0_51, %c0_52] : memref<8x2x32xbf16, #tpu.memory_space<vmem>>, vector<1x2x32xbf16>
    tpu.vector_store %arg7[%176, %c0_51, %c0_52], %175 {strides = array<i32>} : memref<8x2x32xbf16, #tpu.memory_space<vmem>>, vector<1x2x32xbf16>,
    %c3_i32 = arith.constant 3 : i32
    %c7_i32_53 = arith.constant 7 : i32
    %178 = arith.subi %c7_i32_53, %c3_i32 : i32
    %179 = arith.index_cast %c3_i32 : i32 to index
    %c0_54 = arith.constant 0 : index
    %c0_55 = arith.constant 0 : index
    %180 = vector.load %arg2[%179, %c0_54, %c0_55] : memref<8x2x128xbf16, #tpu.memory_space<vmem>>, vector<1x2x128xbf16>
    %181 = vector.shape_cast %180 : vector<1x2x128xbf16> to vector<2x128xbf16>
    %182 = arith.extf %181 : vector<2x128xbf16> to vector<2x128xf32>
    %183 = arith.truncf %146 : vector<2x32xf32> to vector<2x32xbf16>
    %cst_56 = arith.constant dense<0.000000e+00> : vector<2x128xf32>
    %184 = tpu.matmul %183, %3, %cst_56 {dimension_numbers = #tpu.dot_dimension_numbers<[1], [0], [0], [1], [0, 0, 1, 1], [], []>} : vector<2x32xbf16>, vector<32x128xbf16>, vector<2x128xf32> -> vector<2x128xf32>
    %185 = arith.addf %182, %184 : vector<2x128xf32>
    %186 = vector.extract_strided_slice %185 {offsets = [0, 0], sizes = [2, 96], strides = [1, 1]} : vector<2x128xf32> to vector<2x96xf32>
    %187 = arith.negf %186 : vector<2x96xf32>
    %188 = math.exp %187 : vector<2x96xf32>
    %cst_57 = arith.constant 1.000000e+00 : f32
    %189 = vector.broadcast %cst_57 : f32 to vector<2x96xf32>
    %190 = arith.addf %189, %188 : vector<2x96xf32>
    %191 = arith.divf %189, %190 : vector<2x96xf32>
    %192 = vector.extract_strided_slice %185 {offsets = [0, 96], sizes = [2, 32], strides = [1, 1]} : vector<2x128xf32> to vector<2x32xf32>
    %193 = math.tanh %192 : vector<2x32xf32>
    %194 = vector.extract_strided_slice %191 {offsets = [0, 32], sizes = [2, 32], strides = [1, 1]} : vector<2x96xf32> to vector<2x32xf32>
    %195 = arith.mulf %194, %143 : vector<2x32xf32>
    %196 = vector.extract_strided_slice %191 {offsets = [0, 0], sizes = [2, 32], strides = [1, 1]} : vector<2x96xf32> to vector<2x32xf32>
    %197 = arith.mulf %196, %193 : vector<2x32xf32>
    %198 = arith.addf %195, %197 : vector<2x32xf32>
    %199 = vector.extract_strided_slice %191 {offsets = [0, 64], sizes = [2, 32], strides = [1, 1]} : vector<2x96xf32> to vector<2x32xf32>
    %200 = math.tanh %198 : vector<2x32xf32>
    %201 = arith.mulf %199, %200 : vector<2x32xf32>
    %202 = arith.index_cast %178 : i32 to index
    %c0_58 = arith.constant 0 : index
    %c0_59 = arith.constant 0 : index
    %203 = vector.load %arg3[%202, %c0_58, %c0_59] : memref<8x2x128xbf16, #tpu.memory_space<vmem>>, vector<1x2x128xbf16>
    %204 = vector.shape_cast %203 : vector<1x2x128xbf16> to vector<2x128xbf16>
    %205 = arith.extf %204 : vector<2x128xbf16> to vector<2x128xf32>
    %206 = arith.truncf %169 : vector<2x32xf32> to vector<2x32xbf16>
    %cst_60 = arith.constant dense<0.000000e+00> : vector<2x128xf32>
    %207 = tpu.matmul %206, %4, %cst_60 {dimension_numbers = #tpu.dot_dimension_numbers<[1], [0], [0], [1], [0, 0, 1, 1], [], []>} : vector<2x32xbf16>, vector<32x128xbf16>, vector<2x128xf32> -> vector<2x128xf32>
    %208 = arith.addf %205, %207 : vector<2x128xf32>
    %209 = vector.extract_strided_slice %208 {offsets = [0, 0], sizes = [2, 96], strides = [1, 1]} : vector<2x128xf32> to vector<2x96xf32>
    %210 = arith.negf %209 : vector<2x96xf32>
    %211 = math.exp %210 : vector<2x96xf32>
    %cst_61 = arith.constant 1.000000e+00 : f32
    %212 = vector.broadcast %cst_61 : f32 to vector<2x96xf32>
    %213 = arith.addf %212, %211 : vector<2x96xf32>
    %214 = arith.divf %212, %213 : vector<2x96xf32>
    %215 = vector.extract_strided_slice %208 {offsets = [0, 96], sizes = [2, 32], strides = [1, 1]} : vector<2x128xf32> to vector<2x32xf32>
    %216 = math.tanh %215 : vector<2x32xf32>
    %217 = vector.extract_strided_slice %214 {offsets = [0, 32], sizes = [2, 32], strides = [1, 1]} : vector<2x96xf32> to vector<2x32xf32>
    %218 = arith.mulf %217, %166 : vector<2x32xf32>
    %219 = vector.extract_strided_slice %214 {offsets = [0, 0], sizes = [2, 32], strides = [1, 1]} : vector<2x96xf32> to vector<2x32xf32>
    %220 = arith.mulf %219, %216 : vector<2x32xf32>
    %221 = arith.addf %218, %220 : vector<2x32xf32>
    %222 = vector.extract_strided_slice %214 {offsets = [0, 64], sizes = [2, 32], strides = [1, 1]} : vector<2x96xf32> to vector<2x32xf32>
    %223 = math.tanh %221 : vector<2x32xf32>
    %224 = arith.mulf %222, %223 : vector<2x32xf32>
    %225 = vector.shape_cast %201 : vector<2x32xf32> to vector<1x2x32xf32>
    %226 = arith.truncf %225 : vector<1x2x32xf32> to vector<1x2x32xbf16>
    %227 = arith.index_cast %c3_i32 : i32 to index
    %c0_62 = arith.constant 0 : index
    %c0_63 = arith.constant 0 : index
    %228 = vector.load %arg6[%227, %c0_62, %c0_63] : memref<8x2x32xbf16, #tpu.memory_space<vmem>>, vector<1x2x32xbf16>
    tpu.vector_store %arg6[%227, %c0_62, %c0_63], %226 {strides = array<i32>} : memref<8x2x32xbf16, #tpu.memory_space<vmem>>, vector<1x2x32xbf16>,
    %229 = vector.shape_cast %224 : vector<2x32xf32> to vector<1x2x32xf32>
    %230 = arith.truncf %229 : vector<1x2x32xf32> to vector<1x2x32xbf16>
    %231 = arith.index_cast %178 : i32 to index
    %c0_64 = arith.constant 0 : index
    %c0_65 = arith.constant 0 : index
    %232 = vector.load %arg7[%231, %c0_64, %c0_65] : memref<8x2x32xbf16, #tpu.memory_space<vmem>>, vector<1x2x32xbf16>
    tpu.vector_store %arg7[%231, %c0_64, %c0_65], %230 {strides = array<i32>} : memref<8x2x32xbf16, #tpu.memory_space<vmem>>, vector<1x2x32xbf16>,
    %c4_i32 = arith.constant 4 : i32
    %c7_i32_66 = arith.constant 7 : i32
    %233 = arith.subi %c7_i32_66, %c4_i32 : i32
    %234 = arith.index_cast %c4_i32 : i32 to index
    %c0_67 = arith.constant 0 : index
    %c0_68 = arith.constant 0 : index
    %235 = vector.load %arg2[%234, %c0_67, %c0_68] : memref<8x2x128xbf16, #tpu.memory_space<vmem>>, vector<1x2x128xbf16>
    %236 = vector.shape_cast %235 : vector<1x2x128xbf16> to vector<2x128xbf16>
    %237 = arith.extf %236 : vector<2x128xbf16> to vector<2x128xf32>
    %238 = arith.truncf %201 : vector<2x32xf32> to vector<2x32xbf16>
    %cst_69 = arith.constant dense<0.000000e+00> : vector<2x128xf32>
    %239 = tpu.matmul %238, %3, %cst_69 {dimension_numbers = #tpu.dot_dimension_numbers<[1], [0], [0], [1], [0, 0, 1, 1], [], []>} : vector<2x32xbf16>, vector<32x128xbf16>, vector<2x128xf32> -> vector<2x128xf32>
    %240 = arith.addf %237, %239 : vector<2x128xf32>
    %241 = vector.extract_strided_slice %240 {offsets = [0, 0], sizes = [2, 96], strides = [1, 1]} : vector<2x128xf32> to vector<2x96xf32>
    %242 = arith.negf %241 : vector<2x96xf32>
    %243 = math.exp %242 : vector<2x96xf32>
    %cst_70 = arith.constant 1.000000e+00 : f32
    %244 = vector.broadcast %cst_70 : f32 to vector<2x96xf32>
    %245 = arith.addf %244, %243 : vector<2x96xf32>
    %246 = arith.divf %244, %245 : vector<2x96xf32>
    %247 = vector.extract_strided_slice %240 {offsets = [0, 96], sizes = [2, 32], strides = [1, 1]} : vector<2x128xf32> to vector<2x32xf32>
    %248 = math.tanh %247 : vector<2x32xf32>
    %249 = vector.extract_strided_slice %246 {offsets = [0, 32], sizes = [2, 32], strides = [1, 1]} : vector<2x96xf32> to vector<2x32xf32>
    %250 = arith.mulf %249, %198 : vector<2x32xf32>
    %251 = vector.extract_strided_slice %246 {offsets = [0, 0], sizes = [2, 32], strides = [1, 1]} : vector<2x96xf32> to vector<2x32xf32>
    %252 = arith.mulf %251, %248 : vector<2x32xf32>
    %253 = arith.addf %250, %252 : vector<2x32xf32>
    %254 = vector.extract_strided_slice %246 {offsets = [0, 64], sizes = [2, 32], strides = [1, 1]} : vector<2x96xf32> to vector<2x32xf32>
    %255 = math.tanh %253 : vector<2x32xf32>
    %256 = arith.mulf %254, %255 : vector<2x32xf32>
    %257 = arith.index_cast %233 : i32 to index
    %c0_71 = arith.constant 0 : index
    %c0_72 = arith.constant 0 : index
    %258 = vector.load %arg3[%257, %c0_71, %c0_72] : memref<8x2x128xbf16, #tpu.memory_space<vmem>>, vector<1x2x128xbf16>
    %259 = vector.shape_cast %258 : vector<1x2x128xbf16> to vector<2x128xbf16>
    %260 = arith.extf %259 : vector<2x128xbf16> to vector<2x128xf32>
    %261 = arith.truncf %224 : vector<2x32xf32> to vector<2x32xbf16>
    %cst_73 = arith.constant dense<0.000000e+00> : vector<2x128xf32>
    %262 = tpu.matmul %261, %4, %cst_73 {dimension_numbers = #tpu.dot_dimension_numbers<[1], [0], [0], [1], [0, 0, 1, 1], [], []>} : vector<2x32xbf16>, vector<32x128xbf16>, vector<2x128xf32> -> vector<2x128xf32>
    %263 = arith.addf %260, %262 : vector<2x128xf32>
    %264 = vector.extract_strided_slice %263 {offsets = [0, 0], sizes = [2, 96], strides = [1, 1]} : vector<2x128xf32> to vector<2x96xf32>
    %265 = arith.negf %264 : vector<2x96xf32>
    %266 = math.exp %265 : vector<2x96xf32>
    %cst_74 = arith.constant 1.000000e+00 : f32
    %267 = vector.broadcast %cst_74 : f32 to vector<2x96xf32>
    %268 = arith.addf %267, %266 : vector<2x96xf32>
    %269 = arith.divf %267, %268 : vector<2x96xf32>
    %270 = vector.extract_strided_slice %263 {offsets = [0, 96], sizes = [2, 32], strides = [1, 1]} : vector<2x128xf32> to vector<2x32xf32>
    %271 = math.tanh %270 : vector<2x32xf32>
    %272 = vector.extract_strided_slice %269 {offsets = [0, 32], sizes = [2, 32], strides = [1, 1]} : vector<2x96xf32> to vector<2x32xf32>
    %273 = arith.mulf %272, %221 : vector<2x32xf32>
    %274 = vector.extract_strided_slice %269 {offsets = [0, 0], sizes = [2, 32], strides = [1, 1]} : vector<2x96xf32> to vector<2x32xf32>
    %275 = arith.mulf %274, %271 : vector<2x32xf32>
    %276 = arith.addf %273, %275 : vector<2x32xf32>
    %277 = vector.extract_strided_slice %269 {offsets = [0, 64], sizes = [2, 32], strides = [1, 1]} : vector<2x96xf32> to vector<2x32xf32>
    %278 = math.tanh %276 : vector<2x32xf32>
    %279 = arith.mulf %277, %278 : vector<2x32xf32>
    %280 = vector.shape_cast %256 : vector<2x32xf32> to vector<1x2x32xf32>
    %281 = arith.truncf %280 : vector<1x2x32xf32> to vector<1x2x32xbf16>
    %282 = arith.index_cast %c4_i32 : i32 to index
    %c0_75 = arith.constant 0 : index
    %c0_76 = arith.constant 0 : index
    %283 = vector.load %arg6[%282, %c0_75, %c0_76] : memref<8x2x32xbf16, #tpu.memory_space<vmem>>, vector<1x2x32xbf16>
    tpu.vector_store %arg6[%282, %c0_75, %c0_76], %281 {strides = array<i32>} : memref<8x2x32xbf16, #tpu.memory_space<vmem>>, vector<1x2x32xbf16>,
    %284 = vector.shape_cast %279 : vector<2x32xf32> to vector<1x2x32xf32>
    %285 = arith.truncf %284 : vector<1x2x32xf32> to vector<1x2x32xbf16>
    %286 = arith.index_cast %233 : i32 to index
    %c0_77 = arith.constant 0 : index
    %c0_78 = arith.constant 0 : index
    %287 = vector.load %arg7[%286, %c0_77, %c0_78] : memref<8x2x32xbf16, #tpu.memory_space<vmem>>, vector<1x2x32xbf16>
    tpu.vector_store %arg7[%286, %c0_77, %c0_78], %285 {strides = array<i32>} : memref<8x2x32xbf16, #tpu.memory_space<vmem>>, vector<1x2x32xbf16>,
    %c5_i32 = arith.constant 5 : i32
    %c7_i32_79 = arith.constant 7 : i32
    %288 = arith.subi %c7_i32_79, %c5_i32 : i32
    %289 = arith.index_cast %c5_i32 : i32 to index
    %c0_80 = arith.constant 0 : index
    %c0_81 = arith.constant 0 : index
    %290 = vector.load %arg2[%289, %c0_80, %c0_81] : memref<8x2x128xbf16, #tpu.memory_space<vmem>>, vector<1x2x128xbf16>
    %291 = vector.shape_cast %290 : vector<1x2x128xbf16> to vector<2x128xbf16>
    %292 = arith.extf %291 : vector<2x128xbf16> to vector<2x128xf32>
    %293 = arith.truncf %256 : vector<2x32xf32> to vector<2x32xbf16>
    %cst_82 = arith.constant dense<0.000000e+00> : vector<2x128xf32>
    %294 = tpu.matmul %293, %3, %cst_82 {dimension_numbers = #tpu.dot_dimension_numbers<[1], [0], [0], [1], [0, 0, 1, 1], [], []>} : vector<2x32xbf16>, vector<32x128xbf16>, vector<2x128xf32> -> vector<2x128xf32>
    %295 = arith.addf %292, %294 : vector<2x128xf32>
    %296 = vector.extract_strided_slice %295 {offsets = [0, 0], sizes = [2, 96], strides = [1, 1]} : vector<2x128xf32> to vector<2x96xf32>
    %297 = arith.negf %296 : vector<2x96xf32>
    %298 = math.exp %297 : vector<2x96xf32>
    %cst_83 = arith.constant 1.000000e+00 : f32
    %299 = vector.broadcast %cst_83 : f32 to vector<2x96xf32>
    %300 = arith.addf %299, %298 : vector<2x96xf32>
    %301 = arith.divf %299, %300 : vector<2x96xf32>
    %302 = vector.extract_strided_slice %295 {offsets = [0, 96], sizes = [2, 32], strides = [1, 1]} : vector<2x128xf32> to vector<2x32xf32>
    %303 = math.tanh %302 : vector<2x32xf32>
    %304 = vector.extract_strided_slice %301 {offsets = [0, 32], sizes = [2, 32], strides = [1, 1]} : vector<2x96xf32> to vector<2x32xf32>
    %305 = arith.mulf %304, %253 : vector<2x32xf32>
    %306 = vector.extract_strided_slice %301 {offsets = [0, 0], sizes = [2, 32], strides = [1, 1]} : vector<2x96xf32> to vector<2x32xf32>
    %307 = arith.mulf %306, %303 : vector<2x32xf32>
    %308 = arith.addf %305, %307 : vector<2x32xf32>
    %309 = vector.extract_strided_slice %301 {offsets = [0, 64], sizes = [2, 32], strides = [1, 1]} : vector<2x96xf32> to vector<2x32xf32>
    %310 = math.tanh %308 : vector<2x32xf32>
    %311 = arith.mulf %309, %310 : vector<2x32xf32>
    %312 = arith.index_cast %288 : i32 to index
    %c0_84 = arith.constant 0 : index
    %c0_85 = arith.constant 0 : index
    %313 = vector.load %arg3[%312, %c0_84, %c0_85] : memref<8x2x128xbf16, #tpu.memory_space<vmem>>, vector<1x2x128xbf16>
    %314 = vector.shape_cast %313 : vector<1x2x128xbf16> to vector<2x128xbf16>
    %315 = arith.extf %314 : vector<2x128xbf16> to vector<2x128xf32>
    %316 = arith.truncf %279 : vector<2x32xf32> to vector<2x32xbf16>
    %cst_86 = arith.constant dense<0.000000e+00> : vector<2x128xf32>
    %317 = tpu.matmul %316, %4, %cst_86 {dimension_numbers = #tpu.dot_dimension_numbers<[1], [0], [0], [1], [0, 0, 1, 1], [], []>} : vector<2x32xbf16>, vector<32x128xbf16>, vector<2x128xf32> -> vector<2x128xf32>
    %318 = arith.addf %315, %317 : vector<2x128xf32>
    %319 = vector.extract_strided_slice %318 {offsets = [0, 0], sizes = [2, 96], strides = [1, 1]} : vector<2x128xf32> to vector<2x96xf32>
    %320 = arith.negf %319 : vector<2x96xf32>
    %321 = math.exp %320 : vector<2x96xf32>
    %cst_87 = arith.constant 1.000000e+00 : f32
    %322 = vector.broadcast %cst_87 : f32 to vector<2x96xf32>
    %323 = arith.addf %322, %321 : vector<2x96xf32>
    %324 = arith.divf %322, %323 : vector<2x96xf32>
    %325 = vector.extract_strided_slice %318 {offsets = [0, 96], sizes = [2, 32], strides = [1, 1]} : vector<2x128xf32> to vector<2x32xf32>
    %326 = math.tanh %325 : vector<2x32xf32>
    %327 = vector.extract_strided_slice %324 {offsets = [0, 32], sizes = [2, 32], strides = [1, 1]} : vector<2x96xf32> to vector<2x32xf32>
    %328 = arith.mulf %327, %276 : vector<2x32xf32>
    %329 = vector.extract_strided_slice %324 {offsets = [0, 0], sizes = [2, 32], strides = [1, 1]} : vector<2x96xf32> to vector<2x32xf32>
    %330 = arith.mulf %329, %326 : vector<2x32xf32>
    %331 = arith.addf %328, %330 : vector<2x32xf32>
    %332 = vector.extract_strided_slice %324 {offsets = [0, 64], sizes = [2, 32], strides = [1, 1]} : vector<2x96xf32> to vector<2x32xf32>
    %333 = math.tanh %331 : vector<2x32xf32>
    %334 = arith.mulf %332, %333 : vector<2x32xf32>
    %335 = vector.shape_cast %311 : vector<2x32xf32> to vector<1x2x32xf32>
    %336 = arith.truncf %335 : vector<1x2x32xf32> to vector<1x2x32xbf16>
    %337 = arith.index_cast %c5_i32 : i32 to index
    %c0_88 = arith.constant 0 : index
    %c0_89 = arith.constant 0 : index
    %338 = vector.load %arg6[%337, %c0_88, %c0_89] : memref<8x2x32xbf16, #tpu.memory_space<vmem>>, vector<1x2x32xbf16>
    tpu.vector_store %arg6[%337, %c0_88, %c0_89], %336 {strides = array<i32>} : memref<8x2x32xbf16, #tpu.memory_space<vmem>>, vector<1x2x32xbf16>,
    %339 = vector.shape_cast %334 : vector<2x32xf32> to vector<1x2x32xf32>
    %340 = arith.truncf %339 : vector<1x2x32xf32> to vector<1x2x32xbf16>
    %341 = arith.index_cast %288 : i32 to index
    %c0_90 = arith.constant 0 : index
    %c0_91 = arith.constant 0 : index
    %342 = vector.load %arg7[%341, %c0_90, %c0_91] : memref<8x2x32xbf16, #tpu.memory_space<vmem>>, vector<1x2x32xbf16>
    tpu.vector_store %arg7[%341, %c0_90, %c0_91], %340 {strides = array<i32>} : memref<8x2x32xbf16, #tpu.memory_space<vmem>>, vector<1x2x32xbf16>,
    %c6_i32 = arith.constant 6 : i32
    %c7_i32_92 = arith.constant 7 : i32
    %343 = arith.subi %c7_i32_92, %c6_i32 : i32
    %344 = arith.index_cast %c6_i32 : i32 to index
    %c0_93 = arith.constant 0 : index
    %c0_94 = arith.constant 0 : index
    %345 = vector.load %arg2[%344, %c0_93, %c0_94] : memref<8x2x128xbf16, #tpu.memory_space<vmem>>, vector<1x2x128xbf16>
    %346 = vector.shape_cast %345 : vector<1x2x128xbf16> to vector<2x128xbf16>
    %347 = arith.extf %346 : vector<2x128xbf16> to vector<2x128xf32>
    %348 = arith.truncf %311 : vector<2x32xf32> to vector<2x32xbf16>
    %cst_95 = arith.constant dense<0.000000e+00> : vector<2x128xf32>
    %349 = tpu.matmul %348, %3, %cst_95 {dimension_numbers = #tpu.dot_dimension_numbers<[1], [0], [0], [1], [0, 0, 1, 1], [], []>} : vector<2x32xbf16>, vector<32x128xbf16>, vector<2x128xf32> -> vector<2x128xf32>
    %350 = arith.addf %347, %349 : vector<2x128xf32>
    %351 = vector.extract_strided_slice %350 {offsets = [0, 0], sizes = [2, 96], strides = [1, 1]} : vector<2x128xf32> to vector<2x96xf32>
    %352 = arith.negf %351 : vector<2x96xf32>
    %353 = math.exp %352 : vector<2x96xf32>
    %cst_96 = arith.constant 1.000000e+00 : f32
    %354 = vector.broadcast %cst_96 : f32 to vector<2x96xf32>
    %355 = arith.addf %354, %353 : vector<2x96xf32>
    %356 = arith.divf %354, %355 : vector<2x96xf32>
    %357 = vector.extract_strided_slice %350 {offsets = [0, 96], sizes = [2, 32], strides = [1, 1]} : vector<2x128xf32> to vector<2x32xf32>
    %358 = math.tanh %357 : vector<2x32xf32>
    %359 = vector.extract_strided_slice %356 {offsets = [0, 32], sizes = [2, 32], strides = [1, 1]} : vector<2x96xf32> to vector<2x32xf32>
    %360 = arith.mulf %359, %308 : vector<2x32xf32>
    %361 = vector.extract_strided_slice %356 {offsets = [0, 0], sizes = [2, 32], strides = [1, 1]} : vector<2x96xf32> to vector<2x32xf32>
    %362 = arith.mulf %361, %358 : vector<2x32xf32>
    %363 = arith.addf %360, %362 : vector<2x32xf32>
    %364 = vector.extract_strided_slice %356 {offsets = [0, 64], sizes = [2, 32], strides = [1, 1]} : vector<2x96xf32> to vector<2x32xf32>
    %365 = math.tanh %363 : vector<2x32xf32>
    %366 = arith.mulf %364, %365 : vector<2x32xf32>
    %367 = arith.index_cast %343 : i32 to index
    %c0_97 = arith.constant 0 : index
    %c0_98 = arith.constant 0 : index
    %368 = vector.load %arg3[%367, %c0_97, %c0_98] : memref<8x2x128xbf16, #tpu.memory_space<vmem>>, vector<1x2x128xbf16>
    %369 = vector.shape_cast %368 : vector<1x2x128xbf16> to vector<2x128xbf16>
    %370 = arith.extf %369 : vector<2x128xbf16> to vector<2x128xf32>
    %371 = arith.truncf %334 : vector<2x32xf32> to vector<2x32xbf16>
    %cst_99 = arith.constant dense<0.000000e+00> : vector<2x128xf32>
    %372 = tpu.matmul %371, %4, %cst_99 {dimension_numbers = #tpu.dot_dimension_numbers<[1], [0], [0], [1], [0, 0, 1, 1], [], []>} : vector<2x32xbf16>, vector<32x128xbf16>, vector<2x128xf32> -> vector<2x128xf32>
    %373 = arith.addf %370, %372 : vector<2x128xf32>
    %374 = vector.extract_strided_slice %373 {offsets = [0, 0], sizes = [2, 96], strides = [1, 1]} : vector<2x128xf32> to vector<2x96xf32>
    %375 = arith.negf %374 : vector<2x96xf32>
    %376 = math.exp %375 : vector<2x96xf32>
    %cst_100 = arith.constant 1.000000e+00 : f32
    %377 = vector.broadcast %cst_100 : f32 to vector<2x96xf32>
    %378 = arith.addf %377, %376 : vector<2x96xf32>
    %379 = arith.divf %377, %378 : vector<2x96xf32>
    %380 = vector.extract_strided_slice %373 {offsets = [0, 96], sizes = [2, 32], strides = [1, 1]} : vector<2x128xf32> to vector<2x32xf32>
    %381 = math.tanh %380 : vector<2x32xf32>
    %382 = vector.extract_strided_slice %379 {offsets = [0, 32], sizes = [2, 32], strides = [1, 1]} : vector<2x96xf32> to vector<2x32xf32>
    %383 = arith.mulf %382, %331 : vector<2x32xf32>
    %384 = vector.extract_strided_slice %379 {offsets = [0, 0], sizes = [2, 32], strides = [1, 1]} : vector<2x96xf32> to vector<2x32xf32>
    %385 = arith.mulf %384, %381 : vector<2x32xf32>
    %386 = arith.addf %383, %385 : vector<2x32xf32>
    %387 = vector.extract_strided_slice %379 {offsets = [0, 64], sizes = [2, 32], strides = [1, 1]} : vector<2x96xf32> to vector<2x32xf32>
    %388 = math.tanh %386 : vector<2x32xf32>
    %389 = arith.mulf %387, %388 : vector<2x32xf32>
    %390 = vector.shape_cast %366 : vector<2x32xf32> to vector<1x2x32xf32>
    %391 = arith.truncf %390 : vector<1x2x32xf32> to vector<1x2x32xbf16>
    %392 = arith.index_cast %c6_i32 : i32 to index
    %c0_101 = arith.constant 0 : index
    %c0_102 = arith.constant 0 : index
    %393 = vector.load %arg6[%392, %c0_101, %c0_102] : memref<8x2x32xbf16, #tpu.memory_space<vmem>>, vector<1x2x32xbf16>
    tpu.vector_store %arg6[%392, %c0_101, %c0_102], %391 {strides = array<i32>} : memref<8x2x32xbf16, #tpu.memory_space<vmem>>, vector<1x2x32xbf16>,
    %394 = vector.shape_cast %389 : vector<2x32xf32> to vector<1x2x32xf32>
    %395 = arith.truncf %394 : vector<1x2x32xf32> to vector<1x2x32xbf16>
    %396 = arith.index_cast %343 : i32 to index
    %c0_103 = arith.constant 0 : index
    %c0_104 = arith.constant 0 : index
    %397 = vector.load %arg7[%396, %c0_103, %c0_104] : memref<8x2x32xbf16, #tpu.memory_space<vmem>>, vector<1x2x32xbf16>
    tpu.vector_store %arg7[%396, %c0_103, %c0_104], %395 {strides = array<i32>} : memref<8x2x32xbf16, #tpu.memory_space<vmem>>, vector<1x2x32xbf16>,
    %c7_i32_105 = arith.constant 7 : i32
    %c7_i32_106 = arith.constant 7 : i32
    %398 = arith.subi %c7_i32_106, %c7_i32_105 : i32
    %399 = arith.index_cast %c7_i32_105 : i32 to index
    %c0_107 = arith.constant 0 : index
    %c0_108 = arith.constant 0 : index
    %400 = vector.load %arg2[%399, %c0_107, %c0_108] : memref<8x2x128xbf16, #tpu.memory_space<vmem>>, vector<1x2x128xbf16>
    %401 = vector.shape_cast %400 : vector<1x2x128xbf16> to vector<2x128xbf16>
    %402 = arith.extf %401 : vector<2x128xbf16> to vector<2x128xf32>
    %403 = arith.truncf %366 : vector<2x32xf32> to vector<2x32xbf16>
    %cst_109 = arith.constant dense<0.000000e+00> : vector<2x128xf32>
    %404 = tpu.matmul %403, %3, %cst_109 {dimension_numbers = #tpu.dot_dimension_numbers<[1], [0], [0], [1], [0, 0, 1, 1], [], []>} : vector<2x32xbf16>, vector<32x128xbf16>, vector<2x128xf32> -> vector<2x128xf32>
    %405 = arith.addf %402, %404 : vector<2x128xf32>
    %406 = vector.extract_strided_slice %405 {offsets = [0, 0], sizes = [2, 96], strides = [1, 1]} : vector<2x128xf32> to vector<2x96xf32>
    %407 = arith.negf %406 : vector<2x96xf32>
    %408 = math.exp %407 : vector<2x96xf32>
    %cst_110 = arith.constant 1.000000e+00 : f32
    %409 = vector.broadcast %cst_110 : f32 to vector<2x96xf32>
    %410 = arith.addf %409, %408 : vector<2x96xf32>
    %411 = arith.divf %409, %410 : vector<2x96xf32>
    %412 = vector.extract_strided_slice %405 {offsets = [0, 96], sizes = [2, 32], strides = [1, 1]} : vector<2x128xf32> to vector<2x32xf32>
    %413 = math.tanh %412 : vector<2x32xf32>
    %414 = vector.extract_strided_slice %411 {offsets = [0, 32], sizes = [2, 32], strides = [1, 1]} : vector<2x96xf32> to vector<2x32xf32>
    %415 = arith.mulf %414, %363 : vector<2x32xf32>
    %416 = vector.extract_strided_slice %411 {offsets = [0, 0], sizes = [2, 32], strides = [1, 1]} : vector<2x96xf32> to vector<2x32xf32>
    %417 = arith.mulf %416, %413 : vector<2x32xf32>
    %418 = arith.addf %415, %417 : vector<2x32xf32>
    %419 = vector.extract_strided_slice %411 {offsets = [0, 64], sizes = [2, 32], strides = [1, 1]} : vector<2x96xf32> to vector<2x32xf32>
    %420 = math.tanh %418 : vector<2x32xf32>
    %421 = arith.mulf %419, %420 : vector<2x32xf32>
    %422 = arith.index_cast %398 : i32 to index
    %c0_111 = arith.constant 0 : index
    %c0_112 = arith.constant 0 : index
    %423 = vector.load %arg3[%422, %c0_111, %c0_112] : memref<8x2x128xbf16, #tpu.memory_space<vmem>>, vector<1x2x128xbf16>
    %424 = vector.shape_cast %423 : vector<1x2x128xbf16> to vector<2x128xbf16>
    %425 = arith.extf %424 : vector<2x128xbf16> to vector<2x128xf32>
    %426 = arith.truncf %389 : vector<2x32xf32> to vector<2x32xbf16>
    %cst_113 = arith.constant dense<0.000000e+00> : vector<2x128xf32>
    %427 = tpu.matmul %426, %4, %cst_113 {dimension_numbers = #tpu.dot_dimension_numbers<[1], [0], [0], [1], [0, 0, 1, 1], [], []>} : vector<2x32xbf16>, vector<32x128xbf16>, vector<2x128xf32> -> vector<2x128xf32>
    %428 = arith.addf %425, %427 : vector<2x128xf32>
    %429 = vector.extract_strided_slice %428 {offsets = [0, 0], sizes = [2, 96], strides = [1, 1]} : vector<2x128xf32> to vector<2x96xf32>
    %430 = arith.negf %429 : vector<2x96xf32>
    %431 = math.exp %430 : vector<2x96xf32>
    %cst_114 = arith.constant 1.000000e+00 : f32
    %432 = vector.broadcast %cst_114 : f32 to vector<2x96xf32>
    %433 = arith.addf %432, %431 : vector<2x96xf32>
    %434 = arith.divf %432, %433 : vector<2x96xf32>
    %435 = vector.extract_strided_slice %428 {offsets = [0, 96], sizes = [2, 32], strides = [1, 1]} : vector<2x128xf32> to vector<2x32xf32>
    %436 = math.tanh %435 : vector<2x32xf32>
    %437 = vector.extract_strided_slice %434 {offsets = [0, 32], sizes = [2, 32], strides = [1, 1]} : vector<2x96xf32> to vector<2x32xf32>
    %438 = arith.mulf %437, %386 : vector<2x32xf32>
    %439 = vector.extract_strided_slice %434 {offsets = [0, 0], sizes = [2, 32], strides = [1, 1]} : vector<2x96xf32> to vector<2x32xf32>
    %440 = arith.mulf %439, %436 : vector<2x32xf32>
    %441 = arith.addf %438, %440 : vector<2x32xf32>
    %442 = vector.extract_strided_slice %434 {offsets = [0, 64], sizes = [2, 32], strides = [1, 1]} : vector<2x96xf32> to vector<2x32xf32>
    %443 = math.tanh %441 : vector<2x32xf32>
    %444 = arith.mulf %442, %443 : vector<2x32xf32>
    %445 = vector.shape_cast %421 : vector<2x32xf32> to vector<1x2x32xf32>
    %446 = arith.truncf %445 : vector<1x2x32xf32> to vector<1x2x32xbf16>
    %447 = arith.index_cast %c7_i32_105 : i32 to index
    %c0_115 = arith.constant 0 : index
    %c0_116 = arith.constant 0 : index
    %448 = vector.load %arg6[%447, %c0_115, %c0_116] : memref<8x2x32xbf16, #tpu.memory_space<vmem>>, vector<1x2x32xbf16>
    tpu.vector_store %arg6[%447, %c0_115, %c0_116], %446 {strides = array<i32>} : memref<8x2x32xbf16, #tpu.memory_space<vmem>>, vector<1x2x32xbf16>,
    %449 = vector.shape_cast %444 : vector<2x32xf32> to vector<1x2x32xf32>
    %450 = arith.truncf %449 : vector<1x2x32xf32> to vector<1x2x32xbf16>
    %451 = arith.index_cast %398 : i32 to index
    %c0_117 = arith.constant 0 : index
    %c0_118 = arith.constant 0 : index
    %452 = vector.load %arg7[%451, %c0_117, %c0_118] : memref<8x2x32xbf16, #tpu.memory_space<vmem>>, vector<1x2x32xbf16>
    tpu.vector_store %arg7[%451, %c0_117, %c0_118], %450 {strides = array<i32>} : memref<8x2x32xbf16, #tpu.memory_space<vmem>>, vector<1x2x32xbf16>,
    %c8_i32 = arith.constant 8 : i32
    %c0_119 = arith.constant 0 : index
    %c0_120 = arith.constant 0 : index
    %c0_121 = arith.constant 0 : index
    %453 = vector.load %arg10[%c0_119, %c0_120, %c0_121] : memref<2x2x32xf32, #tpu.memory_space<vmem>>, vector<1x2x32xf32>
    %454 = vector.shape_cast %453 : vector<1x2x32xf32> to vector<2x32xf32>
    %455 = vector.shape_cast %421 : vector<2x32xf32> to vector<1x2x32xf32>
    tpu.vector_store %arg10[%c0_119, %c0_120, %c0_121], %455 {strides = array<i32>} : memref<2x2x32xf32, #tpu.memory_space<vmem>>, vector<1x2x32xf32>,
    %c1_122 = arith.constant 1 : index
    %c0_123 = arith.constant 0 : index
    %c0_124 = arith.constant 0 : index
    %456 = vector.load %arg10[%c1_122, %c0_123, %c0_124] : memref<2x2x32xf32, #tpu.memory_space<vmem>>, vector<1x2x32xf32>
    %457 = vector.shape_cast %456 : vector<1x2x32xf32> to vector<2x32xf32>
    %458 = vector.shape_cast %444 : vector<2x32xf32> to vector<1x2x32xf32>
    tpu.vector_store %arg10[%c1_122, %c0_123, %c0_124], %458 {strides = array<i32>} : memref<2x2x32xf32, #tpu.memory_space<vmem>>, vector<1x2x32xf32>,
    %c0_125 = arith.constant 0 : index
    %c0_126 = arith.constant 0 : index
    %c0_127 = arith.constant 0 : index
    %459 = vector.load %arg11[%c0_125, %c0_126, %c0_127] : memref<2x2x32xf32, #tpu.memory_space<vmem>>, vector<1x2x32xf32>
    %460 = vector.shape_cast %459 : vector<1x2x32xf32> to vector<2x32xf32>
    %461 = vector.shape_cast %418 : vector<2x32xf32> to vector<1x2x32xf32>
    tpu.vector_store %arg11[%c0_125, %c0_126, %c0_127], %461 {strides = array<i32>} : memref<2x2x32xf32, #tpu.memory_space<vmem>>, vector<1x2x32xf32>,
    %c1_128 = arith.constant 1 : index
    %c0_129 = arith.constant 0 : index
    %c0_130 = arith.constant 0 : index
    %462 = vector.load %arg11[%c1_128, %c0_129, %c0_130] : memref<2x2x32xf32, #tpu.memory_space<vmem>>, vector<1x2x32xf32>
    %463 = vector.shape_cast %462 : vector<1x2x32xf32> to vector<2x32xf32>
    %464 = vector.shape_cast %441 : vector<2x32xf32> to vector<1x2x32xf32>
    tpu.vector_store %arg11[%c1_128, %c0_129, %c0_130], %464 {strides = array<i32>} : memref<2x2x32xf32, #tpu.memory_space<vmem>>, vector<1x2x32xf32>,
    %c0_i32_131 = arith.constant 0 : i32
    %465 = arith.cmpi eq, %arg1, %c0_i32_131 : i32
    %466 = arith.extui %465 : i1 to i32
    %c0_i32_132 = arith.constant 0 : i32
    %467 = arith.cmpi ne, %466, %c0_i32_132 : i32
    scf.if %467 {
      %c0_133 = arith.constant 0 : index
      %c0_134 = arith.constant 0 : index
      %c0_135 = arith.constant 0 : index
      %468 = vector.load %arg8[%c0_133, %c0_134, %c0_135] : memref<2x2x32xf32, #tpu.memory_space<vmem>>, vector<1x2x32xf32>
      %469 = vector.shape_cast %468 : vector<1x2x32xf32> to vector<2x32xf32>
      %470 = vector.shape_cast %421 : vector<2x32xf32> to vector<1x2x32xf32>
      tpu.vector_store %arg8[%c0_133, %c0_134, %c0_135], %470 {strides = array<i32>} : memref<2x2x32xf32, #tpu.memory_space<vmem>>, vector<1x2x32xf32>,
      %c1_136 = arith.constant 1 : index
      %c0_137 = arith.constant 0 : index
      %c0_138 = arith.constant 0 : index
      %471 = vector.load %arg8[%c1_136, %c0_137, %c0_138] : memref<2x2x32xf32, #tpu.memory_space<vmem>>, vector<1x2x32xf32>
      %472 = vector.shape_cast %471 : vector<1x2x32xf32> to vector<2x32xf32>
      %473 = vector.shape_cast %444 : vector<2x32xf32> to vector<1x2x32xf32>
      tpu.vector_store %arg8[%c1_136, %c0_137, %c0_138], %473 {strides = array<i32>} : memref<2x2x32xf32, #tpu.memory_space<vmem>>, vector<1x2x32xf32>,
      %c0_139 = arith.constant 0 : index
      %c0_140 = arith.constant 0 : index
      %c0_141 = arith.constant 0 : index
      %474 = vector.load %arg9[%c0_139, %c0_140, %c0_141] : memref<2x2x32xf32, #tpu.memory_space<vmem>>, vector<1x2x32xf32>
      %475 = vector.shape_cast %474 : vector<1x2x32xf32> to vector<2x32xf32>
      %476 = vector.shape_cast %418 : vector<2x32xf32> to vector<1x2x32xf32>
      tpu.vector_store %arg9[%c0_139, %c0_140, %c0_141], %476 {strides = array<i32>} : memref<2x2x32xf32, #tpu.memory_space<vmem>>, vector<1x2x32xf32>,
      %c1_142 = arith.constant 1 : index
      %c0_143 = arith.constant 0 : index
      %c0_144 = arith.constant 0 : index
      %477 = vector.load %arg9[%c1_142, %c0_143, %c0_144] : memref<2x2x32xf32, #tpu.memory_space<vmem>>, vector<1x2x32xf32>
      %478 = vector.shape_cast %477 : vector<1x2x32xf32> to vector<2x32xf32>
      %479 = vector.shape_cast %441 : vector<2x32xf32> to vector<1x2x32xf32>
      tpu.vector_store %arg9[%c1_142, %c0_143, %c0_144], %479 {strides = array<i32>} : memref<2x2x32xf32, #tpu.memory_space<vmem>>, vector<1x2x32xf32>,
    } else {
    }
    return
  }
  func.func @transform_0(%arg0: i32, %arg1: i32) -> (i32, i32, i32) {
    %c0_i32 = arith.constant 0 : i32
    %c0_i32_0 = arith.constant 0 : i32
    return %arg1, %arg0, %c0_i32 : i32, i32, i32
  }
  func.func @transform_1(%arg0: i32, %arg1: i32) -> (i32, i32, i32) {
    %c0_i32 = arith.constant 0 : i32
    %0 = arith.subi %c0_i32, %arg1 : i32
    %c1_i32 = arith.constant 1 : i32
    %c0_i32_0 = arith.constant 0 : i32
    return %0, %arg0, %c1_i32 : i32, i32, i32
  }
  func.func @transform_2(%arg0: i32, %arg1: i32) -> (i32, i32) {
    %c0_i32 = arith.constant 0 : i32
    %c0_i32_0 = arith.constant 0 : i32
    %c0_i32_1 = arith.constant 0 : i32
    return %c0_i32, %c0_i32_0 : i32, i32
  }
  func.func @transform_3(%arg0: i32, %arg1: i32) -> (i32, i32) {
    %c0_i32 = arith.constant 0 : i32
    %c0_i32_0 = arith.constant 0 : i32
    %c0_i32_1 = arith.constant 0 : i32
    return %c0_i32, %c0_i32_0 : i32, i32
  }
  func.func @transform_4(%arg0: i32, %arg1: i32) -> (i32, i32, i32) {
    %c0_i32 = arith.constant 0 : i32
    %c0_i32_0 = arith.constant 0 : i32
    return %arg1, %arg0, %c0_i32 : i32, i32, i32
  }
  func.func @transform_5(%arg0: i32, %arg1: i32) -> (i32, i32, i32) {
    %c0_i32 = arith.constant 0 : i32
    %0 = arith.subi %c0_i32, %arg1 : i32
    %c0_i32_0 = arith.constant 0 : i32
    %c0_i32_1 = arith.constant 0 : i32
    return %0, %arg0, %c0_i32_0 : i32, i32, i32
  }
  func.func @transform_6(%arg0: i32, %arg1: i32) -> (i32, i32, i32) {
    %c0_i32 = arith.constant 0 : i32
    %c0_i32_0 = arith.constant 0 : i32
    %c0_i32_1 = arith.constant 0 : i32
    return %c0_i32, %arg0, %c0_i32_0 : i32, i32, i32
  }
  func.func @transform_7(%arg0: i32, %arg1: i32) -> (i32, i32, i32) {
    %c0_i32 = arith.constant 0 : i32
    %c0_i32_0 = arith.constant 0 : i32
    %c0_i32_1 = arith.constant 0 : i32
    return %c0_i32, %arg0, %c0_i32_0 : i32, i32, i32
  }
}

</mosaic_0001>

<bundles_post_ra>
// kernel: transcription_forward.5
= control target key start
LH: loop header
LB: loop body
LE: loop exit
PB: predicated region body
PF: predicated region fallthrough
CT: control target
= control target key end

     0   :  { %vm95_vm0 = vcmask 392192   ;;  %vm433_vm1 = vcmask 1041409   ;;  %vm436_vm2 = vcmask 1042434   ;;  %vm439_vm3 = vcmask 1043459   ;;  %s715_s1 = inlined_call_operand.vmem [shape: bf16[48,128], index: 1, kind: input, shape index: {}]   ;;  %s716_s0 = inlined_call_operand.vmem [shape: bf16[16,8,48], index: 0, kind: input, shape index: {}]   ;;  %s717_s2 = inlined_call_operand.vmem [shape: f32[1,128], index: 2, kind: input, shape index: {}]   ;;  %s718_s3 = inlined_call_operand.vmem [shape: bf16[16,128], index: 3, kind: output, shape index: {}]  }
   0x1   :  { %v568_v0 = vld [vmem:[%s715_s1] sm:$0xff]   ;;  %v569_v1 = vld [vmem:[%s715_s1 + $0x8] sm:$0xff]   ;;  %v570_v2 = vld [vmem:[%s715_s1 + $0x10] sm:$0xff]   ;;  %vm442_vm4 = vcmask 1044484   ;;  %vm445_vm5 = vcmask 1045509   ;;  %vm448_vm6 = vcmask 1046534  }
   0x2   :  { %540 = vmatprep.subr.bf16.mxu0 %v568_v0  ;;  %562 = vmatprep.subr.bf16.mxu1 %v568_v0  ;;  %v571_v3 = vld [vmem:[%s716_s0] sm:$0xff]   ;;  %v573_v5 = vld [vmem:[%s716_s0 + $0x8] sm:$0xff]   ;;  %v575_v7 = vld [vmem:[%s716_s0 + $0x10] sm:$0xff]   ;;  %vm451_vm7 = vcmask 1047559  }
   0x3   :  { %541 = vmatpush3.bf16.msra.mxu0 %v568_v0  ;;  %565 = vmatpush3.bf16.msra.mxu1 %v568_v0  ;;  %v572_v4 = vld [vmem:[%s716_s0 + $0x20] sm:$0xff]   ;;  %v574_v6 = vld [vmem:[%s716_s0 + $0x28] sm:$0xff]   ;;  %v576_v8 = vld [vmem:[%s716_s0 + $0x30] sm:$0xff]  }
   0x4   :  { %542 = vmatprep.subr.bf16.mxu0 %v569_v1  ;;  %563 = vmatprep.subr.bf16.mxu1 %v569_v1  ;;  %v577_v9 = vld [vmem:[%s716_s0 + $0x18] sm:$0xff]   ;;  %v675_v55 = vld [vmem:[%s717_s2] ss:$0 sm:$0xff] }
   0x5   :  { %546 = vmatprep.mubr.msk.bf16.mxu0 %vm95_vm0, %v571_v3  ;;  %554 = vmatprep.mubr.msk.bf16.mxu1 %vm95_vm0, %v572_v4  ;;  %v578_v10 = vld [vmem:[%s716_s0 + $0x38] sm:$0xff]  }
   0x7   :  { %543 = vmatpush3.bf16.msra.mxu0 %v569_v1  ;;  %566 = vmatpush3.bf16.msra.mxu1 %v569_v1 }
   0x8   :  { %544 = vmatprep.subr.bf16.mxu0 %v570_v2  ;;  %564 = vmatprep.subr.bf16.mxu1 %v570_v2 }
   0xb   :  { %545 = vmatpush3.bf16.msra.mxu0 %v570_v2  ;;  %567 = vmatpush3.bf16.msra.mxu1 %v570_v2 }
   0xe   :  { %547 = vmatmul.mubr.msk.bf16.vlgmr.msra.gmra.mrb[0].mxu0 %vm95_vm0, %v573_v5  ;;  %555 = vmatmul.mubr.msk.bf16.vlgmr.msra.gmra.mrb[0].mxu1 %vm95_vm0, %v574_v6 }
   0xf   :  { %550 = vmatprep.mubr.msk.bf16.mxu0 %vm95_vm0, %v575_v7  ;;  %558 = vmatprep.mubr.msk.bf16.mxu1 %vm95_vm0, %v576_v8 }
  0x16   :  { %551 = vmatmul.mubr.msk.bf16.gmra.mrb[4].mxu0 %vm95_vm0, %v577_v9  ;;  %559 = vmatmul.mubr.msk.bf16.gmra.mrb[4].mxu1 %vm95_vm0, %v578_v10 }
  0xe1   :  { %v548_v11 = vpop.f32.mrb[0].mxu0  ;;  %v556_v12 = vpop.f32.mrb[0].mxu1 }
  0xe2   :  { %v229_v13 = vrot.slane %v548_v11, 4  ;;  %v277_v14 = vrot.slane %v556_v12, 4  ;;  %v154_v15 = vpop.f32.mrb[1].mxu0  ;;  %v186_v16 = vpop.f32.mrb[1].mxu1 }
  0xe3   :  { %v217_v17 = vrot.slane %v154_v15, 4  ;;  %v265_v18 = vrot.slane %v186_v16, 4  ;;  %v549_v19 = vpop.f32.mrb[2].mxu0  ;;  %v557_v20 = vpop.f32.mrb[2].mxu1 }
  0xe4   :  { %v230_v21 = vmax.f32 %v548_v11, %v229_v13  ;;  %v278_v22 = vmax.f32 %v556_v12, %v277_v14  ;;  %v235_v23 = vrot.slane %v549_v19, 4  ;;  %v283_v24 = vrot.slane %v557_v20, 4  ;;  %v157_v25 = vpop.f32.mrb[3].mxu0  ;;  %v189_v26 = vpop.f32.mrb[3].mxu1 }
  0xe5   :  { %v218_v27 = vmax.f32 %v154_v15, %v217_v17  ;;  %v266_v28 = vmax.f32 %v186_v16, %v265_v18  ;;  %v223_v29 = vrot.slane %v157_v25, 4  ;;  %v271_v30 = vrot.slane %v189_v26, 4 }
  0xe6   :  { %v231_v31 = vrot.slane %v230_v21, 2  ;;  %v279_v32 = vrot.slane %v278_v22, 2  ;;  %v236_v33 = vmax.f32 %v549_v19, %v235_v23  ;;  %v284_v34 = vmax.f32 %v557_v20, %v283_v24 }
  0xe7   :  { %v219_v35 = vrot.slane %v218_v27, 2  ;;  %v267_v36 = vrot.slane %v266_v28, 2  ;;  %v224_v37 = vmax.f32 %v157_v25, %v223_v29  ;;  %v272_v38 = vmax.f32 %v189_v26, %v271_v30 }
  0xe8   :  { %v232_v39 = vmax.f32 %v230_v21, %v231_v31  ;;  %v280_v40 = vmax.f32 %v278_v22, %v279_v32  ;;  %v237_v41 = vrot.slane %v236_v33, 2  ;;  %v285_v42 = vrot.slane %v284_v34, 2 }
  0xe9   :  { %v220_v43 = vmax.f32 %v218_v27, %v219_v35  ;;  %v268_v44 = vmax.f32 %v266_v28, %v267_v36  ;;  %v225_v45 = vrot.slane %v224_v37, 2  ;;  %v273_v46 = vrot.slane %v272_v38, 2  ;;  %v552_v47 = vpop.f32.mrb[4].mxu0  ;;  %v560_v48 = vpop.f32.mrb[4].mxu1 }
  0xea   :  { %v233_v49 = vrot.slane %v232_v39, 1  ;;  %v281_v50 = vrot.slane %v280_v40, 1  ;;  %v238_v51 = vmax.f32 %v236_v33, %v237_v41  ;;  %v286_v52 = vmax.f32 %v284_v34, %v285_v42  ;;  %v170_v53 = vpop.f32.mrb[5].mxu0  ;;  %v202_v54 = vpop.f32.mrb[5].mxu1 }
  0xeb   :  { %v221_v56 = vrot.slane %v220_v43, 1  ;;  %v269_v57 = vrot.slane %v268_v44, 1  ;;  %v226_v58 = vmax.f32 %v224_v37, %v225_v45  ;;  %v274_v59 = vmax.f32 %v272_v38, %v273_v46  ;;  %v553_v60 = vpop.f32.mrb[6].mxu0  ;;  %v561_v61 = vpop.f32.mrb[6].mxu1 }
  0xec   :  { %v234_v62 = vmax.f32 %v232_v39, %v233_v49  ;;  %v282_v63 = vmax.f32 %v280_v40, %v281_v50  ;;  %v239_v0 = vrot.slane %v238_v51, 1  ;;  %v287_v1 = vrot.slane %v286_v52, 1  ;;  %v677_v2 = vpop.f32.mrb[7].mxu0  ;;  %v679_v3 = vpop.f32.mrb[7].mxu1 }
  0xed   :  { %v222_v4 = vmax.f32 %v220_v43, %v221_v56  ;;  %v270_v5 = vmax.f32 %v268_v44, %v269_v57  ;;  %v227_v6 = vrot.slane %v226_v58, 1  ;;  %v275_v7 = vrot.slane %v274_v59, 1 }
  0xee   :  { %v322_v8 = vadd.f32 %v675_v55, %v234_v62  ;;  %v330_v9 = vadd.f32 %v675_v55, %v282_v63  ;;  %v240_v10 = vmax.f32 %v238_v51, %v239_v0  ;;  %v288_v11 = vmax.f32 %v286_v52, %v287_v1 }
  0xef   :  { %v320_v12 = vadd.f32 %v675_v55, %v222_v4  ;;  %v328_v13 = vadd.f32 %v675_v55, %v270_v5  ;;  %v228_v14 = vmax.f32 %v226_v58, %v227_v6  ;;  %v276_v15 = vmax.f32 %v274_v59, %v275_v7 }
  0xf0   :  { %579 = vtanh.f32 %v322_v8  ;;  %v323_v16 = vadd.f32 %v675_v55, %v240_v10  ;;  %v331_v17 = vadd.f32 %v675_v55, %v288_v11  ;;  %v253_v18 = vrot.slane %v552_v47, 4 }
  0xf1   :  { %581 = vtanh.f32 %v330_v9  ;;  %v321_v19 = vadd.f32 %v675_v55, %v228_v14  ;;  %v329_v20 = vadd.f32 %v675_v55, %v276_v15  ;;  %v301_v21 = vrot.slane %v560_v48, 4 }
  0xf2   :  { %583 = vtanh.f32 %v320_v12  ;;  %v254_v22 = vmax.f32 %v552_v47, %v253_v18  ;;  %v241_v23 = vrot.slane %v170_v53, 4  ;;  %v289_v24 = vrot.slane %v202_v54, 4 }
  0xf3   :  { %585 = vtanh.f32 %v328_v13  ;;  %v302_v25 = vmax.f32 %v560_v48, %v301_v21  ;;  %v259_v26 = vrot.slane %v553_v60, 4  ;;  %v307_v27 = vrot.slane %v561_v61, 4 }
  0xf4   :  { %587 = vtanh.f32 %v323_v16  ;;  %v255_v28 = vrot.slane %v254_v22, 2  ;;  %v242_v29 = vmax.f32 %v170_v53, %v241_v23  ;;  %v290_v30 = vmax.f32 %v202_v54, %v289_v24 }
  0xf5   :  { %589 = vtanh.f32 %v331_v17  ;;  %v303_v31 = vrot.slane %v302_v25, 2  ;;  %v260_v32 = vmax.f32 %v553_v60, %v259_v26  ;;  %v308_v33 = vmax.f32 %v561_v61, %v307_v27 }
  0xf6   :  { %591 = vtanh.f32 %v321_v19  ;;  %v256_v34 = vmax.f32 %v254_v22, %v255_v28  ;;  %v243_v35 = vrot.slane %v242_v29, 2  ;;  %v291_v36 = vrot.slane %v290_v30, 2 }
  0xf7   :  { %593 = vtanh.f32 %v329_v20  ;;  %v304_v37 = vmax.f32 %v302_v25, %v303_v31  ;;  %v261_v38 = vrot.slane %v260_v32, 2  ;;  %v309_v39 = vrot.slane %v308_v33, 2 }
  0xf8   :  { %v257_v40 = vrot.slane %v256_v34, 1  ;;  %v244_v41 = vmax.f32 %v242_v29, %v243_v35  ;;  %v292_v42 = vmax.f32 %v290_v30, %v291_v36  ;;  %v247_v49 = vrot.slane %v677_v2, 4 }
  0xf9   :  { %v305_v43 = vrot.slane %v304_v37, 1  ;;  %v262_v44 = vmax.f32 %v260_v32, %v261_v38  ;;  %v310_v52 = vmax.f32 %v308_v33, %v309_v39  ;;  %v295_v7 = vrot.slane %v679_v3, 4 }
  0xfa   :  { %v580_v45 = vpop.eup %579  ;;  %v258_v46 = vmax.f32 %v256_v34, %v257_v40  ;;  %v245_v47 = vrot.slane %v244_v41, 1  ;;  %v293_v48 = vrot.slane %v292_v42, 1  ;;  %v248_v0 = vmax.f32 %v677_v2, %v247_v49 }
  0xfb   :  { %v582_v50 = vpop.eup %581  ;;  %v515_v51 = vpack.c.bf16 %v580_v45, %v580_v45  ;;  %v306_v54 = vmax.f32 %v304_v37, %v305_v43  ;;  %v263_v60 = vrot.slane %v262_v44, 1  ;;  %v311_v6 = vrot.slane %v310_v52, 1 }
  0xfc   :  { %v584_v53 = vpop.eup %583  ;;  %v246_v56 = vmax.f32 %v244_v41, %v245_v47  ;;  %v523_v58 = vpack.c.bf16 %v582_v50, %v582_v50  ;;  %v294_v59 = vmax.f32 %v292_v42, %v293_v48  ;;  %v326_v62 = vadd.f32 %v675_v55, %v258_v46 }
  0xfd   :  { %v586_v57 = vpop.eup %585  ;;  %v418_v4 = vunpack.c.l.b16 %v515_v51  ;;  %v513_v9 = vpack.c.bf16 %v584_v53, %v584_v53  ;;  %v334_v11 = vadd.f32 %v675_v55, %v306_v54  ;;  %v264_v16 = vmax.f32 %v262_v44, %v263_v60 }
  0xfe   :  { %v588_v61 = vpop.eup %587  ;;  %v324_v63 = vadd.f32 %v675_v55, %v246_v56  ;;  %v426_v13 = vunpack.c.l.b16 %v523_v58  ;;  %v332_v15 = vadd.f32 %v675_v55, %v294_v59  ;;  %v521_v17 = vpack.c.bf16 %v586_v57, %v586_v57 }
  0xff   :  { %v590_v1 = vpop.eup %589  ;;  %v516_v5 = vpack.c.bf16 %v588_v61, %v588_v61  ;;  %v249_v18 = vrot.slane %v248_v0, 2  ;;  %v296_v21 = vmax.f32 %v679_v3, %v295_v7  ;;  %v416_v22 = vunpack.c.l.b16 %v513_v9 }
 0x100   :  { %v592_v8 = vpop.eup %591  ;;  %v524_v10 = vpack.c.bf16 %v590_v1, %v590_v1  ;;  %595 = vtanh.f32 %v324_v63  ;;  %v312_v25 = vmax.f32 %v310_v52, %v311_v6  ;;  %v327_v27 = vadd.f32 %v675_v55, %v264_v16 }
 0x101   :  { %v594_v12 = vpop.eup %593  ;;  %v514_v14 = vpack.c.bf16 %v592_v8, %v592_v8  ;;  %597 = vtanh.f32 %v326_v62  ;;  %v419_v19 = vunpack.c.l.b16 %v516_v5  ;;  %v250_v28 = vmax.f32 %v248_v0, %v249_v18 }
 0x102   :  { %v522_v2 = vpack.c.bf16 %v594_v12, %v594_v12  ;;  %599 = vtanh.f32 %v332_v15  ;;  %v427_v23 = vunpack.c.l.b16 %v524_v10  ;;  %v297_v29 = vrot.slane %v296_v21, 2 }
 0x103   :  { %v417_v20 = vunpack.c.l.b16 %v514_v14  ;;  %v435_v30 = vrot.slane %v418_v4, 6  ;;  %v455_v31 = vrot.slane %v426_v13, 6  ;;  %v424_v32 = vunpack.c.l.b16 %v521_v17 }
 0x104   :  { %v425_v24 = vunpack.c.l.b16 %v522_v2  ;;  %v438_v34 = vrot.slane %v419_v19, 5  ;;  %v251_v36 = vrot.slane %v250_v28, 1  ;;  %v298_v37 = vmax.f32 %v296_v21, %v297_v29 }
 0x105   :  { %v432_v26 = vrot.slane %v417_v20, 7  ;;  %v457_v38 = vrot.slane %v427_v23, 5  ;;  %v335_v40 = vadd.f32 %v675_v55, %v312_v25  ;;  %601 = vtanh.f32 %v327_v27 }
 0x106   :  { %v453_v33 = vrot.slane %v425_v24, 7  ;;  %v252_v43 = vmax.f32 %v250_v28, %v251_v36  ;;  %v299_v46 = vrot.slane %v298_v37, 1  ;;  %603 = vtanh.f32 %v334_v11 }
 0x107   :  { %v434_v35 = vsel %vm433_vm1, %v432_v26, %v416_v22  ;;  %605 = vtanh.f32 %v335_v40 }
 0x108   :  { %v437_v3 = vsel %vm436_vm2, %v435_v30, %v434_v35  ;;  %v454_v39 = vsel %vm433_vm1, %v453_v33, %v424_v32  ;;  %v325_v48 = vadd.f32 %v675_v55, %v252_v43  ;;  %v300_v50 = vmax.f32 %v298_v37, %v299_v46 }
 0x109   :  { %v456_v41 = vsel %vm436_vm2, %v455_v31, %v454_v39  ;;  %v440_v42 = vsel %vm439_vm3, %v438_v34, %v437_v3 }
 0x10a   :  { %v596_v44 = vpop.eup %595  ;;  %v458_v45 = vsel %vm439_vm3, %v457_v38, %v456_v41  ;;  %607 = vtanh.f32 %v325_v48  ;;  %v333_v54 = vadd.f32 %v675_v55, %v300_v50 }
 0x10b   :  { %v517_v47 = vpack.c.bf16 %v596_v44, %v596_v44  ;;  %v598_v49 = vpop.eup %597 }
 0x10c   :  { %v600_v51 = vpop.eup %599  ;;  %609 = vtanh.f32 %v333_v54  ;;  %v519_v63 = vpack.c.bf16 %v598_v49, %v598_v49 }
 0x10d   :  { %v420_v52 = vunpack.c.l.b16 %v517_v47  ;;  %v525_v53 = vpack.c.bf16 %v600_v51, %v600_v51 }
 0x10e   :  { %v422_v7 = vunpack.c.l.b16 %v519_v63 }
 0x10f   :  { %v441_v56 = vrot.slane %v420_v52, 4  ;;  %v428_v57 = vunpack.c.l.b16 %v525_v53  ;;  %v602_v60 = vpop.eup %601 }
 0x110   :  { %v604_v62 = vpop.eup %603  ;;  %v520_v1 = vpack.c.bf16 %v602_v60, %v602_v60  ;;  %v447_v14 = vrot.slane %v422_v7, 2 }
 0x111   :  { %v443_v58 = vsel %vm442_vm4, %v441_v56, %v440_v42  ;;  %v459_v59 = vrot.slane %v428_v57, 4  ;;  %v606_v0 = vpop.eup %605  ;;  %v527_v5 = vpack.c.bf16 %v604_v62, %v604_v62 }
 0x112   :  { %v528_v8 = vpack.c.bf16 %v606_v0, %v606_v0  ;;  %v423_v10 = vunpack.c.l.b16 %v520_v1 }
 0x113   :  { %v460_v61 = vsel %vm442_vm4, %v459_v59, %v458_v45  ;;  %v430_v12 = vunpack.c.l.b16 %v527_v5 }
 0x114   :  { %v608_v4 = vpop.eup %607  ;;  %v431_v15 = vunpack.c.l.b16 %v528_v8  ;;  %v450_v17 = vrot.slane %v423_v10, 1 }
 0x115   :  { %v518_v6 = vpack.c.bf16 %v608_v4, %v608_v4  ;;  %v463_v20 = vrot.slane %v430_v12, 2 }
 0x116   :  { %v610_v9 = vpop.eup %609  ;;  %v465_v22 = vrot.slane %v431_v15, 1 }
 0x117   :  { %v421_v11 = vunpack.c.l.b16 %v518_v6  ;;  %v526_v55 = vpack.c.bf16 %v610_v9, %v610_v9 }
 0x119   :  { %v444_v13 = vrot.slane %v421_v11, 3  ;;  %v429_v16 = vunpack.c.l.b16 %v526_v55 }
 0x11b   :  { %v446_v2 = vsel %vm445_vm5, %v444_v13, %v443_v58  ;;  %v461_v19 = vrot.slane %v429_v16, 3 }
 0x11c   :  { %v449_v18 = vsel %vm448_vm6, %v447_v14, %v446_v2 }
 0x11d   :  { %v452_v21 = vsel %vm451_vm7, %v450_v17, %v449_v18  ;;  %v462_v24 = vsel %vm445_vm5, %v461_v19, %v460_v61 }
 0x11e   :  { %v467_v23 = vpack.c.b16 %v452_v21, %v452_v21  ;;  %v464_v25 = vsel %vm448_vm6, %v463_v20, %v462_v24 }
 0x11f   :  { %v466_v26 = vsel %vm451_vm7, %v465_v22, %v464_v25 }
 0x120   :  { %471 = vst [vmem:[%s718_s3] sm:$0xf] %v467_v23  ;;  %v468_v27 = vpack.c.b16 %v466_v26, %v466_v26 }
 0x122   :  { %472 = vst [vmem:[%s718_s3 + $0x4] sm:$0xf] %v468_v27 }

// kernel: transcription_forward.6
= control target key start
LH: loop header
LB: loop body
LE: loop exit
PB: predicated region body
PF: predicated region fallthrough
CT: control target
= control target key end

     0   :  { %v754_v1 = vmov 0   ;;  %v755_v5 = vmov 1966171168   ;;  %v70_v7 = vlaneseq  ;;  %vm303_vm0 = vcmask 130048   ;;  %s944_s3 = inlined_call_operand.vmem [shape: bf16[128,256], index: 3, kind: input, shape index: {}]   ;;  %s945_s2 = inlined_call_operand.vmem [shape: bf16[16,256], index: 2, kind: input, shape index: {}]   ;;  %s946_s0 = inlined_call_operand.vmem [shape: bf16[8,2,16], index: 0, kind: input, shape index: {}]   ;;  %s947_s1 = inlined_call_operand.vmem [shape: bf16[8,2,128], index: 1, kind: input, shape index: {}]   ;;  %s948_s4 = inlined_call_operand.vmem [shape: f32[1,256], index: 4, kind: input, shape index: {}]   ;;  %s949_s5 = inlined_call_operand.vmem [shape: bf16[8,2,256], index: 5, kind: output, shape index: {}]  }
   0x1   :  { %v727_v0 = vld [vmem:[%s944_s3 + $0x4] ss:$8 sps:$4 sm:$0xff]   ;;  %339 = vmatprep.mubr.bf16.mxu0 %v754_v1  ;;  %225 = vmatprep.mubr.bf16.mxu1 %v754_v1  ;;  %v729_v2 = vld [vmem:[%s944_s3] ss:$8 sps:$4 sm:$0xff]   ;;  %v730_v3 = vld [vmem:[%s944_s3 + $0x14] ss:$8 sps:$4 sm:$0xff]   ;;  %v68_v6 = vunpack.c.l.s4 %v755_v5 }
   0x2   :  { %193 = vmatprep.subr.bf16.mxu1 %v727_v0  ;;  %v732_v4 = vld [vmem:[%s944_s3 + $0x10] ss:$8 sps:$4 sm:$0xff]   ;;  %v733_v8 = vld [vmem:[%s944_s3 + $0x24] ss:$8 sps:$4 sm:$0xff]   ;;  %v735_v9 = vld [vmem:[%s944_s3 + $0x20] ss:$8 sps:$4 sm:$0xff]  }
   0x3   :  { %194 = vmatpush1.bf16.msra.mxu1 %v729_v2  ;;  %v69_v10 = vunpack.c.0.s8 %v68_v6  ;;  %v805_v11 = vshrl.u32 %v70_v7, 7  ;;  %v736_v12 = vld [vmem:[%s944_s3 + $0x34] ss:$8 sps:$4 sm:$0xff]   ;;  %v748_v13 = vld [vmem:[%s945_s2 + $0x4] ss:$8 sps:$4 sm:$0xff]  }
   0x4   :  { %195 = vmatprep.subr.bf16.mxu1 %v730_v3  ;;  %v750_v14 = vld [vmem:[%s945_s2] ss:$8 sps:$4 sm:$0xff]   ;;  %v738_v15 = vld [vmem:[%s944_s3 + $0x30] ss:$8 sps:$4 sm:$0xff]   ;;  %v739_v16 = vld [vmem:[%s944_s3 + $0x44] ss:$8 sps:$4 sm:$0xff]   ;;  %307 = vmatprep.subr.bf16.mxu0 %v748_v13 }
   0x5   :  { %v823_v17 = vsub.s32 %v69_v10, %v805_v11  ;;  %v21_v18 = vld [vmem:[%s946_s0] sm:$0x1]  ;;  %v22_v19 = vld [vmem:[%s946_s0 + $0x1] sm:$0x1]  ;;  %v23_v20 = vld [vmem:[%s946_s0 + $0x2] sm:$0x1]  ;;  %308 = vmatpush1.bf16.msra.mxu0 %v750_v14 }
   0x6   :  { %v741_v21 = vld [vmem:[%s944_s3 + $0x40] ss:$8 sps:$4 sm:$0xff]   ;;  %v25_v23 = vld [vmem:[%s946_s0 + $0x4] sm:$0x1]  ;;  %v26_v24 = vld [vmem:[%s946_s0 + $0x5] sm:$0x1]  ;;  %v244_v25 = vcombine.low %v21_v18, %v22_v19 }
   0x7   :  { %196 = vmatpush1.bf16.msra.mxu1 %v732_v4  ;;  %v24_v22 = vld [vmem:[%s946_s0 + $0x3] sm:$0x1]  ;;  %v742_v26 = vld [vmem:[%s944_s3 + $0x54] ss:$8 sps:$4 sm:$0xff]   ;;  %v27_v27 = vld [vmem:[%s946_s0 + $0x6] sm:$0x1]  ;;  %v246_v30 = vcombine.low %v25_v23, %v26_v24 }
   0x8   :  { %197 = vmatprep.subr.bf16.mxu1 %v733_v8  ;;  %v28_v28 = vld [vmem:[%s946_s0 + $0x7] sm:$0x1]  ;;  %v245_v29 = vcombine.low %v23_v20, %v24_v22  ;;  %v31_v31 = vld [vmem:[%s947_s1] sm:$0x1]  ;;  %v254_v33 = vrot.slane %v244_v25, %v823_v17  ;;  %v32_v34 = vld [vmem:[%s947_s1 + $0x1] sm:$0x1] }
   0x9   :  { %v247_v32 = vcombine.low %v27_v27, %v28_v28  ;;  %v33_v35 = vld [vmem:[%s947_s1 + $0x2] sm:$0x1]  ;;  %v34_v36 = vld [vmem:[%s947_s1 + $0x3] sm:$0x1]  ;;  %v268_v38 = vrot.slane %v246_v30, %v823_v17  ;;  %v35_v39 = vld [vmem:[%s947_s1 + $0x4] sm:$0x1]  ;;  %v63_v42 = vcombine.low %v31_v31, %v32_v34 }
   0xa   :  { %v261_v37 = vrot.slane %v245_v29, %v823_v17  ;;  %v36_v40 = vld [vmem:[%s947_s1 + $0x5] sm:$0x1]  ;;  %v37_v41 = vld [vmem:[%s947_s1 + $0x6] sm:$0x1]  ;;  %v64_v43 = vcombine.low %v33_v35, %v34_v36  ;;  %v38_v45 = vld [vmem:[%s947_s1 + $0x7] sm:$0x1] }
   0xb   :  { %198 = vmatpush1.bf16.msra.mxu1 %v735_v9  ;;  %v275_v44 = vrot.slane %v247_v32, %v823_v17  ;;  %v65_v46 = vcombine.low %v35_v39, %v36_v40  ;;  %v66_v48 = vcombine.low %v37_v41, %v38_v45  ;;  %v73_v49 = vrot.slane %v63_v42, %v823_v17  ;;  %v744_v51 = vld [vmem:[%s944_s3 + $0x50] ss:$8 sps:$4 sm:$0xff]   ;;  %v745_v54 = vld [vmem:[%s944_s3 + $0x64] ss:$8 sps:$4 sm:$0xff]   ;;  %v747_v60 = vld [vmem:[%s944_s3 + $0x60] ss:$8 sps:$4 sm:$0xff]  }
   0xc   :  { %199 = vmatprep.subr.bf16.mxu1 %v736_v12  ;;  %v276_v47 = vcombine.low %v254_v33, %v261_v37  ;;  %v80_v50 = vrot.slane %v64_v43, %v823_v17  ;;  %v751_v62 = vld [vmem:[%s944_s3 + $0x74] ss:$8 sps:$4 sm:$0xff]   ;;  %v753_v1 = vld [vmem:[%s944_s3 + $0x70] ss:$8 sps:$4 sm:$0xff]   ;;  %v756_v5 = vmov 1983009808  }
   0xd   :  { %v277_v52 = vcombine.low %v268_v38, %v275_v44  ;;  %v87_v53 = vrot.slane %v65_v46, %v823_v17  ;;  %v94_v56 = vrot.slane %v66_v48, %v823_v17  ;;  %v357_v6 = vunpack.c.l.s4 %v756_v5  ;;  %v398_v10 = vld [vmem:[%s948_s4] sm:$0x3] }
   0xe   :  { %v284_v55 = vrot.slane %v276_v47, %v823_v17  ;;  %v95_v58 = vcombine.low %v73_v49, %v80_v50  ;;  %v402_v7 = vsub.s32 0, %v805_v11  ;;  %v406_v8 = vsub.s32 1, %v805_v11 }
   0xf   :  { %200 = vmatpush1.bf16.msra.mxu1 %v738_v15  ;;  %v291_v57 = vrot.slane %v277_v52, %v823_v17  ;;  %v96_v59 = vcombine.low %v87_v53, %v94_v56  ;;  %v358_v13 = vunpack.c.0.s8 %v357_v6 }
  0x10   :  { %201 = vmatprep.subr.bf16.mxu1 %v739_v16  ;;  %v103_v63 = vrot.slane %v95_v58, %v823_v17  ;;  %v403_v14 = vrot.slane %v398_v10, %v402_v7  ;;  %v407_v15 = vrot.slane %v398_v10, %v406_v8 }
  0x11   :  { %v292_v61 = vcombine.low %v284_v55, %v291_v57  ;;  %v110_v0 = vrot.slane %v96_v59, %v823_v17  ;;  %v361_v18 = vsub.s32 %v358_v13, %v805_v11 }
  0x12   :  { %v408_v19 = vcombine.low %v403_v14, %v407_v15 }
  0x13   :  { %202 = vmatpush1.bf16.msra.mxu1 %v741_v21  ;;  %703 = vmatmul.mubr.msk.bf16.vlgmr.msra.gmra.mrb[0].mxu0 %vm303_vm0, %v292_v61  ;;  %v111_v2 = vcombine.low %v103_v63, %v110_v0 }
  0x14   :  { %203 = vmatprep.subr.bf16.mxu1 %v742_v26  ;;  %v415_v28 = vrot.slane %v408_v19, %v361_v18 }
  0x17   :  { %204 = vmatpush1.bf16.msra.mxu1 %v744_v51 }
  0x18   :  { %205 = vmatprep.subr.bf16.mxu1 %v745_v54 }
  0x1b   :  { %206 = vmatpush1.bf16.msra.mxu1 %v747_v60 }
  0x1c   :  { %207 = vmatprep.subr.bf16.mxu1 %v751_v62 }
  0x1f   :  { %208 = vmatpush1.bf16.msra.mxu1 %v753_v1 }
  0x22   :  { %226 = vmatmul.mubr.bf16.vlgmr.msra.gmra.mrb[0].mxu1 %v111_v2 }
  0xe6   :  { %v341_v3 = vpop.f32.mrb[0].mxu0 }
  0xe7   :  { %v343_v4 = vpop.f32.mrb[1].mxu0 }
  0xe8   :  { %v345_v9 = vpop.f32.mrb[2].mxu0 }
  0xe9   :  { %v347_v12 = vpop.f32.mrb[3].mxu0 }
  0xf5   :  { %v227_v16 = vpop.f32.mrb[0].mxu1 }
  0xf6   :  { %v342_v20 = vadd.f32 %v341_v3, %v227_v16  ;;  %v229_v21 = vpop.f32.mrb[1].mxu1 }
  0xf7   :  { %v344_v22 = vadd.f32 %v343_v4, %v229_v21  ;;  %v231_v23 = vpop.f32.mrb[2].mxu1 }
  0xf8   :  { %v346_v24 = vadd.f32 %v345_v9, %v231_v23  ;;  %v233_v25 = vpop.f32.mrb[3].mxu1 }
  0xf9   :  { %v354_v26 = vcombine.low %v342_v20, %v344_v22  ;;  %v355_v27 = vcombine.high %v342_v20, %v344_v22  ;;  %v348_v29 = vadd.f32 %v347_v12, %v233_v25 }
  0xfb   :  { %v362_v30 = vrot.slane %v354_v26, %v361_v18  ;;  %v369_v31 = vrot.slane %v355_v27, %v361_v18  ;;  %v372_v32 = vcombine.low %v346_v24, %v348_v29  ;;  %v373_v33 = vcombine.high %v346_v24, %v348_v29 }
  0xfd   :  { %v370_v34 = vcombine.high %v362_v30, %v362_v30  ;;  %v371_v35 = vcombine.high %v369_v31, %v369_v31  ;;  %v417_v36 = vadd.f32 %v415_v28, %v362_v30  ;;  %v419_v37 = vadd.f32 %v415_v28, %v369_v31 }
  0xfe   :  { %v380_v11 = vrot.slane %v372_v32, %v361_v18  ;;  %v387_v38 = vrot.slane %v373_v33, %v361_v18 }
  0xff   :  { %v418_v39 = vadd.f32 %v415_v28, %v370_v34  ;;  %v420_v40 = vadd.f32 %v415_v28, %v371_v35  ;;  %v439_v41 = vrot.slane %v417_v36, %v361_v18  ;;  %v455_v42 = vrot.slane %v419_v37, %v361_v18 }
 0x100   :  { %v388_v43 = vcombine.high %v380_v11, %v380_v11  ;;  %v389_v44 = vcombine.high %v387_v38, %v387_v38  ;;  %v421_v45 = vadd.f32 %v415_v28, %v380_v11  ;;  %v423_v46 = vadd.f32 %v415_v28, %v387_v38 }
 0x101   :  { %v440_v47 = vcombine.high %v439_v41, %v439_v41  ;;  %v447_v48 = vrot.slane %v418_v39, %v361_v18  ;;  %v456_v49 = vcombine.high %v455_v42, %v455_v42  ;;  %v463_v50 = vrot.slane %v420_v40, %v361_v18 }
 0x102   :  { %v422_v51 = vadd.f32 %v415_v28, %v388_v43  ;;  %v424_v52 = vadd.f32 %v415_v28, %v389_v44  ;;  %v471_v53 = vrot.slane %v421_v45, %v361_v18  ;;  %v487_v54 = vrot.slane %v423_v46, %v361_v18 }
 0x103   :  { %v448_v55 = vcombine.high %v447_v48, %v447_v48  ;;  %v464_v56 = vcombine.high %v463_v50, %v463_v50  ;;  %v704_v57 = vpack.c.bf16 %v440_v47, %v439_v41  ;;  %v706_v58 = vpack.c.bf16 %v456_v49, %v455_v42 }
 0x104   :  { %v472_v59 = vcombine.high %v471_v53, %v471_v53  ;;  %v479_v60 = vrot.slane %v422_v51, %v361_v18  ;;  %v488_v61 = vcombine.high %v487_v54, %v487_v54  ;;  %v495_v62 = vrot.slane %v424_v52, %v361_v18 }
 0x105   :  { %v552_v63 = vrot.slane %v704_v57, %v823_v17  ;;  %v705_v0 = vpack.c.bf16 %v448_v55, %v447_v48  ;;  %v582_v1 = vrot.slane %v706_v58, %v823_v17  ;;  %v707_v2 = vpack.c.bf16 %v464_v56, %v463_v50 }
 0x106   :  { %v480_v3 = vcombine.high %v479_v60, %v479_v60  ;;  %v496_v4 = vcombine.high %v495_v62, %v495_v62  ;;  %v708_v5 = vpack.c.bf16 %v472_v59, %v471_v53  ;;  %v710_v6 = vpack.c.bf16 %v488_v61, %v487_v54 }
 0x107   :  { %v567_v7 = vrot.slane %v705_v0, %v823_v17  ;;  %v597_v8 = vrot.slane %v707_v2, %v823_v17  ;;  %712 = vst.sshfl [vmem:[%s949_s5] sm:$0x5 pattern:$0x73625140] %v552_v63 }
 0x108   :  { %714 = vst.sshfl [vmem:[%s949_s5 + $0x4] sm:$0x5 pattern:$0x73625140] %v582_v1  ;;  %v612_v9 = vrot.slane %v708_v5, %v823_v17  ;;  %v709_v10 = vpack.c.bf16 %v480_v3, %v479_v60  ;;  %v642_v12 = vrot.slane %v710_v6, %v823_v17  ;;  %v711_v13 = vpack.c.bf16 %v496_v4, %v495_v62 }
 0x109   :  { %713 = vst.sshfl [vmem:[%s949_s5 + $0x2] sm:$0x5 pattern:$0x73625140] %v567_v7 }
 0x10a   :  { %715 = vst.sshfl [vmem:[%s949_s5 + $0x6] sm:$0x5 pattern:$0x73625140] %v597_v8  ;;  %v627_v14 = vrot.slane %v709_v10, %v823_v17  ;;  %v657_v15 = vrot.slane %v711_v13, %v823_v17 }
 0x10b   :  { %716 = vst.sshfl [vmem:[%s949_s5 + $0x8] sm:$0x5 pattern:$0x73625140] %v612_v9 }
 0x10c   :  { %718 = vst.sshfl [vmem:[%s949_s5 + $0xc] sm:$0x5 pattern:$0x73625140] %v642_v12 }
 0x10d   :  { %717 = vst.sshfl [vmem:[%s949_s5 + $0xa] sm:$0x5 pattern:$0x73625140] %v627_v14 }
 0x10e   :  { %719 = vst.sshfl [vmem:[%s949_s5 + $0xe] sm:$0x5 pattern:$0x73625140] %v657_v15 }

// kernel: transcription_forward.8
= control target key start
LH: loop header
LB: loop body
LE: loop exit
PB: predicated region body
PF: predicated region fallthrough
CT: control target
= control target key end

     0   :  { %v60_v0 = vlaneseq  ;;  %v672_v2 = vmov 0   ;;  %v673_v3 = vmov 1966171168   ;;  %vm122_vm0 = vcmask 261120   ;;  %s832_s3 = inlined_call_operand.vmem [shape: bf16[32,256], index: 3, kind: input, shape index: {}]   ;;  %s833_s2 = inlined_call_operand.vmem [shape: bf16[32,256], index: 2, kind: input, shape index: {}]   ;;  %s834_s1 = inlined_call_operand.vmem [shape: bf16[8,2,32], index: 1, kind: input, shape index: {}]   ;;  %s835_s0 = inlined_call_operand.vmem [shape: bf16[8,2,32], index: 0, kind: input, shape index: {}]   ;;  %s836_s4 = inlined_call_operand.vmem [shape: f32[1,256], index: 4, kind: input, shape index: {}]   ;;  %s837_s5 = inlined_call_operand.vmem [shape: bf16[8,2,256], index: 5, kind: output, shape index: {}]  }
   0x1   :  { %v660_v1 = vld [vmem:[%s832_s3 + $0x4] ss:$8 sps:$4 sm:$0xff]   ;;  %158 = vmatprep.mubr.bf16.mxu1 %v672_v2  ;;  %281 = vmatprep.mubr.bf16.mxu0 %v672_v2  ;;  %v58_v4 = vunpack.c.l.s4 %v673_v3  ;;  %v664_v7 = vld [vmem:[%s832_s3] ss:$8 sps:$4 sm:$0xff]   ;;  %v666_v10 = vld [vmem:[%s832_s3 + $0x14] ss:$8 sps:$4 sm:$0xff]  }
   0x2   :  { %v662_v5 = vld [vmem:[%s833_s2 + $0x4] ss:$8 sps:$4 sm:$0xff]   ;;  %v711_v6 = vshrl.u32 %v60_v0, 7  ;;  %126 = vmatprep.subr.bf16.mxu1 %v660_v1  ;;  %v665_v8 = vld [vmem:[%s833_s2] ss:$8 sps:$4 sm:$0xff]  }
   0x3   :  { %v59_v9 = vunpack.c.0.s8 %v58_v4  ;;  %249 = vmatprep.subr.bf16.mxu0 %v662_v5  ;;  %127 = vmatpush1.bf16.msra.mxu1 %v664_v7  ;;  %v668_v11 = vld [vmem:[%s833_s2 + $0x14] ss:$8 sps:$4 sm:$0xff]   ;;  %v670_v12 = vld [vmem:[%s832_s3 + $0x10] ss:$8 sps:$4 sm:$0xff]   ;;  %v33_v15 = vld [vmem:[%s834_s1] sm:$0x1] }
   0x4   :  { %250 = vmatpush1.bf16.msra.mxu0 %v665_v8  ;;  %128 = vmatprep.subr.bf16.mxu1 %v666_v10  ;;  %v671_v14 = vld [vmem:[%s833_s2 + $0x10] ss:$8 sps:$4 sm:$0xff]   ;;  %v34_v16 = vld [vmem:[%s834_s1 + $0x1] sm:$0x1]  ;;  %v35_v17 = vld [vmem:[%s834_s1 + $0x2] sm:$0x1] }
   0x5   :  { %v729_v13 = vsub.s32 %v59_v9, %v711_v6  ;;  %251 = vmatprep.subr.bf16.mxu0 %v668_v11  ;;  %v36_v18 = vld [vmem:[%s834_s1 + $0x3] sm:$0x1]  ;;  %v37_v19 = vld [vmem:[%s834_s1 + $0x4] sm:$0x1]  ;;  %v53_v20 = vcombine.low %v33_v15, %v34_v16  ;;  %v38_v21 = vld [vmem:[%s834_s1 + $0x5] sm:$0x1] }
   0x6   :  { %v39_v22 = vld [vmem:[%s834_s1 + $0x6] sm:$0x1]  ;;  %v40_v23 = vld [vmem:[%s834_s1 + $0x7] sm:$0x1]  ;;  %v54_v24 = vcombine.low %v35_v17, %v36_v18  ;;  %v55_v25 = vcombine.low %v37_v19, %v38_v21  ;;  %v21_v28 = vld [vmem:[%s835_s0] sm:$0x1] }
   0x7   :  { %129 = vmatpush1.bf16.msra.mxu1 %v670_v12  ;;  %v56_v26 = vcombine.low %v39_v22, %v40_v23  ;;  %v63_v27 = vrot.slane %v53_v20, %v729_v13  ;;  %v22_v29 = vld [vmem:[%s835_s0 + $0x1] sm:$0x1]  ;;  %v23_v30 = vld [vmem:[%s835_s0 + $0x2] sm:$0x1]  ;;  %v24_v32 = vld [vmem:[%s835_s0 + $0x3] sm:$0x1] }
   0x8   :  { %252 = vmatpush1.bf16.msra.mxu0 %v671_v14  ;;  %v70_v31 = vrot.slane %v54_v24, %v729_v13  ;;  %v25_v33 = vld [vmem:[%s835_s0 + $0x4] sm:$0x1]  ;;  %v26_v34 = vld [vmem:[%s835_s0 + $0x5] sm:$0x1]  ;;  %v177_v35 = vcombine.low %v21_v28, %v22_v29  ;;  %v77_v36 = vrot.slane %v55_v25, %v729_v13  ;;  %v27_v38 = vld [vmem:[%s835_s0 + $0x6] sm:$0x1]  ;;  %v178_v40 = vcombine.low %v23_v30, %v24_v32 }
   0x9   :  { %v84_v37 = vrot.slane %v56_v26, %v729_v13  ;;  %v28_v39 = vld [vmem:[%s835_s0 + $0x7] sm:$0x1]  ;;  %v179_v41 = vcombine.low %v25_v33, %v26_v34  ;;  %v674_v57 = vmov 1983009808   ;;  %v344_v59 = vsub.s32 0, %v711_v6 }
   0xa   :  { %v85_v42 = vcombine.low %v63_v27, %v70_v31  ;;  %v180_v43 = vcombine.low %v27_v38, %v28_v39  ;;  %v187_v44 = vrot.slane %v177_v35, %v729_v13  ;;  %v194_v46 = vrot.slane %v178_v40, %v729_v13  ;;  %v340_v61 = vld [vmem:[%s836_s4] sm:$0x3] }
   0xb   :  { %v86_v45 = vcombine.low %v77_v36, %v84_v37  ;;  %v201_v47 = vrot.slane %v179_v41, %v729_v13  ;;  %v299_v58 = vunpack.c.l.s4 %v674_v57  ;;  %v348_v60 = vsub.s32 1, %v711_v6 }
   0xc   :  { %v93_v48 = vrot.slane %v85_v42, %v729_v13  ;;  %v208_v49 = vrot.slane %v180_v43, %v729_v13  ;;  %v209_v51 = vcombine.low %v187_v44, %v194_v46  ;;  %v345_v63 = vrot.slane %v340_v61, %v344_v59 }
   0xd   :  { %v100_v50 = vrot.slane %v86_v45, %v729_v13  ;;  %v300_v62 = vunpack.c.0.s8 %v299_v58  ;;  %v349_v0 = vrot.slane %v340_v61, %v348_v60 }
   0xe   :  { %v210_v52 = vcombine.low %v201_v47, %v208_v49  ;;  %v217_v54 = vrot.slane %v209_v51, %v729_v13 }
   0xf   :  { %v101_v53 = vcombine.low %v93_v48, %v100_v50  ;;  %v303_v5 = vsub.s32 %v300_v62, %v711_v6  ;;  %v350_v7 = vcombine.low %v345_v63, %v349_v0 }
  0x10   :  { %v224_v55 = vrot.slane %v210_v52, %v729_v13 }
  0x11   :  { %631 = vmatmul.mubr.msk.bf16.vlgmr.msra.gmra.mrb[0].mxu1 %vm122_vm0, %v101_v53  ;;  %v357_v18 = vrot.slane %v350_v7, %v303_v5 }
  0x12   :  { %v225_v56 = vcombine.low %v217_v54, %v224_v55 }
  0x14   :  { %636 = vmatmul.mubr.msk.bf16.vlgmr.msra.gmra.mrb[0].mxu0 %vm122_vm0, %v225_v56 }
  0xe4   :  { %v160_v1 = vpop.f32.mrb[0].mxu1 }
  0xe5   :  { %v162_v2 = vpop.f32.mrb[1].mxu1 }
  0xe6   :  { %v164_v3 = vpop.f32.mrb[2].mxu1 }
  0xe7   :  { %v283_v4 = vpop.f32.mrb[0].mxu0  ;;  %v166_v8 = vpop.f32.mrb[3].mxu1 }
  0xe8   :  { %v284_v9 = vadd.f32 %v283_v4, %v160_v1  ;;  %v285_v10 = vpop.f32.mrb[1].mxu0 }
  0xe9   :  { %v286_v11 = vadd.f32 %v285_v10, %v162_v2  ;;  %v287_v12 = vpop.f32.mrb[2].mxu0 }
  0xea   :  { %v288_v14 = vadd.f32 %v287_v12, %v164_v3  ;;  %v289_v15 = vpop.f32.mrb[3].mxu0 }
  0xeb   :  { %v296_v16 = vcombine.low %v284_v9, %v286_v11  ;;  %v297_v17 = vcombine.high %v284_v9, %v286_v11  ;;  %v290_v19 = vadd.f32 %v289_v15, %v166_v8 }
  0xed   :  { %v304_v20 = vrot.slane %v296_v16, %v303_v5  ;;  %v311_v21 = vrot.slane %v297_v17, %v303_v5  ;;  %v314_v22 = vcombine.low %v288_v14, %v290_v19  ;;  %v315_v23 = vcombine.high %v288_v14, %v290_v19 }
  0xef   :  { %v312_v24 = vcombine.high %v304_v20, %v304_v20  ;;  %v313_v25 = vcombine.high %v311_v21, %v311_v21  ;;  %v359_v26 = vadd.f32 %v357_v18, %v304_v20  ;;  %v361_v6 = vadd.f32 %v357_v18, %v311_v21 }
  0xf0   :  { %v322_v27 = vrot.slane %v314_v22, %v303_v5  ;;  %v329_v28 = vrot.slane %v315_v23, %v303_v5 }
  0xf1   :  { %v360_v29 = vadd.f32 %v357_v18, %v312_v24  ;;  %v362_v30 = vadd.f32 %v357_v18, %v313_v25  ;;  %v381_v31 = vrot.slane %v359_v26, %v303_v5  ;;  %v397_v32 = vrot.slane %v361_v6, %v303_v5 }
  0xf2   :  { %v330_v33 = vcombine.high %v322_v27, %v322_v27  ;;  %v331_v34 = vcombine.high %v329_v28, %v329_v28  ;;  %v363_v35 = vadd.f32 %v357_v18, %v322_v27  ;;  %v365_v36 = vadd.f32 %v357_v18, %v329_v28 }
  0xf3   :  { %v382_v37 = vcombine.high %v381_v31, %v381_v31  ;;  %v389_v38 = vrot.slane %v360_v29, %v303_v5  ;;  %v398_v39 = vcombine.high %v397_v32, %v397_v32  ;;  %v405_v40 = vrot.slane %v362_v30, %v303_v5 }
  0xf4   :  { %v364_v41 = vadd.f32 %v357_v18, %v330_v33  ;;  %v366_v42 = vadd.f32 %v357_v18, %v331_v34  ;;  %v413_v43 = vrot.slane %v363_v35, %v303_v5  ;;  %v429_v44 = vrot.slane %v365_v36, %v303_v5 }
  0xf5   :  { %v390_v45 = vcombine.high %v389_v38, %v389_v38  ;;  %v406_v46 = vcombine.high %v405_v40, %v405_v40  ;;  %v637_v47 = vpack.c.bf16 %v382_v37, %v381_v31  ;;  %v639_v48 = vpack.c.bf16 %v398_v39, %v397_v32 }
  0xf6   :  { %v414_v49 = vcombine.high %v413_v43, %v413_v43  ;;  %v421_v50 = vrot.slane %v364_v41, %v303_v5  ;;  %v430_v51 = vcombine.high %v429_v44, %v429_v44  ;;  %v437_v52 = vrot.slane %v366_v42, %v303_v5 }
  0xf7   :  { %v494_v53 = vrot.slane %v637_v47, %v729_v13  ;;  %v638_v54 = vpack.c.bf16 %v390_v45, %v389_v38  ;;  %v524_v55 = vrot.slane %v639_v48, %v729_v13  ;;  %v640_v56 = vpack.c.bf16 %v406_v46, %v405_v40 }
  0xf8   :  { %v422_v57 = vcombine.high %v421_v50, %v421_v50  ;;  %v438_v58 = vcombine.high %v437_v52, %v437_v52  ;;  %v641_v59 = vpack.c.bf16 %v414_v49, %v413_v43  ;;  %v643_v60 = vpack.c.bf16 %v430_v51, %v429_v44 }
  0xf9   :  { %v509_v61 = vrot.slane %v638_v54, %v729_v13  ;;  %v539_v62 = vrot.slane %v640_v56, %v729_v13  ;;  %645 = vst.sshfl [vmem:[%s837_s5] sm:$0x5 pattern:$0x73625140] %v494_v53 }
  0xfa   :  { %647 = vst.sshfl [vmem:[%s837_s5 + $0x4] sm:$0x5 pattern:$0x73625140] %v524_v55  ;;  %v554_v63 = vrot.slane %v641_v59, %v729_v13  ;;  %v642_v0 = vpack.c.bf16 %v422_v57, %v421_v50  ;;  %v584_v1 = vrot.slane %v643_v60, %v729_v13  ;;  %v644_v2 = vpack.c.bf16 %v438_v58, %v437_v52 }
  0xfb   :  { %646 = vst.sshfl [vmem:[%s837_s5 + $0x2] sm:$0x5 pattern:$0x73625140] %v509_v61 }
  0xfc   :  { %648 = vst.sshfl [vmem:[%s837_s5 + $0x6] sm:$0x5 pattern:$0x73625140] %v539_v62  ;;  %v569_v3 = vrot.slane %v642_v0, %v729_v13  ;;  %v599_v4 = vrot.slane %v644_v2, %v729_v13 }
  0xfd   :  { %649 = vst.sshfl [vmem:[%s837_s5 + $0x8] sm:$0x5 pattern:$0x73625140] %v554_v63 }
  0xfe   :  { %651 = vst.sshfl [vmem:[%s837_s5 + $0xc] sm:$0x5 pattern:$0x73625140] %v584_v1 }
  0xff   :  { %650 = vst.sshfl [vmem:[%s837_s5 + $0xa] sm:$0x5 pattern:$0x73625140] %v569_v3 }
 0x100   :  { %652 = vst.sshfl [vmem:[%s837_s5 + $0xe] sm:$0x5 pattern:$0x73625140] %v599_v4 }

// kernel: transcription_forward.7
= control target key start
LH: loop header
LB: loop body
LE: loop exit
PB: predicated region body
PF: predicated region fallthrough
CT: control target
= control target key end

     0   :  { %v2226_v1 = vmov 0.0   ;;  %vm2227_vm0 = vmmov 0   ;;  %vm183_vm1 = vcmask 254976   ;;  %vm217_vm2 = vcmask 261120   ;;  %s2228_s9 = smov 32   ;;  %s2229_s14 = smov 64   ;;  %s2791_s0 = inlined_call_operand.vmem [shape: bf16[8,2,256], index: 0, kind: input, shape index: {}, may-alias: {0,1}]   ;;  %s2792_s1 = inlined_call_operand.vmem [shape: bf16[8,2,256], index: 1, kind: input, shape index: {}, may-alias: {0,1}]   ;;  %s2793_s2 = inlined_call_operand.vmem [shape: bf16[32,128], index: 2, kind: input, shape index: {}]   ;;  %s2794_s3 = inlined_call_operand.vmem [shape: bf16[32,128], index: 3, kind: input, shape index: {}]   ;;  %s2795_s4 = inlined_call_operand.vmem [shape: bf16[8,2,32], index: 4, kind: output, shape index: {0}]   ;;  %s2796_s5 = inlined_call_operand.vmem [shape: bf16[8,2,32], index: 5, kind: output, shape index: {1}]   ;;  %s2797_s6 = inlined_call_operand.vmem [shape: f32[2,2,32], index: 6, kind: output, shape index: {2}]   ;;  %s2798_s7 = inlined_call_operand.vmem [shape: f32[2,2,32], index: 7, kind: output, shape index: {3}]  }
   0x1   :  { %v2276_v0 = vld [vmem:[%s2793_s2] sm:$0xff]   ;;  %1959 = vmatprep.subr.bf16.mxu0 %v2226_v1  ;;  %1967 = vmatprep.subr.bf16.mxu1 %v2226_v1  ;;  %v2289_v3 = vld [vmem:[%s2793_s2 + $0x8] sm:$0xff]   ;;  %184 = vst.msk [vmem:[#allocation2] sm:$0x3] %vm183_vm1, %v2226_v1  ;;  %185 = vst.msk [vmem:[#allocation2 + $0x2] sm:$0x3] %vm183_vm1, %v2226_v1 }
   0x2   :  { %v2283_v2 = vld [vmem:[%s2794_s3] sm:$0xff]   ;;  %1960 = vmatpush3.bf16.msra.mxu0 %v2276_v0  ;;  %1963 = vmatprep.mubr.msk.bf16.mxu0 %vm2227_vm0, %v2226_v1  ;;  %v2298_v4 = vld [vmem:[%s2794_s3 + $0x8] sm:$0xff]   ;;  %186 = vst.msk [vmem:[#allocation3] sm:$0x3] %vm183_vm1, %v2226_v1  ;;  %187 = vst.msk [vmem:[#allocation3 + $0x2] sm:$0x3] %vm183_vm1, %v2226_v1 }
   0x3   :  { %1968 = vmatpush3.bf16.msra.mxu1 %v2283_v2  ;;  %1961 = vmatprep.subr.bf16.mxu0 %v2226_v1  ;;  %v30_v5 = vld [vmem:[%s2791_s0] sm:$0x1]  ;;  %v1856_v12 = vld [vmem:[%s2792_s1 + $0xf] sm:$0x1]  ;;  %v32_v51 = vld [vmem:[%s2791_s0 + $0x2] sm:$0x1] }
   0x4   :  { %1969 = vmatprep.subr.bf16.mxu1 %v2226_v1  ;;  %1971 = vmatprep.mubr.msk.bf16.mxu1 %vm2227_vm0, %v2226_v1  ;;  %31 = vst [vmem:[#allocation4] sm:$0x1] %v30_v5  ;;  %119 = vst [vmem:[#allocation5 + $0x7] sm:$0x1] %v1856_v12  ;;  %v1855_v60 = vld [vmem:[%s2792_s1 + $0xd] sm:$0x1] }
   0x5   :  { %33 = vst [vmem:[#allocation4 + $0x1] sm:$0x1] %v32_v51  ;;  %117 = vst [vmem:[#allocation5 + $0x6] sm:$0x1] %v1855_v60  ;;  %vm411_vm3 = vcmask 253952   ;;  %s2232_s25 = smov 96  }
   0x6   :  { %1962 = vmatpush3.bf16.msra.mxu0 %v2289_v3 }
   0x7   :  { %1970 = vmatpush3.bf16.msra.mxu1 %v2298_v4  ;;  %1975 = vmatprep.subr.bf16.mxu0 %v2226_v1 }
   0x8   :  { %1983 = vmatprep.subr.bf16.mxu1 %v2226_v1  ;;  %v196_v6 = vld [vmem:[#allocation2] sm:$0x3]  ;;  %v199_v7 = vld [vmem:[#allocation2 + $0x2] sm:$0x3] }
   0x9   :  { %v204_v8 = vpack.c.bf16 %v196_v6, %v196_v6  ;;  %v300_v9 = vpack.c.bf16 %v199_v7, %v199_v7  ;;  %v1861_v10 = vld.sshfl [vmem:[#allocation3] sm:$0x3 pattern:$0x76325410] }
   0xa   :  { %277 = vrot.lane.b32.xlu1 %v1861_v10, %s2228_s9  ;;  %v1866_v11 = vld.sshfl [vmem:[#allocation3 + $0x2] sm:$0x3 pattern:$0x76325410] }
   0xb   :  { %1964 = vmatmul.mubr.msk.bf16.vlgmr.msra.gmra.mrb[0].mxu0 %vm217_vm2, %v204_v8  ;;  %1972 = vmatmul.mubr.msk.bf16.vlgmr.msra.gmra.mrb[0].mxu1 %vm217_vm2, %v300_v9  ;;  %v202_v13 = vld [vmem:[#allocation4] sm:$0x1]  ;;  %v298_v14 = vld [vmem:[#allocation5 + $0x7] sm:$0x1] }
   0xc   :  { %1976 = vmatpush3.bf16.msra.mxu0 %v2276_v0  ;;  %1984 = vmatpush3.bf16.msra.mxu1 %v2283_v2  ;;  %v203_v15 = vunpack.c.l.bf16 %v202_v13  ;;  %v299_v16 = vunpack.c.l.bf16 %v298_v14  ;;  %v435_v61 = vld [vmem:[#allocation4 + $0x1] sm:$0x1]  ;;  %v508_v63 = vld [vmem:[#allocation5 + $0x6] sm:$0x1] }
   0xd   :  { %1977 = vmatprep.subr.bf16.mxu0 %v2226_v1  ;;  %1979 = vmatprep.mubr.msk.bf16.mxu0 %vm2227_vm0, %v2226_v1  ;;  %v436_v62 = vunpack.c.l.bf16 %v435_v61  ;;  %v509_v8 = vunpack.c.l.bf16 %v508_v63 }
   0xe   :  { %372 = vrot.lane.b32.xlu1 %v1866_v11, %s2228_s9  ;;  %1985 = vmatprep.subr.bf16.mxu1 %v2226_v1 }
   0xf   :  { %1987 = vmatprep.mubr.msk.bf16.mxu1 %vm2227_vm0, %v2226_v1 }
  0x10   :  { %1978 = vmatpush3.bf16.msra.mxu0 %v2289_v3  ;;  %1986 = vmatpush3.bf16.msra.mxu1 %v2298_v4 }
  0x11   :  { %1991 = vmatprep.subr.bf16.mxu0 %v2226_v1  ;;  %1999 = vmatprep.subr.bf16.mxu1 %v2226_v1 }
  0x7c   :  { %v278_v41 = vpop.permute.xlu1 %277 }
  0x80   :  { %v373_v43 = vpop.permute.xlu1 %372 }
  0xde   :  { %v255_v17 = vpop.f32.mrb[0].mxu0  ;;  %v350_v18 = vpop.f32.mrb[0].mxu1 }
  0xdf   :  { %v261_v19 = vadd.f32 %v255_v17, %v203_v15  ;;  %v1965_v20 = vpop.f32.mrb[1].mxu0  ;;  %v356_v21 = vadd.f32 %v350_v18, %v299_v16  ;;  %v1973_v22 = vpop.f32.mrb[1].mxu1 }
  0xe0   :  { %v258_v23 = vpop.f32.mrb[2].mxu0  ;;  %v353_v24 = vpop.f32.mrb[2].mxu1 }
  0xe1   :  { %2098 = vtanh.f32 %v261_v19  ;;  %v1966_v25 = vpop.f32.mrb[3].mxu0  ;;  %v1974_v26 = vpop.f32.mrb[3].mxu1  ;;  %v1860_v29 = vmul.f32 -1.442695, %v261_v19  ;;  %v1865_v30 = vmul.f32 -1.442695, %v356_v21 }
  0xe2   :  { %2100 = vtanh.f32 %v356_v21 }
  0xe3   :  { %2102 = vpow2.f32 %v1860_v29 }
  0xe4   :  { %2104 = vpow2.f32 %v1865_v30 }
  0xeb   :  { %v2099_v27 = vpop.eup %2098 }
  0xec   :  { %282 = vrot.lane.b32.xlu0 %v2099_v27, %s2228_s9  ;;  %v2101_v28 = vpop.eup %2100 }
  0xed   :  { %v2103_v31 = vpop.eup %2102 }
  0xee   :  { %v265_v32 = vadd.f32 1.0, %v2103_v31  ;;  %v2105_v33 = vpop.eup %2104 }
  0xef   :  { %v360_v34 = vadd.f32 1.0, %v2105_v33 }
  0xf0   :  { %377 = vrot.lane.b32.xlu0 %v2101_v28, %s2228_s9  ;;  %2106 = vrcp.f32 %v265_v32 }
  0xf1   :  { %2108 = vrcp.f32 %v360_v34 }
  0xfa   :  { %v2107_v35 = vpop.eup %2106 }
  0xfb   :  { %v2109_v38 = vpop.eup %2108  ;;  %v280_v42 = vmul.f32 %v2107_v35, %v278_v41 }
  0xfc   :  { %v375_v46 = vmul.f32 %v2109_v38, %v373_v43 }
 0x15e   :  { %v283_v36 = vpop.permute.xlu0 %282 }
 0x15f   :  { %v285_v37 = vmul.f32 %v2107_v35, %v283_v36 }
 0x161   :  { %287 = vrot.lane.b32.xlu0 %v285_v37, %s2228_s9 }
 0x162   :  { %v378_v39 = vpop.permute.xlu0 %377 }
 0x163   :  { %v380_v40 = vmul.f32 %v2109_v38, %v378_v39 }
 0x165   :  { %382 = vrot.lane.b32.xlu1 %v380_v40, %s2228_s9 }
 0x1d3   :  { %v288_v44 = vpop.permute.xlu0 %287 }
 0x1d4   :  { %v2341_v45 = vadd.f32 %v288_v44, %v280_v42 }
 0x1d6   :  { %2110 = vtanh.f32 %v2341_v45 }
 0x1d7   :  { %v383_v47 = vpop.permute.xlu1 %382 }
 0x1d8   :  { %v2344_v48 = vadd.f32 %v383_v47, %v375_v46  ;;  %v1854_v47 = vld [vmem:[%s2792_s1 + $0xb] sm:$0x1] }
 0x1d9   :  { %115 = vst [vmem:[#allocation5 + $0x5] sm:$0x1] %v1854_v47 }
 0x1da   :  { %2112 = vtanh.f32 %v2344_v48 }
 0x1e0   :  { %v2111_v49 = vpop.eup %2110 }
 0x1e1   :  { %293 = vrot.lane.b32.xlu0 %v2111_v49, %s2228_s9 }
 0x1e4   :  { %v2113_v50 = vpop.eup %2112 }
 0x1e5   :  { %388 = vrot.lane.b32.xlu1 %v2113_v50, %s2228_s9  ;;  %v696_v50 = vld [vmem:[#allocation5 + $0x5] sm:$0x1] }
 0x253   :  { %v294_v52 = vpop.permute.xlu0 %293 }
 0x254   :  { %v296_v53 = vmul.f32 %v2107_v35, %v294_v52 }
 0x256   :  { %v2352_v54 = vpack.c.bf16 %v296_v53, %v296_v53 }
 0x257   :  { %v389_v55 = vpop.permute.xlu1 %388 }
 0x258   :  { %v391_v56 = vmul.f32 %v2109_v38, %v389_v55  ;;  %437 = vrot.lane.b32.xlu0 %v2352_v54, %s2229_s14  ;;  %v34_v38 = vld [vmem:[%s2791_s0 + $0x4] sm:$0x1]  ;;  %v697_v55 = vunpack.c.l.bf16 %v696_v50 }
 0x259   :  { %35 = vst [vmem:[#allocation4 + $0x2] sm:$0x1] %v34_v38 }
 0x25a   :  { %v2356_v57 = vpack.c.bf16 %v391_v56, %v391_v56 }
 0x25c   :  { %510 = vrot.lane.b32.xlu1 %v2356_v57, %s2229_s14 }
 0x2ca   :  { %v438_v58 = vpop.permute.xlu0 %437 }
 0x2cb   :  { %1980 = vmatmul.mubr.msk.bf16.vlgmr.msra.gmra.mrb[4].mxu0 %vm217_vm2, %v438_v58 }
 0x2cc   :  { %1992 = vmatpush3.bf16.msra.mxu0 %v2276_v0  ;;  %1995 = vmatprep.mubr.msk.bf16.mxu0 %vm2227_vm0, %v2226_v1 }
 0x2cd   :  { %1993 = vmatprep.subr.bf16.mxu0 %v2226_v1 }
 0x2ce   :  { %v511_v59 = vpop.permute.xlu1 %510 }
 0x2cf   :  { %1988 = vmatmul.mubr.msk.bf16.vlgmr.msra.gmra.mrb[4].mxu1 %vm217_vm2, %v511_v59 }
 0x2d0   :  { %2000 = vmatpush3.bf16.msra.mxu1 %v2283_v2  ;;  %1994 = vmatpush3.bf16.msra.mxu0 %v2289_v3 }
 0x2d1   :  { %2001 = vmatprep.subr.bf16.mxu1 %v2226_v1  ;;  %2003 = vmatprep.mubr.msk.bf16.mxu1 %vm2227_vm0, %v2226_v1 }
 0x2d2   :  { %2007 = vmatprep.subr.bf16.mxu0 %v2226_v1 }
 0x2d4   :  { %2002 = vmatpush3.bf16.msra.mxu1 %v2298_v4 }
 0x2d5   :  { %2015 = vmatprep.subr.bf16.mxu1 %v2226_v1 }
 0x39e   :  { %v476_v5 = vpop.f32.mrb[4].mxu0 }
 0x39f   :  { %v482_v6 = vadd.f32 %v476_v5, %v436_v62  ;;  %v1981_v7 = vpop.f32.mrb[5].mxu0 }
 0x3a0   :  { %v479_v9 = vpop.f32.mrb[6].mxu0 }
 0x3a1   :  { %2114 = vtanh.f32 %v482_v6  ;;  %v1982_v10 = vpop.f32.mrb[7].mxu0  ;;  %v1869_v18 = vmul.f32 -1.442695, %v482_v6 }
 0x3a2   :  { %v549_v11 = vpop.f32.mrb[4].mxu1 }
 0x3a3   :  { %v555_v12 = vadd.f32 %v549_v11, %v509_v8  ;;  %v1989_v13 = vpop.f32.mrb[5].mxu1 }
 0x3a4   :  { %v552_v14 = vpop.f32.mrb[6].mxu1 }
 0x3a5   :  { %2116 = vtanh.f32 %v555_v12  ;;  %v1990_v15 = vpop.f32.mrb[7].mxu1  ;;  %v1871_v19 = vmul.f32 -1.442695, %v555_v12 }
 0x3a6   :  { %2118 = vpow2.f32 %v1869_v18 }
 0x3a7   :  { %2120 = vpow2.f32 %v1871_v19 }
 0x3ab   :  { %v2115_v16 = vpop.eup %2114 }
 0x3ac   :  { %492 = vrot.lane.b32.xlu0 %v2115_v16, %s2228_s9 }
 0x3af   :  { %v2117_v17 = vpop.eup %2116 }
 0x3b0   :  { %565 = vrot.lane.b32.xlu1 %v2117_v17, %s2228_s9  ;;  %v2119_v20 = vpop.eup %2118 }
 0x3b1   :  { %v486_v21 = vadd.f32 1.0, %v2119_v20  ;;  %v2121_v22 = vpop.eup %2120 }
 0x3b2   :  { %v559_v23 = vadd.f32 1.0, %v2121_v22 }
 0x3b3   :  { %2122 = vrcp.f32 %v486_v21 }
 0x3b4   :  { %2124 = vrcp.f32 %v559_v23 }
 0x3bd   :  { %v2123_v24 = vpop.eup %2122 }
 0x3be   :  { %v2125_v27 = vpop.eup %2124  ;;  %v490_v30 = vmul.f32 %v2123_v24, %v2341_v45 }
 0x3bf   :  { %v563_v33 = vmul.f32 %v2125_v27, %v2344_v48  ;;  %v623_v48 = vld [vmem:[#allocation4 + $0x2] sm:$0x1] }
 0x3c0   :  { %v624_v49 = vunpack.c.l.bf16 %v623_v48 }
 0x41e   :  { %v493_v25 = vpop.permute.xlu0 %492 }
 0x41f   :  { %v495_v26 = vmul.f32 %v2123_v24, %v493_v25 }
 0x421   :  { %497 = vrot.lane.b32.xlu0 %v495_v26, %s2228_s9 }
 0x422   :  { %v566_v28 = vpop.permute.xlu1 %565 }
 0x423   :  { %v568_v29 = vmul.f32 %v2125_v27, %v566_v28 }
 0x425   :  { %570 = vrot.lane.b32.xlu1 %v568_v29, %s2228_s9 }
 0x493   :  { %v498_v31 = vpop.permute.xlu0 %497 }
 0x494   :  { %v2382_v32 = vadd.f32 %v498_v31, %v490_v30 }
 0x496   :  { %2126 = vtanh.f32 %v2382_v32 }
 0x497   :  { %v571_v34 = vpop.permute.xlu1 %570 }
 0x498   :  { %v2386_v35 = vadd.f32 %v571_v34, %v563_v33 }
 0x49a   :  { %2128 = vtanh.f32 %v2386_v35 }
 0x4a0   :  { %v2127_v36 = vpop.eup %2126 }
 0x4a1   :  { %503 = vrot.lane.b32.xlu0 %v2127_v36, %s2228_s9  ;;  %v1853_v36 = vld [vmem:[%s2792_s1 + $0x9] sm:$0x1] }
 0x4a2   :  { %113 = vst [vmem:[#allocation5 + $0x4] sm:$0x1] %v1853_v36 }
 0x4a4   :  { %v2129_v37 = vpop.eup %2128 }
 0x4a5   :  { %576 = vrot.lane.b32.xlu1 %v2129_v37, %s2228_s9 }
 0x513   :  { %v504_v39 = vpop.permute.xlu0 %503 }
 0x514   :  { %v506_v40 = vmul.f32 %v2123_v24, %v504_v39  ;;  %v884_v39 = vld [vmem:[#allocation5 + $0x4] sm:$0x1] }
 0x516   :  { %v2394_v41 = vpack.c.bf16 %v506_v40, %v506_v40 }
 0x517   :  { %v577_v42 = vpop.permute.xlu1 %576 }
 0x518   :  { %v579_v43 = vmul.f32 %v2125_v27, %v577_v42  ;;  %625 = vrot.lane.b32.xlu0 %v2394_v41, %s2229_s14  ;;  %v36_v27 = vld [vmem:[%s2791_s0 + $0x6] sm:$0x1] }
 0x519   :  { %37 = vst [vmem:[#allocation4 + $0x3] sm:$0x1] %v36_v27  ;;  %v1852_v27 = vld [vmem:[%s2792_s1 + $0x7] sm:$0x1] }
 0x51a   :  { %v2398_v44 = vpack.c.bf16 %v579_v43, %v579_v43  ;;  %111 = vst [vmem:[#allocation5 + $0x3] sm:$0x1] %v1852_v27 }
 0x51c   :  { %698 = vrot.lane.b32.xlu1 %v2398_v44, %s2229_s14 }
 0x520   :  { %v811_v37 = vld [vmem:[#allocation4 + $0x3] sm:$0x1] }
 0x521   :  { %v812_v38 = vunpack.c.l.bf16 %v811_v37 }
 0x58a   :  { %v626_v45 = vpop.permute.xlu0 %625 }
 0x58b   :  { %1996 = vmatmul.mubr.msk.bf16.vlgmr.msra.gmra.mrb[8].mxu0 %vm217_vm2, %v626_v45  ;;  %v885_v45 = vunpack.c.l.bf16 %v884_v39 }
 0x58c   :  { %2008 = vmatpush3.bf16.msra.mxu0 %v2276_v0  ;;  %2011 = vmatprep.mubr.msk.bf16.mxu0 %vm2227_vm0, %v2226_v1 }
 0x58d   :  { %2009 = vmatprep.subr.bf16.mxu0 %v2226_v1 }
 0x58e   :  { %v699_v46 = vpop.permute.xlu1 %698 }
 0x58f   :  { %2004 = vmatmul.mubr.msk.bf16.vlgmr.msra.gmra.mrb[8].mxu1 %vm217_vm2, %v699_v46 }
 0x590   :  { %2016 = vmatpush3.bf16.msra.mxu1 %v2283_v2  ;;  %2010 = vmatpush3.bf16.msra.mxu0 %v2289_v3 }
 0x591   :  { %2017 = vmatprep.subr.bf16.mxu1 %v2226_v1  ;;  %2019 = vmatprep.mubr.msk.bf16.mxu1 %vm2227_vm0, %v2226_v1 }
 0x592   :  { %2023 = vmatprep.subr.bf16.mxu0 %v2226_v1 }
 0x594   :  { %2018 = vmatpush3.bf16.msra.mxu1 %v2298_v4 }
 0x595   :  { %2031 = vmatprep.subr.bf16.mxu1 %v2226_v1 }
 0x65e   :  { %v664_v51 = vpop.f32.mrb[8].mxu0 }
 0x65f   :  { %v670_v52 = vadd.f32 %v664_v51, %v624_v49  ;;  %v1997_v53 = vpop.f32.mrb[9].mxu0 }
 0x660   :  { %v667_v56 = vpop.f32.mrb[10].mxu0 }
 0x661   :  { %2130 = vtanh.f32 %v670_v52  ;;  %v1998_v58 = vpop.f32.mrb[11].mxu0  ;;  %v1875_v7 = vmul.f32 -1.442695, %v670_v52 }
 0x662   :  { %v737_v59 = vpop.f32.mrb[8].mxu1 }
 0x663   :  { %v743_v60 = vadd.f32 %v737_v59, %v697_v55  ;;  %v2005_v61 = vpop.f32.mrb[9].mxu1 }
 0x664   :  { %v740_v62 = vpop.f32.mrb[10].mxu1 }
 0x665   :  { %2132 = vtanh.f32 %v743_v60  ;;  %v2006_v63 = vpop.f32.mrb[11].mxu1  ;;  %v1877_v8 = vmul.f32 -1.442695, %v743_v60 }
 0x666   :  { %2134 = vpow2.f32 %v1875_v7 }
 0x667   :  { %2136 = vpow2.f32 %v1877_v8 }
 0x66b   :  { %v2131_v5 = vpop.eup %2130 }
 0x66c   :  { %680 = vrot.lane.b32.xlu0 %v2131_v5, %s2228_s9 }
 0x66f   :  { %v2133_v6 = vpop.eup %2132 }
 0x670   :  { %753 = vrot.lane.b32.xlu1 %v2133_v6, %s2228_s9  ;;  %v2135_v9 = vpop.eup %2134 }
 0x671   :  { %v674_v10 = vadd.f32 1.0, %v2135_v9  ;;  %v2137_v11 = vpop.eup %2136 }
 0x672   :  { %v747_v12 = vadd.f32 1.0, %v2137_v11 }
 0x673   :  { %2138 = vrcp.f32 %v674_v10 }
 0x674   :  { %2140 = vrcp.f32 %v747_v12 }
 0x67d   :  { %v2139_v13 = vpop.eup %2138 }
 0x67e   :  { %v2141_v16 = vpop.eup %2140  ;;  %v678_v19 = vmul.f32 %v2139_v13, %v2382_v32 }
 0x67f   :  { %v751_v22 = vmul.f32 %v2141_v16, %v2386_v35 }
 0x6de   :  { %v681_v14 = vpop.permute.xlu0 %680 }
 0x6df   :  { %v683_v15 = vmul.f32 %v2139_v13, %v681_v14 }
 0x6e1   :  { %685 = vrot.lane.b32.xlu0 %v683_v15, %s2228_s9 }
 0x6e2   :  { %v754_v17 = vpop.permute.xlu1 %753 }
 0x6e3   :  { %v756_v18 = vmul.f32 %v2141_v16, %v754_v17 }
 0x6e5   :  { %758 = vrot.lane.b32.xlu1 %v756_v18, %s2228_s9  ;;  %v38_v18 = vld [vmem:[%s2791_s0 + $0x8] sm:$0x1] }
 0x6e6   :  { %39 = vst [vmem:[#allocation4 + $0x4] sm:$0x1] %v38_v18 }
 0x753   :  { %v686_v20 = vpop.permute.xlu0 %685 }
 0x754   :  { %v2424_v21 = vadd.f32 %v686_v20, %v678_v19 }
 0x756   :  { %2142 = vtanh.f32 %v2424_v21 }
 0x757   :  { %v759_v23 = vpop.permute.xlu1 %758 }
 0x758   :  { %v2428_v24 = vadd.f32 %v759_v23, %v751_v22 }
 0x75a   :  { %2144 = vtanh.f32 %v2428_v24 }
 0x760   :  { %v2143_v25 = vpop.eup %2142 }
 0x761   :  { %691 = vrot.lane.b32.xlu0 %v2143_v25, %s2228_s9 }
 0x764   :  { %v2145_v26 = vpop.eup %2144 }
 0x765   :  { %764 = vrot.lane.b32.xlu1 %v2145_v26, %s2228_s9 }
 0x7d3   :  { %v692_v28 = vpop.permute.xlu0 %691 }
 0x7d4   :  { %v694_v29 = vmul.f32 %v2139_v13, %v692_v28  ;;  %v999_v28 = vld [vmem:[#allocation4 + $0x4] sm:$0x1] }
 0x7d6   :  { %v2436_v30 = vpack.c.bf16 %v694_v29, %v694_v29  ;;  %v1000_v29 = vunpack.c.l.bf16 %v999_v28 }
 0x7d7   :  { %v765_v31 = vpop.permute.xlu1 %764 }
 0x7d8   :  { %v767_v32 = vmul.f32 %v2141_v16, %v765_v31  ;;  %813 = vrot.lane.b32.xlu0 %v2436_v30, %s2229_s14  ;;  %v1072_v31 = vld [vmem:[#allocation5 + $0x3] sm:$0x1] }
 0x7d9   :  { %v1073_v36 = vunpack.c.l.bf16 %v1072_v31 }
 0x7da   :  { %v2440_v33 = vpack.c.bf16 %v767_v32, %v767_v32 }
 0x7dc   :  { %886 = vrot.lane.b32.xlu1 %v2440_v33, %s2229_s14 }
 0x84a   :  { %v814_v34 = vpop.permute.xlu0 %813 }
 0x84b   :  { %2012 = vmatmul.mubr.msk.bf16.vlgmr.msra.gmra.mrb[12].mxu0 %vm217_vm2, %v814_v34 }
 0x84c   :  { %2024 = vmatpush3.bf16.msra.mxu0 %v2276_v0  ;;  %2027 = vmatprep.mubr.msk.bf16.mxu0 %vm2227_vm0, %v2226_v1 }
 0x84d   :  { %2025 = vmatprep.subr.bf16.mxu0 %v2226_v1 }
 0x84e   :  { %v887_v35 = vpop.permute.xlu1 %886 }
 0x84f   :  { %2020 = vmatmul.mubr.msk.bf16.vlgmr.msra.gmra.mrb[12].mxu1 %vm217_vm2, %v887_v35 }
 0x850   :  { %2032 = vmatpush3.bf16.msra.mxu1 %v2283_v2  ;;  %2026 = vmatpush3.bf16.msra.mxu0 %v2289_v3 }
 0x851   :  { %2033 = vmatprep.subr.bf16.mxu1 %v2226_v1  ;;  %2035 = vmatprep.mubr.msk.bf16.mxu1 %vm2227_vm0, %v2226_v1 }
 0x852   :  { %2039 = vmatprep.subr.bf16.mxu0 %v2226_v1 }
 0x854   :  { %2034 = vmatpush3.bf16.msra.mxu1 %v2298_v4 }
 0x855   :  { %2047 = vmatprep.subr.bf16.mxu1 %v2226_v1 }
 0x91e   :  { %v852_v40 = vpop.f32.mrb[12].mxu0 }
 0x91f   :  { %v858_v42 = vadd.f32 %v852_v40, %v812_v38  ;;  %v2013_v43 = vpop.f32.mrb[13].mxu0 }
 0x920   :  { %v855_v46 = vpop.f32.mrb[14].mxu0 }
 0x921   :  { %2146 = vtanh.f32 %v858_v42  ;;  %v2014_v47 = vpop.f32.mrb[15].mxu0  ;;  %v1881_v56 = vmul.f32 -1.442695, %v858_v42 }
 0x922   :  { %v925_v48 = vpop.f32.mrb[12].mxu1 }
 0x923   :  { %v931_v49 = vadd.f32 %v925_v48, %v885_v45  ;;  %v2021_v50 = vpop.f32.mrb[13].mxu1 }
 0x924   :  { %v928_v51 = vpop.f32.mrb[14].mxu1 }
 0x925   :  { %2148 = vtanh.f32 %v931_v49  ;;  %v2022_v52 = vpop.f32.mrb[15].mxu1  ;;  %v1883_v58 = vmul.f32 -1.442695, %v931_v49 }
 0x926   :  { %2150 = vpow2.f32 %v1881_v56 }
 0x927   :  { %2152 = vpow2.f32 %v1883_v58 }
 0x92b   :  { %v2147_v53 = vpop.eup %2146 }
 0x92c   :  { %868 = vrot.lane.b32.xlu0 %v2147_v53, %s2228_s9 }
 0x92f   :  { %v2149_v55 = vpop.eup %2148 }
 0x930   :  { %941 = vrot.lane.b32.xlu1 %v2149_v55, %s2228_s9  ;;  %v2151_v59 = vpop.eup %2150 }
 0x931   :  { %v862_v60 = vadd.f32 1.0, %v2151_v59  ;;  %v2153_v61 = vpop.eup %2152 }
 0x932   :  { %v935_v62 = vadd.f32 1.0, %v2153_v61 }
 0x933   :  { %2154 = vrcp.f32 %v862_v60 }
 0x934   :  { %2156 = vrcp.f32 %v935_v62 }
 0x93d   :  { %v2155_v63 = vpop.eup %2154 }
 0x93e   :  { %v2157_v7 = vpop.eup %2156  ;;  %v866_v10 = vmul.f32 %v2155_v63, %v2424_v21 }
 0x93f   :  { %v939_v13 = vmul.f32 %v2157_v7, %v2428_v24 }
 0x99e   :  { %v869_v5 = vpop.permute.xlu0 %868 }
 0x99f   :  { %v871_v6 = vmul.f32 %v2155_v63, %v869_v5 }
 0x9a1   :  { %873 = vrot.lane.b32.xlu0 %v871_v6, %s2228_s9 }
 0x9a2   :  { %v942_v8 = vpop.permute.xlu1 %941 }
 0x9a3   :  { %v944_v9 = vmul.f32 %v2157_v7, %v942_v8 }
 0x9a5   :  { %946 = vrot.lane.b32.xlu1 %v944_v9, %s2228_s9 }
 0xa13   :  { %v874_v11 = vpop.permute.xlu0 %873 }
 0xa14   :  { %v2466_v12 = vadd.f32 %v874_v11, %v866_v10  ;;  %v40_v11 = vld [vmem:[%s2791_s0 + $0xa] sm:$0x1] }
 0xa15   :  { %41 = vst [vmem:[#allocation4 + $0x5] sm:$0x1] %v40_v11 }
 0xa16   :  { %2158 = vtanh.f32 %v2466_v12 }
 0xa17   :  { %v947_v14 = vpop.permute.xlu1 %946 }
 0xa18   :  { %v2470_v15 = vadd.f32 %v947_v14, %v939_v13 }
 0xa1a   :  { %2160 = vtanh.f32 %v2470_v15 }
 0xa20   :  { %v2159_v16 = vpop.eup %2158 }
 0xa21   :  { %879 = vrot.lane.b32.xlu0 %v2159_v16, %s2228_s9 }
 0xa24   :  { %v2161_v17 = vpop.eup %2160 }
 0xa25   :  { %952 = vrot.lane.b32.xlu1 %v2161_v17, %s2228_s9 }
 0xa93   :  { %v880_v19 = vpop.permute.xlu0 %879 }
 0xa94   :  { %v882_v20 = vmul.f32 %v2155_v63, %v880_v19 }
 0xa96   :  { %v2478_v21 = vpack.c.bf16 %v882_v20, %v882_v20  ;;  %v1851_v20 = vld [vmem:[%s2792_s1 + $0x5] sm:$0x1] }
 0xa97   :  { %v953_v22 = vpop.permute.xlu1 %952  ;;  %109 = vst [vmem:[#allocation5 + $0x2] sm:$0x1] %v1851_v20 }
 0xa98   :  { %v955_v23 = vmul.f32 %v2157_v7, %v953_v22  ;;  %1001 = vrot.lane.b32.xlu0 %v2478_v21, %s2229_s14  ;;  %v1187_v22 = vld [vmem:[#allocation4 + $0x5] sm:$0x1] }
 0xa9a   :  { %v2482_v24 = vpack.c.bf16 %v955_v23, %v955_v23  ;;  %v1188_v23 = vunpack.c.l.bf16 %v1187_v22 }
 0xa9c   :  { %1074 = vrot.lane.b32.xlu1 %v2482_v24, %s2229_s14 }
 0xb0a   :  { %v1002_v25 = vpop.permute.xlu0 %1001 }
 0xb0b   :  { %2028 = vmatmul.mubr.msk.bf16.vlgmr.msra.gmra.mrb[16].mxu0 %vm217_vm2, %v1002_v25  ;;  %v1260_v25 = vld [vmem:[#allocation5 + $0x2] sm:$0x1] }
 0xb0c   :  { %2040 = vmatpush3.bf16.msra.mxu0 %v2276_v0  ;;  %2043 = vmatprep.mubr.msk.bf16.mxu0 %vm2227_vm0, %v2226_v1 }
 0xb0d   :  { %2041 = vmatprep.subr.bf16.mxu0 %v2226_v1 }
 0xb0e   :  { %v1075_v26 = vpop.permute.xlu1 %1074 }
 0xb0f   :  { %2036 = vmatmul.mubr.msk.bf16.vlgmr.msra.gmra.mrb[16].mxu1 %vm217_vm2, %v1075_v26 }
 0xb10   :  { %2048 = vmatpush3.bf16.msra.mxu1 %v2283_v2  ;;  %2042 = vmatpush3.bf16.msra.mxu0 %v2289_v3 }
 0xb11   :  { %2049 = vmatprep.subr.bf16.mxu1 %v2226_v1  ;;  %2051 = vmatprep.mubr.msk.bf16.mxu1 %vm2227_vm0, %v2226_v1 }
 0xb12   :  { %2055 = vmatprep.subr.bf16.mxu0 %v2226_v1 }
 0xb14   :  { %2050 = vmatpush3.bf16.msra.mxu1 %v2298_v4 }
 0xb15   :  { %2063 = vmatprep.subr.bf16.mxu1 %v2226_v1 }
 0xbde   :  { %v1040_v32 = vpop.f32.mrb[16].mxu0 }
 0xbdf   :  { %v1046_v34 = vadd.f32 %v1040_v32, %v1000_v29  ;;  %v2029_v35 = vpop.f32.mrb[17].mxu0  ;;  %v1261_v29 = vunpack.c.l.bf16 %v1260_v25 }
 0xbe0   :  { %v1043_v37 = vpop.f32.mrb[18].mxu0 }
 0xbe1   :  { %2162 = vtanh.f32 %v1046_v34  ;;  %v2030_v38 = vpop.f32.mrb[19].mxu0  ;;  %v1887_v48 = vmul.f32 -1.442695, %v1046_v34 }
 0xbe2   :  { %v1113_v39 = vpop.f32.mrb[16].mxu1 }
 0xbe3   :  { %v1119_v40 = vadd.f32 %v1113_v39, %v1073_v36  ;;  %v2037_v42 = vpop.f32.mrb[17].mxu1 }
 0xbe4   :  { %v1116_v43 = vpop.f32.mrb[18].mxu1 }
 0xbe5   :  { %2164 = vtanh.f32 %v1119_v40  ;;  %v2038_v45 = vpop.f32.mrb[19].mxu1  ;;  %v1889_v49 = vmul.f32 -1.442695, %v1119_v40 }
 0xbe6   :  { %2166 = vpow2.f32 %v1887_v48 }
 0xbe7   :  { %2168 = vpow2.f32 %v1889_v49 }
 0xbeb   :  { %v2163_v46 = vpop.eup %2162 }
 0xbec   :  { %1056 = vrot.lane.b32.xlu0 %v2163_v46, %s2228_s9 }
 0xbef   :  { %v2165_v47 = vpop.eup %2164 }
 0xbf0   :  { %1129 = vrot.lane.b32.xlu1 %v2165_v47, %s2228_s9  ;;  %v2167_v50 = vpop.eup %2166 }
 0xbf1   :  { %v1050_v51 = vadd.f32 1.0, %v2167_v50  ;;  %v2169_v52 = vpop.eup %2168 }
 0xbf2   :  { %v1123_v53 = vadd.f32 1.0, %v2169_v52 }
 0xbf3   :  { %2170 = vrcp.f32 %v1050_v51 }
 0xbf4   :  { %2172 = vrcp.f32 %v1123_v53 }
 0xbfd   :  { %v2171_v55 = vpop.eup %2170 }
 0xbfe   :  { %v2173_v59 = vpop.eup %2172  ;;  %v1054_v62 = vmul.f32 %v2171_v55, %v2466_v12 }
 0xbff   :  { %v1127_v6 = vmul.f32 %v2173_v59, %v2470_v15 }
 0xc5e   :  { %v1057_v56 = vpop.permute.xlu0 %1056 }
 0xc5f   :  { %v1059_v58 = vmul.f32 %v2171_v55, %v1057_v56 }
 0xc61   :  { %1061 = vrot.lane.b32.xlu0 %v1059_v58, %s2228_s9 }
 0xc62   :  { %v1130_v60 = vpop.permute.xlu1 %1129 }
 0xc63   :  { %v1132_v61 = vmul.f32 %v2173_v59, %v1130_v60 }
 0xc65   :  { %1134 = vrot.lane.b32.xlu1 %v1132_v61, %s2228_s9 }
 0xcd3   :  { %v1062_v63 = vpop.permute.xlu0 %1061 }
 0xcd4   :  { %v2508_v5 = vadd.f32 %v1062_v63, %v1054_v62 }
 0xcd6   :  { %2174 = vtanh.f32 %v2508_v5 }
 0xcd7   :  { %v1135_v7 = vpop.permute.xlu1 %1134 }
 0xcd8   :  { %v2512_v8 = vadd.f32 %v1135_v7, %v1127_v6 }
 0xcda   :  { %2176 = vtanh.f32 %v2512_v8 }
 0xce0   :  { %v2175_v9 = vpop.eup %2174 }
 0xce1   :  { %1067 = vrot.lane.b32.xlu0 %v2175_v9, %s2228_s9 }
 0xce4   :  { %v2177_v10 = vpop.eup %2176 }
 0xce5   :  { %1140 = vrot.lane.b32.xlu1 %v2177_v10, %s2228_s9 }
 0xd53   :  { %v1068_v12 = vpop.permute.xlu0 %1067 }
 0xd54   :  { %v1070_v13 = vmul.f32 %v2171_v55, %v1068_v12 }
 0xd56   :  { %v2520_v14 = vpack.c.bf16 %v1070_v13, %v1070_v13 }
 0xd57   :  { %v1141_v15 = vpop.permute.xlu1 %1140 }
 0xd58   :  { %v1143_v16 = vmul.f32 %v2173_v59, %v1141_v15  ;;  %1189 = vrot.lane.b32.xlu0 %v2520_v14, %s2229_s14 }
 0xd5a   :  { %v2524_v17 = vpack.c.bf16 %v1143_v16, %v1143_v16 }
 0xd5c   :  { %1262 = vrot.lane.b32.xlu1 %v2524_v17, %s2229_s14 }
 0xdca   :  { %v1190_v18 = vpop.permute.xlu0 %1189 }
 0xdcb   :  { %2044 = vmatmul.mubr.msk.bf16.vlgmr.msra.gmra.mrb[20].mxu0 %vm217_vm2, %v1190_v18 }
 0xdcc   :  { %2056 = vmatpush3.bf16.msra.mxu0 %v2276_v0  ;;  %2059 = vmatprep.mubr.msk.bf16.mxu0 %vm2227_vm0, %v2226_v1 }
 0xdcd   :  { %2057 = vmatprep.subr.bf16.mxu0 %v2226_v1 }
 0xdce   :  { %v1263_v19 = vpop.permute.xlu1 %1262 }
 0xdcf   :  { %2052 = vmatmul.mubr.msk.bf16.vlgmr.msra.gmra.mrb[20].mxu1 %vm217_vm2, %v1263_v19 }
 0xdd0   :  { %2064 = vmatpush3.bf16.msra.mxu1 %v2283_v2  ;;  %2058 = vmatpush3.bf16.msra.mxu0 %v2289_v3 }
 0xdd1   :  { %2065 = vmatprep.subr.bf16.mxu1 %v2226_v1  ;;  %2067 = vmatprep.mubr.msk.bf16.mxu1 %vm2227_vm0, %v2226_v1 }
 0xdd2   :  { %2071 = vmatprep.subr.bf16.mxu0 %v2226_v1 }
 0xdd4   :  { %2066 = vmatpush3.bf16.msra.mxu1 %v2298_v4 }
 0xdd5   :  { %2079 = vmatprep.subr.bf16.mxu1 %v2226_v1 }
 0xe9e   :  { %v1228_v26 = vpop.f32.mrb[20].mxu0 }
 0xe9f   :  { %v1234_v27 = vadd.f32 %v1228_v26, %v1188_v23  ;;  %v2045_v28 = vpop.f32.mrb[21].mxu0 }
 0xea0   :  { %v1231_v31 = vpop.f32.mrb[22].mxu0 }
 0xea1   :  { %2178 = vtanh.f32 %v1234_v27  ;;  %v2046_v32 = vpop.f32.mrb[23].mxu0  ;;  %v1893_v42 = vmul.f32 -1.442695, %v1234_v27 }
 0xea2   :  { %v1301_v34 = vpop.f32.mrb[20].mxu1 }
 0xea3   :  { %v1307_v35 = vadd.f32 %v1301_v34, %v1261_v29  ;;  %v2053_v36 = vpop.f32.mrb[21].mxu1 }
 0xea4   :  { %v1304_v37 = vpop.f32.mrb[22].mxu1 }
 0xea5   :  { %2180 = vtanh.f32 %v1307_v35  ;;  %v2054_v38 = vpop.f32.mrb[23].mxu1  ;;  %v1895_v43 = vmul.f32 -1.442695, %v1307_v35 }
 0xea6   :  { %2182 = vpow2.f32 %v1893_v42 }
 0xea7   :  { %2184 = vpow2.f32 %v1895_v43 }
 0xeab   :  { %v2179_v39 = vpop.eup %2178 }
 0xeac   :  { %1244 = vrot.lane.b32.xlu0 %v2179_v39, %s2228_s9 }
 0xeaf   :  { %v2181_v40 = vpop.eup %2180 }
 0xeb0   :  { %1317 = vrot.lane.b32.xlu1 %v2181_v40, %s2228_s9  ;;  %v2183_v45 = vpop.eup %2182 }
 0xeb1   :  { %v1238_v46 = vadd.f32 1.0, %v2183_v45  ;;  %v2185_v47 = vpop.eup %2184 }
 0xeb2   :  { %v1311_v48 = vadd.f32 1.0, %v2185_v47 }
 0xeb3   :  { %2186 = vrcp.f32 %v1238_v46 }
 0xeb4   :  { %2188 = vrcp.f32 %v1311_v48 }
 0xebd   :  { %v2187_v49 = vpop.eup %2186 }
 0xebe   :  { %v2189_v52 = vpop.eup %2188  ;;  %v1242_v56 = vmul.f32 %v2187_v49, %v2508_v5  ;;  %v42_v5 = vld [vmem:[%s2791_s0 + $0xc] sm:$0x1] }
 0xebf   :  { %v1315_v60 = vmul.f32 %v2189_v52, %v2512_v8  ;;  %43 = vst [vmem:[#allocation4 + $0x6] sm:$0x1] %v42_v5 }
 0xec6   :  { %v1375_v16 = vld [vmem:[#allocation4 + $0x6] sm:$0x1] }
 0xec7   :  { %v1376_v18 = vunpack.c.l.bf16 %v1375_v16 }
 0xf1e   :  { %v1245_v50 = vpop.permute.xlu0 %1244 }
 0xf1f   :  { %v1247_v51 = vmul.f32 %v2187_v49, %v1245_v50 }
 0xf21   :  { %1249 = vrot.lane.b32.xlu0 %v1247_v51, %s2228_s9 }
 0xf22   :  { %v1318_v53 = vpop.permute.xlu1 %1317 }
 0xf23   :  { %v1320_v55 = vmul.f32 %v2189_v52, %v1318_v53 }
 0xf25   :  { %1322 = vrot.lane.b32.xlu1 %v1320_v55, %s2228_s9 }
 0xf93   :  { %v1250_v58 = vpop.permute.xlu0 %1249 }
 0xf94   :  { %v2550_v59 = vadd.f32 %v1250_v58, %v1242_v56  ;;  %v44_v56 = vld [vmem:[%s2791_s0 + $0xe] sm:$0x1] }
 0xf95   :  { %45 = vst [vmem:[#allocation4 + $0x7] sm:$0x1] %v44_v56 }
 0xf96   :  { %2190 = vtanh.f32 %v2550_v59 }
 0xf97   :  { %v1323_v61 = vpop.permute.xlu1 %1322 }
 0xf98   :  { %v2554_v62 = vadd.f32 %v1323_v61, %v1315_v60 }
 0xf9a   :  { %2192 = vtanh.f32 %v2554_v62 }
 0xfa0   :  { %v2191_v63 = vpop.eup %2190 }
 0xfa1   :  { %1255 = vrot.lane.b32.xlu0 %v2191_v63, %s2228_s9 }
 0xfa4   :  { %v2193_v6 = vpop.eup %2192 }
 0xfa5   :  { %1328 = vrot.lane.b32.xlu1 %v2193_v6, %s2228_s9 }
0x1013   :  { %v1256_v7 = vpop.permute.xlu0 %1255 }
0x1014   :  { %v1258_v9 = vmul.f32 %v2187_v49, %v1256_v7  ;;  %v1849_v7 = vld [vmem:[%s2792_s1 + $0x1] sm:$0x1] }
0x1015   :  { %105 = vst [vmem:[#allocation5] sm:$0x1] %v1849_v7 }
0x1016   :  { %v2562_v10 = vpack.c.bf16 %v1258_v9, %v1258_v9  ;;  %v1563_v9 = vld [vmem:[#allocation4 + $0x7] sm:$0x1] }
0x1017   :  { %v1329_v8 = vpop.permute.xlu1 %1328 }
0x1018   :  { %v1331_v11 = vmul.f32 %v2189_v52, %v1329_v8  ;;  %1377 = vrot.lane.b32.xlu0 %v2562_v10, %s2229_s14  ;;  %v1564_v8 = vunpack.c.l.bf16 %v1563_v9 }
0x101a   :  { %v2566_v12 = vpack.c.bf16 %v1331_v11, %v1331_v11 }
0x101c   :  { %1450 = vrot.lane.b32.xlu1 %v2566_v12, %s2229_s14  ;;  %v1635_v11 = vld [vmem:[#allocation5] sm:$0x1] }
0x101d   :  { %v1636_v16 = vunpack.c.l.bf16 %v1635_v11 }
0x108a   :  { %v1378_v13 = vpop.permute.xlu0 %1377 }
0x108b   :  { %2060 = vmatmul.mubr.msk.bf16.vlgmr.msra.gmra.mrb[24].mxu0 %vm217_vm2, %v1378_v13 }
0x108c   :  { %2072 = vmatpush3.bf16.msra.mxu0 %v2276_v0  ;;  %2075 = vmatprep.mubr.msk.bf16.mxu0 %vm2227_vm0, %v2226_v1  ;;  %v1850_v0 = vld [vmem:[%s2792_s1 + $0x3] sm:$0x1] }
0x108d   :  { %2073 = vmatprep.subr.bf16.mxu0 %v2226_v1  ;;  %107 = vst [vmem:[#allocation5 + $0x1] sm:$0x1] %v1850_v0 }
0x108e   :  { %v1451_v15 = vpop.permute.xlu1 %1450 }
0x108f   :  { %2068 = vmatmul.mubr.msk.bf16.vlgmr.msra.gmra.mrb[24].mxu1 %vm217_vm2, %v1451_v15 }
0x1090   :  { %2080 = vmatpush3.bf16.msra.mxu1 %v2283_v2  ;;  %2074 = vmatpush3.bf16.msra.mxu0 %v2289_v3 }
0x1091   :  { %2081 = vmatprep.subr.bf16.mxu1 %v2226_v1  ;;  %2083 = vmatprep.mubr.msk.bf16.mxu1 %vm2227_vm0, %v2226_v1 }
0x1094   :  { %2082 = vmatpush3.bf16.msra.mxu1 %v2298_v4  ;;  %v1448_v19 = vld [vmem:[#allocation5 + $0x1] sm:$0x1] }
0x1095   :  { %v1449_v23 = vunpack.c.l.bf16 %v1448_v19 }
0x115e   :  { %v1416_v20 = vpop.f32.mrb[24].mxu0 }
0x115f   :  { %v1422_v22 = vadd.f32 %v1416_v20, %v1376_v18  ;;  %v2061_v2 = vpop.f32.mrb[25].mxu0 }
0x1160   :  { %v1419_v3 = vpop.f32.mrb[26].mxu0 }
0x1161   :  { %2194 = vtanh.f32 %v1422_v22  ;;  %v2062_v25 = vpop.f32.mrb[27].mxu0  ;;  %v1899_v32 = vmul.f32 -1.442695, %v1422_v22 }
0x1162   :  { %v1489_v26 = vpop.f32.mrb[24].mxu1 }
0x1163   :  { %v1495_v27 = vadd.f32 %v1489_v26, %v1449_v23  ;;  %v2069_v1 = vpop.f32.mrb[25].mxu1 }
0x1164   :  { %v1492_v28 = vpop.f32.mrb[26].mxu1 }
0x1165   :  { %2196 = vtanh.f32 %v1495_v27  ;;  %v2070_v4 = vpop.f32.mrb[27].mxu1  ;;  %v1901_v34 = vmul.f32 -1.442695, %v1495_v27 }
0x1166   :  { %2198 = vpow2.f32 %v1899_v32 }
0x1167   :  { %2200 = vpow2.f32 %v1901_v34 }
0x116b   :  { %v2195_v29 = vpop.eup %2194 }
0x116c   :  { %1432 = vrot.lane.b32.xlu0 %v2195_v29, %s2228_s9 }
0x116f   :  { %v2197_v31 = vpop.eup %2196 }
0x1170   :  { %1505 = vrot.lane.b32.xlu1 %v2197_v31, %s2228_s9  ;;  %v2199_v35 = vpop.eup %2198 }
0x1171   :  { %v1426_v36 = vadd.f32 1.0, %v2199_v35  ;;  %v2201_v37 = vpop.eup %2200 }
0x1172   :  { %v1499_v38 = vadd.f32 1.0, %v2201_v37 }
0x1173   :  { %2202 = vrcp.f32 %v1426_v36 }
0x1174   :  { %2204 = vrcp.f32 %v1499_v38 }
0x117d   :  { %v2203_v39 = vpop.eup %2202 }
0x117e   :  { %v2205_v43 = vpop.eup %2204  ;;  %v1430_v47 = vmul.f32 %v2203_v39, %v2550_v59 }
0x117f   :  { %v1503_v50 = vmul.f32 %v2205_v43, %v2554_v62 }
0x11de   :  { %v1433_v40 = vpop.permute.xlu0 %1432 }
0x11df   :  { %v1435_v42 = vmul.f32 %v2203_v39, %v1433_v40  ;;  %v2230_v40 = vmov 1966171168  }
0x11e1   :  { %1437 = vrot.lane.b32.xlu0 %v1435_v42, %s2228_s9  ;;  %v395_v42 = vunpack.c.l.s4 %v2230_v40 }
0x11e2   :  { %v1506_v45 = vpop.permute.xlu1 %1505 }
0x11e3   :  { %v1508_v46 = vmul.f32 %v2205_v43, %v1506_v45 }
0x11e5   :  { %1510 = vrot.lane.b32.xlu1 %v1508_v46, %s2228_s9 }
0x1253   :  { %v1438_v48 = vpop.permute.xlu0 %1437 }
0x1254   :  { %v2590_v49 = vadd.f32 %v1438_v48, %v1430_v47  ;;  %v396_v48 = vunpack.c.0.s8 %v395_v42 }
0x1256   :  { %2206 = vtanh.f32 %v2590_v49 }
0x1257   :  { %v1511_v51 = vpop.permute.xlu1 %1510 }
0x1258   :  { %v2594_v52 = vadd.f32 %v1511_v51, %v1503_v50 }
0x125a   :  { %2208 = vtanh.f32 %v2594_v52 }
0x1260   :  { %v2207_v53 = vpop.eup %2206 }
0x1261   :  { %1443 = vrot.lane.b32.xlu0 %v2207_v53, %s2228_s9 }
0x1264   :  { %v2209_v55 = vpop.eup %2208 }
0x1265   :  { %1516 = vrot.lane.b32.xlu1 %v2209_v55, %s2228_s9 }
0x12d3   :  { %v1444_v58 = vpop.permute.xlu0 %1443 }
0x12d4   :  { %v1446_v59 = vmul.f32 %v2203_v39, %v1444_v58 }
0x12d6   :  { %v2602_v60 = vpack.c.bf16 %v1446_v59, %v1446_v59 }
0x12d7   :  { %v1517_v61 = vpop.permute.xlu1 %1516 }
0x12d8   :  { %v1519_v62 = vmul.f32 %v2205_v43, %v1517_v61  ;;  %1565 = vrot.lane.b32.xlu0 %v2602_v60, %s2229_s14  ;;  %v397_v43 = vlaneseq }
0x12da   :  { %v2606_v63 = vpack.c.bf16 %v1519_v62, %v1519_v62  ;;  %v398_v50 = vshrl.u32 %v397_v43, 7 }
0x12dc   :  { %1637 = vrot.lane.b32.xlu1 %v2606_v63, %s2229_s14  ;;  %v2635_v55 = vsub.s32 %v396_v48, %v398_v50 }
0x12de   :  { %v421_v58 = vrot.slane %v2356_v57, %v2635_v55  ;;  %v609_v62 = vrot.slane %v2398_v44, %v2635_v55  ;;  %v1152_v9 = vrot.slane %v2520_v14, %v2635_v55  ;;  %v1340_v11 = vrot.slane %v2562_v10, %v2635_v55 }
0x12df   :  { %v1361_v14 = vrot.slane %v2566_v12, %v2635_v55  ;;  %v1549_v10 = vrot.slane %v2606_v63, %v2635_v55 }
0x12e0   :  { %v616_v7 = vrot.slane %v609_v62, %v2635_v55 }
0x12e1   :  { %v1556_v12 = vrot.slane %v1549_v10, %v2635_v55 }
0x134a   :  { %v1566_v6 = vpop.permute.xlu0 %1565 }
0x134b   :  { %2076 = vmatmul.mubr.msk.bf16.vlgmr.msra.gmra.mrb[28].mxu0 %vm217_vm2, %v1566_v6  ;;  %v428_v6 = vrot.slane %v421_v58, %v2635_v55 }
0x134e   :  { %v1638_v5 = vpop.permute.xlu1 %1637 }
0x134f   :  { %2084 = vmatmul.mubr.msk.bf16.vlgmr.msra.gmra.mrb[28].mxu1 %vm217_vm2, %v1638_v5  ;;  %v964_v5 = vrot.slane %v2478_v21, %v2635_v55  ;;  %v1173_v21 = vrot.slane %v2524_v17, %v2635_v55  ;;  %v1347_v17 = vrot.slane %v1340_v11, %v2635_v55 }
0x141e   :  { %v1604_v13 = vpop.f32.mrb[28].mxu0 }
0x141f   :  { %v1610_v15 = vadd.f32 %v1604_v13, %v1564_v8  ;;  %v2077_v0 = vpop.f32.mrb[29].mxu0 }
0x1420   :  { %v1607_v18 = vpop.f32.mrb[30].mxu0  ;;  %v1180_v0 = vrot.slane %v1173_v21, %v2635_v55 }
0x1421   :  { %2210 = vtanh.f32 %v1610_v15  ;;  %v2078_v19 = vpop.f32.mrb[31].mxu0  ;;  %v1905_v27 = vmul.f32 -1.442695, %v1610_v15  ;;  %v1528_v15 = vrot.slane %v2602_v60, %v2635_v55  ;;  %v2231_v60 = vmov 1983009808  }
0x1422   :  { %v1676_v20 = vpop.f32.mrb[28].mxu1  ;;  %v1750_v19 = vunpack.c.l.s4 %v2231_v60 }
0x1423   :  { %v1682_v22 = vadd.f32 %v1676_v20, %v1636_v16  ;;  %v2085_v2 = vpop.f32.mrb[29].mxu1  ;;  %v1368_v16 = vrot.slane %v1361_v14, %v2635_v55  ;;  %v1535_v18 = vrot.slane %v1528_v15, %v2635_v55 }
0x1424   :  { %v1679_v23 = vpop.f32.mrb[30].mxu1  ;;  %v1751_v20 = vunpack.c.0.s8 %v1750_v19 }
0x1425   :  { %2212 = vtanh.f32 %v1682_v22  ;;  %v2086_v3 = vpop.f32.mrb[31].mxu1  ;;  %v1907_v1 = vmul.f32 -1.442695, %v1682_v22 }
0x1426   :  { %2214 = vpow2.f32 %v1905_v27  ;;  %v1754_v2 = vsub.s32 %v1751_v20, %v398_v50 }
0x1427   :  { %2216 = vpow2.f32 %v1907_v1 }
0x142b   :  { %v2211_v25 = vpop.eup %2210 }
0x142c   :  { %1620 = vrot.lane.b32.xlu0 %v2211_v25, %s2228_s9 }
0x142f   :  { %v2213_v26 = vpop.eup %2212 }
0x1430   :  { %1692 = vrot.lane.b32.xlu1 %v2213_v26, %s2228_s9  ;;  %v2215_v28 = vpop.eup %2214 }
0x1431   :  { %v1614_v4 = vadd.f32 1.0, %v2215_v28  ;;  %v2217_v29 = vpop.eup %2216 }
0x1432   :  { %v1686_v31 = vadd.f32 1.0, %v2217_v29 }
0x1433   :  { %2218 = vrcp.f32 %v1614_v4 }
0x1434   :  { %2220 = vrcp.f32 %v1686_v31 }
0x143d   :  { %v2617_v32 = vpop.eup %2218 }
0x143e   :  { %v2621_v36 = vpop.eup %2220  ;;  %v1618_v39 = vmul.f32 %v2617_v32, %v2590_v49  ;;  %v400_v49 = vrot.slane %v2352_v54, %v2635_v55  ;;  %v776_v54 = vrot.slane %v2436_v30, %v2635_v55  ;;  %v985_v30 = vrot.slane %v2482_v24, %v2635_v55 }
0x143f   :  { %v1690_v47 = vmul.f32 %v2621_v36, %v2594_v52  ;;  %v588_v52 = vrot.slane %v2394_v41, %v2635_v55  ;;  %v797_v41 = vrot.slane %v2440_v33, %v2635_v55  ;;  %v971_v33 = vrot.slane %v964_v5, %v2635_v55 }
0x1440   :  { %v407_v59 = vrot.slane %v400_v49, %v2635_v55  ;;  %v783_v44 = vrot.slane %v776_v54, %v2635_v55  ;;  %v992_v13 = vrot.slane %v985_v30, %v2635_v55  ;;  %v1159_v24 = vrot.slane %v1152_v9, %v2635_v55 }
0x1441   :  { %v595_v57 = vrot.slane %v588_v52, %v2635_v55  ;;  %v804_v8 = vrot.slane %v797_v41, %v2635_v55 }
0x149e   :  { %v1621_v34 = vpop.permute.xlu0 %1620 }
0x149f   :  { %v1623_v35 = vmul.f32 %v2617_v32, %v1621_v34 }
0x14a1   :  { %1625 = vrot.lane.b32.xlu0 %v1623_v35, %s2228_s9 }
0x14a2   :  { %v1693_v37 = vpop.permute.xlu1 %1692 }
0x14a3   :  { %v1695_v38 = vmul.f32 %v2621_v36, %v1693_v37 }
0x14a5   :  { %1697 = vrot.lane.b32.xlu1 %v1695_v38, %s2228_s9 }
0x1513   :  { %v1626_v45 = vpop.permute.xlu0 %1625 }
0x1514   :  { %v2627_v46 = vadd.f32 %v1626_v45, %v1618_v39 }
0x1516   :  { %2222 = vtanh.f32 %v2627_v46  ;;  %v1780_v35 = vrot.slane %v2627_v46, %v1754_v2 }
0x1517   :  { %v1698_v51 = vpop.permute.xlu1 %1697 }
0x1518   :  { %v2632_v53 = vadd.f32 %v1698_v51, %v1690_v47 }
0x151a   :  { %2224 = vtanh.f32 %v2632_v53  ;;  %v1792_v39 = vrot.slane %v2632_v53, %v1754_v2 }
0x1520   :  { %v2223_v56 = vpop.eup %2222 }
0x1521   :  { %1631 = vrot.lane.b32.xlu0 %v2223_v56, %s2228_s9 }
0x1524   :  { %v2225_v61 = vpop.eup %2224 }
0x1525   :  { %1703 = vrot.lane.b32.xlu1 %v2225_v61, %s2228_s9  ;;  %408 = vrot.lane.b32.xlu0 %v407_v59, %s2229_s14 }
0x1529   :  { %429 = vrot.lane.b32.xlu1 %v428_v6, %s2229_s14  ;;  %596 = vrot.lane.b32.xlu0 %v595_v57, %s2229_s14 }
0x152d   :  { %617 = vrot.lane.b32.xlu1 %v616_v7, %s2229_s14  ;;  %784 = vrot.lane.b32.xlu0 %v783_v44, %s2229_s14 }
0x1531   :  { %805 = vrot.lane.b32.xlu1 %v804_v8, %s2229_s14  ;;  %972 = vrot.lane.b32.xlu0 %v971_v33, %s2229_s14 }
0x1535   :  { %993 = vrot.lane.b32.xlu1 %v992_v13, %s2229_s14  ;;  %1160 = vrot.lane.b32.xlu0 %v1159_v24, %s2229_s14 }
0x1539   :  { %1181 = vrot.lane.b32.xlu1 %v1180_v0, %s2229_s14  ;;  %1348 = vrot.lane.b32.xlu0 %v1347_v17, %s2229_s14 }
0x153d   :  { %1369 = vrot.lane.b32.xlu1 %v1368_v16, %s2229_s14  ;;  %1536 = vrot.lane.b32.xlu0 %v1535_v18, %s2229_s14 }
0x1541   :  { %1557 = vrot.lane.b32.xlu1 %v1556_v12, %s2229_s14 }
0x1593   :  { %v1632_v22 = vpop.permute.xlu0 %1631 }
0x1594   :  { %v1634_v23 = vmul.f32 %v2617_v32, %v1632_v22 }
0x1596   :  { %v1707_v63 = vpack.c.bf16 %v1634_v23, %v1634_v23  ;;  %v1755_v3 = vrot.slane %v1634_v23, %v1754_v2 }
0x1597   :  { %v1704_v25 = vpop.permute.xlu1 %1703  ;;  %v409_v26 = vpop.permute.xlu0 %408 }
0x1598   :  { %v1715_v27 = vrot.slane %v1707_v63, %v2635_v55  ;;  %v1706_v1 = vmul.f32 %v2621_v36, %v1704_v25  ;;  %412 = vst.msk [vmem:[%s2795_s4] sm:$0x1] %vm411_vm3, %v409_v26  ;;  %1756 = vrot.lane.b32.xlu0 %v1755_v3, %s2229_s14 }
0x159a   :  { %v1728_v28 = vpack.c.bf16 %v1706_v1, %v1706_v1  ;;  %v1768_v4 = vrot.slane %v1706_v1, %v1754_v2  ;;  %v1722_v29 = vrot.slane %v1715_v27, %v2635_v55 }
0x159b   :  { %v430_v31 = vpop.permute.xlu1 %429  ;;  %v597_v32 = vpop.permute.xlu0 %596 }
0x159c   :  { %v1736_v34 = vrot.slane %v1728_v28, %v2635_v55  ;;  %1867 = vst.msk [vmem:[%s2796_s5 + $0x7] sm:$0x1] %vm411_vm3, %v430_v31  ;;  %1872 = vst.msk [vmem:[%s2795_s4 + $0x1] sm:$0x1] %vm411_vm3, %v597_v32  ;;  %1769 = vrot.lane.b32.xlu1 %v1768_v4, %s2229_s14  ;;  %1723 = vrot.lane.b32.xlu0 %v1722_v29, %s2229_s14 }
0x159e   :  { %v1743_v36 = vrot.slane %v1736_v34, %v2635_v55 }
0x159f   :  { %v618_v37 = vpop.permute.xlu1 %617  ;;  %v785_v38 = vpop.permute.xlu0 %784 }
0x15a0   :  { %1873 = vst.msk [vmem:[%s2796_s5 + $0x6] sm:$0x1] %vm411_vm3, %v618_v37  ;;  %1878 = vst.msk [vmem:[%s2795_s4 + $0x2] sm:$0x1] %vm411_vm3, %v785_v38  ;;  %1744 = vrot.lane.b32.xlu1 %v1743_v36, %s2229_s14  ;;  %1781 = vrot.lane.b32.xlu0 %v1780_v35, %s2232_s25 }
0x15a3   :  { %v806_v40 = vpop.permute.xlu1 %805  ;;  %v973_v42 = vpop.permute.xlu0 %972 }
0x15a4   :  { %1879 = vst.msk [vmem:[%s2796_s5 + $0x5] sm:$0x1] %vm411_vm3, %v806_v40  ;;  %1884 = vst.msk [vmem:[%s2795_s4 + $0x3] sm:$0x1] %vm411_vm3, %v973_v42  ;;  %1793 = vrot.lane.b32.xlu1 %v1792_v39, %s2232_s25 }
0x15a7   :  { %v994_v43 = vpop.permute.xlu1 %993  ;;  %v1161_v45 = vpop.permute.xlu0 %1160 }
0x15a8   :  { %1885 = vst.msk [vmem:[%s2796_s5 + $0x4] sm:$0x1] %vm411_vm3, %v994_v43  ;;  %1890 = vst.msk [vmem:[%s2795_s4 + $0x4] sm:$0x1] %vm411_vm3, %v1161_v45 }
0x15ab   :  { %v1182_v46 = vpop.permute.xlu1 %1181  ;;  %v1349_v47 = vpop.permute.xlu0 %1348 }
0x15ac   :  { %1891 = vst.msk [vmem:[%s2796_s5 + $0x3] sm:$0x1] %vm411_vm3, %v1182_v46  ;;  %1896 = vst.msk [vmem:[%s2795_s4 + $0x5] sm:$0x1] %vm411_vm3, %v1349_v47 }
0x15af   :  { %v1370_v48 = vpop.permute.xlu1 %1369  ;;  %v1537_v50 = vpop.permute.xlu0 %1536 }
0x15b0   :  { %1897 = vst.msk [vmem:[%s2796_s5 + $0x2] sm:$0x1] %vm411_vm3, %v1370_v48  ;;  %1902 = vst.msk [vmem:[%s2795_s4 + $0x6] sm:$0x1] %vm411_vm3, %v1537_v50 }
0x15b3   :  { %v1558_v51 = vpop.permute.xlu1 %1557 }
0x15b4   :  { %1903 = vst.msk [vmem:[%s2796_s5 + $0x1] sm:$0x1] %vm411_vm3, %v1558_v51 }
0x160a   :  { %v1757_v53 = vpop.permute.xlu0 %1756 }
0x160b   :  { %1760 = vst.msk [vmem:[#allocation2] sm:$0x3] %vm183_vm1, %v1757_v53  ;;  %1800 = vst.msk [vmem:[%s2797_s6] sm:$0x3] %vm183_vm1, %v1757_v53 }
0x160e   :  { %v1770_v55 = vpop.permute.xlu1 %1769  ;;  %v1724_v49 = vpop.permute.xlu0 %1723 }
0x160f   :  { %1772 = vst.msk [vmem:[#allocation2 + $0x2] sm:$0x3] %vm183_vm1, %v1770_v55  ;;  %1909 = vst.msk [vmem:[%s2797_s6 + $0x2] sm:$0x3] %vm183_vm1, %v1770_v55 }
0x1610   :  { %1908 = vst.msk [vmem:[%s2795_s4 + $0x7] sm:$0x1] %vm411_vm3, %v1724_v49 }
0x1612   :  { %v1745_v56 = vpop.permute.xlu1 %1744  ;;  %v1782_v58 = vpop.permute.xlu0 %1781 }
0x1613   :  { %1747 = vst.msk [vmem:[%s2796_s5] sm:$0x1] %vm411_vm3, %v1745_v56 }
0x1614   :  { %1784 = vst.msk [vmem:[#allocation3] sm:$0x3] %vm183_vm1, %v1782_v58  ;;  %1803 = vst.msk [vmem:[%s2798_s7] sm:$0x3] %vm183_vm1, %v1782_v58 }
0x1616   :  { %v1794_v52 = vpop.permute.xlu1 %1793 }
0x1617   :  { %1796 = vst.msk [vmem:[#allocation3 + $0x2] sm:$0x3] %vm183_vm1, %v1794_v52  ;;  %1910 = vst.msk [vmem:[%s2798_s7 + $0x2] sm:$0x3] %vm183_vm1, %v1794_v52 }

</bundles_post_ra>
